<compile_context>
chip_gen: v6e
topology: v6e:2x2x1
jax: 0.10.0
libtpu: 0.0.40
codegen_flags: <defaults>
</compile_context>

<pallas_src>
import jax
import jax.numpy as jnp
from jax import lax
from jax.experimental import pallas as pl
from jax.experimental.pallas import tpu as pltpu

_LANE = 128
_UNROLL_MAX_T = 8   # forward_t above this switches to the lax.fori_loop rollout


def _round_up(n, m):
    return ((n + m - 1) // m) * m


def _pad2(a, rows, cols, dtype):
    a = jnp.asarray(a, dtype)
    pr, pc = rows - a.shape[0], cols - a.shape[1]
    if pr or pc:
        a = jnp.pad(a, ((0, pr), (0, pc)))
    return a


def _vmem_capacity_bytes():
    try:
        return int(pltpu.get_tpu_info().vmem_capacity_bytes)
    except Exception:
        return 64 * 1024 * 1024            # conservative fallback (v7x per-core VMEM)


def _num_tensorcores():
    # v7x has 2 TensorCores per chip; v5e / v6e have 1.
    try:
        kind = jax.devices()[0].device_kind.lower()
        if "v7" in kind:
            return 2
    except Exception:
        pass
    return 1


def _pick_batch_tile(B, num_tc, max_rows):
    """Largest batch tile that divides B, obeys the (8, *) block rule and the VMEM row cap.
    On multi-TensorCore chips prefer >= 2 tiles so the 'parallel' grid axis actually shards."""
    cands = [d for d in range(1, B + 1)
             if B % d == 0 and (d % 8 == 0 or d == B) and d <= max(max_rows, 8)]
    if not cands:
        cands = [B]
    if num_tc >= 2 and B >= 16:
        half = [d for d in cands if d <= B // 2]
        if half:
            return max(half)
    return max(cands)


def _make_kernel(L, Hp, Dp, forward_t, time_major):
    """Kernel body for fixed (static) sizes.

    Ref order:
      x (L, TB, D_in) bf16,
      w_emb (D_in, Hp) bf16, b_emb (1, Hp) f32,
      per layer k: w_ih (in_kp, 3Hp) bf16, w_hh (Hp, 3Hp) bf16,
                   b_rz (1, 2Hp) f32, b_in (1, Hp) f32, b_hn (1, Hp) f32,
      w_out (Hp, Dp) bf16, b_out (1, Dp) f32,
      out: (TB, forward_t*Dp) f32 [unrolled]  or  (forward_t, TB, Dp) f32 [time-major]
    """
    f32 = jnp.float32
    bf16 = jnp.bfloat16

    def kernel(*refs):
        it = iter(refs)
        x_ref = next(it)
        w_emb_ref = next(it)
        b_emb_ref = next(it)
        layers = []
        for _ in range(L):
            layers.append(dict(w_ih=next(it), w_hh=next(it),
                               b_rz=next(it), b_in=next(it), b_hn=next(it)))
        w_out_ref = next(it)
        b_out_ref = next(it)
        out_ref = next(it)

        TB = x_ref.shape[1]
        D_in = x_ref.shape[2]

        def gru_cell(xin_bf, h_pair, lyr):
            """One GRU cell.  xin_bf None == all-zero input (warm-up).  Returns (f32, bf16)."""
            hprev32, hprev_bf = h_pair
            # single fused hidden-side GEMM -> [r | z | n] lanes (each Hp wide, lane aligned)
            gh = jnp.dot(hprev_bf, lyr["w_hh"][...], preferred_element_type=f32)
            if xin_bf is None:
                # zero input: the input-side matmul is identically zero -> skip it (exact).
                pre_rz = gh[:, :2 * Hp] + lyr["b_rz"][...]
                gi_n = lyr["b_in"][...]
            else:
                gi = jnp.dot(xin_bf, lyr["w_ih"][...], preferred_element_type=f32)
                pre_rz = gi[:, :2 * Hp] + gh[:, :2 * Hp] + lyr["b_rz"][...]
                gi_n = gi[:, 2 * Hp:] + lyr["b_in"][...]
            rz = jax.nn.sigmoid(pre_rz)                       # one fused EUP pass for r and z
            r = rz[:, :Hp]
            z = rz[:, Hp:]
            n = jnp.tanh(gi_n + r * (gh[:, 2 * Hp:] + lyr["b_hn"][...]))
            h_new = n + z * (hprev32 - n)                     # == (1-z)*n + z*hprev
            return (h_new, h_new.astype(bf16))                # cast once, reuse everywhere

        def stack_step(xin_bf, h):
            """Run all L layers for one time step; returns (new h tuple, top-layer bf16)."""
            new_h = []
            for k in range(L):
                hk = gru_cell(xin_bf, h[k], layers[k])
                new_h.append(hk)
                xin_bf = hk[1]
            return tuple(new_h), xin_bf

        def predict(top_bf):
            return jnp.dot(top_bf, w_out_ref[...], preferred_element_type=f32) + b_out_ref[...]

        # ---- initial hidden per GRU layer: relu(input_embedding(x[:, k, :])) ----
        if TB % 8 == 0:
            # fuse the L embedding matmuls into one MXU push; sublane slices are free.
            xf = x_ref[...].reshape(L * TB, D_in)
            hf = jnp.maximum(
                jnp.dot(xf, w_emb_ref[...], preferred_element_type=f32) + b_emb_ref[...], 0.0)
            h_init = [hf[k * TB:(k + 1) * TB, :] for k in range(L)]
        else:
            h_init = [jnp.maximum(
                jnp.dot(x_ref[k], w_emb_ref[...], preferred_element_type=f32)
                + b_emb_ref[...], 0.0) for k in range(L)]
        h = tuple((hk, hk.astype(bf16)) for hk in h_init)

        # ---- t == 0 : GRU over L zero-input time steps (warm-up) ----
        for _step in range(L):
            h, _ = stack_step(None, h)
        out = predict(h[L - 1][1])                            # (TB, Dp) f32

        if time_major:
            out_ref[0] = out
        else:
            out_ref[:, 0:Dp] = out

        # ---- t = 1 .. forward_t-1 : single-step GRU fed with previous prediction ----
        if forward_t > 1:
            if time_major:
                def body(t, carry):
                    out_c, h_c = carry
                    h_n, top = stack_step(out_c.astype(bf16), h_c)
                    out_n = predict(top)
                    out_ref[t] = out_n                        # dynamic index on leading dim
                    return (out_n, h_n)
                lax.fori_loop(1, forward_t, body, (out, h))
            else:
                for t in range(1, forward_t):
                    h, top = stack_step(out.astype(bf16), h)
                    out = predict(top)
                    out_ref[:, t * Dp:(t + 1) * Dp] = out     # static, lane-aligned slice

    return kernel


def lstm_one_many_pallas(x, params, *, hidden_dim, layer_dim, output_dim, forward_t):
    B, T, D_in = x.shape
    assert T == layer_dim, "x.shape[1] must equal layer_dim (GRU initial hidden)"
    H, L, D_out = hidden_dim, layer_dim, output_dim
    f32, bf16 = jnp.float32, jnp.bfloat16

    Hp = _round_up(H, _LANE)          # lane-aligned hidden size -> free gate slicing
    Dp = _round_up(D_out, _LANE)      # lane-aligned output size -> unmasked stores

    # layer-major input for clean per-layer slicing; bf16 operands for the MXU
    x_lbd = jnp.transpose(x, (1, 0, 2)).astype(bf16)          # (L, B, D_in)

    args = [x_lbd,
            _pad2(params["w_emb"], D_in, Hp, bf16),
            _pad2(params["b_emb"], 1, Hp, f32)]
    for k in range(L):
        in_kp = Dp if k == 0 else Hp
        w_ih, w_hh = params[f"w_ih_{k}"], params[f"w_hh_{k}"]     # (in_k, 3H), (H, 3H)
        b_ih, b_hh = params[f"b_ih_{k}"], params[f"b_hh_{k}"]     # (1, 3H)
        # Fused gate weights, each gate zero-padded to Hp lanes (padding is exact: padded
        # lanes of h / out stay identically zero through the recurrence).
        w_ih_f = jnp.concatenate(
            [_pad2(w_ih[:, g * H:(g + 1) * H], in_kp, Hp, bf16) for g in range(3)], axis=1)
        w_hh_f = jnp.concatenate(
            [_pad2(w_hh[:, g * H:(g + 1) * H], Hp, Hp, bf16) for g in range(3)], axis=1)
        b_rz = jnp.concatenate(
            [_pad2(b_ih[:, g * H:(g + 1) * H] + b_hh[:, g * H:(g + 1) * H], 1, Hp, f32)
             for g in range(2)], axis=1)                          # b_ih+b_hh fused (exact)
        b_in = _pad2(b_ih[:, 2 * H:3 * H], 1, Hp, f32)
        b_hn = _pad2(b_hh[:, 2 * H:3 * H], 1, Hp, f32)            # n-gate biases stay split
        args += [w_ih_f, w_hh_f, b_rz, b_in, b_hn]
    args += [_pad2(params["w_out"], Hp, Dp, bf16),
             _pad2(params["b_out"], 1, Dp, f32)]

    weight_bytes = sum(int(a.size) * a.dtype.itemsize for a in args[1:])
    vmem_cap = _vmem_capacity_bytes()
    num_tc = _num_tensorcores()

    # rough per-batch-row VMEM activation footprint (states, gate slabs, out/x tiles)
    per_row = L * Hp * 6 + 16 * Hp * 4 + forward_t * Dp * 8 + L * D_in * 4
    act_budget = max(vmem_cap - 2 * weight_bytes - (12 << 20), 4 << 20)
    TB = _pick_batch_tile(B, num_tc, act_budget // per_row)
    nb = B // TB

    time_major = forward_t > _UNROLL_MAX_T

    # Replicated (constant index map) weights; single-buffer them once they are big enough
    # that the default double buffering would matter for VMEM residency (v7x: 64 MiB).
    single_buffer = 2 * weight_bytes > (8 << 20)

    def replicated(a):
        zeros = (0,) * a.ndim
        if single_buffer:
            return pl.BlockSpec(a.shape, lambda i, _z=zeros: _z,
                                pipeline_mode=pl.Buffered(1))
        return pl.BlockSpec(a.shape, lambda i, _z=zeros: _z)

    in_specs = [pl.BlockSpec((L, TB, D_in), lambda i: (0, i, 0))]
    in_specs += [replicated(a) for a in args[1:]]
    if time_major:
        out_shape = jax.ShapeDtypeStruct((forward_t, B, Dp), f32)
        out_spec = pl.BlockSpec((forward_t, TB, Dp), lambda i: (0, i, 0))
    else:
        out_shape = jax.ShapeDtypeStruct((B, forward_t * Dp), f32)
        out_spec = pl.BlockSpec((TB, forward_t * Dp), lambda i: (i, 0))

    # Scoped-VMEM limit: raise only when needed, never past physical VMEM (v7x: 64 MiB).
    tile_io_bytes = 2 * (L * TB * D_in * 2) + 2 * (TB * forward_t * Dp * 4)
    weight_buf = 1 if single_buffer else 2
    needed = weight_buf * weight_bytes + tile_io_bytes + TB * per_row + (4 << 20)
    vmem_limit = None
    if needed > (32 << 20):
        vmem_limit = int(min(needed, vmem_cap - (8 << 20)))

    kernel = _make_kernel(L, Hp, Dp, forward_t, time_major)
    out_raw = pl.pallas_call(
        kernel,
        out_shape=out_shape,
        grid=(nb,),
        in_specs=in_specs,
        out_specs=out_spec,
        compiler_params=pltpu.CompilerParams(
            dimension_semantics=("parallel",),
            vmem_limit_bytes=vmem_limit),
    )(*args)

    if time_major:
        preds = jnp.transpose(out_raw, (1, 0, 2))[:, :, :D_out]
    else:
        preds = out_raw.reshape(B, forward_t, Dp)[:, :, :D_out]
    return preds


def lstm_one_many_ref(x, params, *, hidden_dim, layer_dim, output_dim, forward_t):
    """Pure-JAX f32 reference with the PyTorch module's semantics (for verification)."""
    B, T, _ = x.shape
    H = hidden_dim
    h = [jnp.maximum(x[:, k, :] @ params["w_emb"] + params["b_emb"], 0.0)
         for k in range(layer_dim)]

    def cell(xin, hp, k):
        gi = xin @ params[f"w_ih_{k}"] + params[f"b_ih_{k}"]
        gh = hp @ params[f"w_hh_{k}"] + params[f"b_hh_{k}"]
        r = jax.nn.sigmoid(gi[:, :H] + gh[:, :H])
        z = jax.nn.sigmoid(gi[:, H:2 * H] + gh[:, H:2 * H])
        n = jnp.tanh(gi[:, 2 * H:] + r * gh[:, 2 * H:])
        return (1.0 - z) * n + z * hp

    preds = []
    for _step in range(layer_dim):
        xin = jnp.zeros((B, output_dim), jnp.float32)
        for k in range(layer_dim):
            h[k] = cell(xin, h[k], k)
            xin = h[k]
    out = h[layer_dim - 1] @ params["w_out"] + params["b_out"]
    preds.append(out)
    for _t in range(1, forward_t):
        xin = out
        for k in range(layer_dim):
            h[k] = cell(xin, h[k], k)
            xin = h[k]
        out = xin @ params["w_out"] + params["b_out"]
        preds.append(out)
    return jnp.stack(preds, axis=1)


def init_params(key, *, input_dim, hidden_dim, layer_dim, output_dim):
    """Deterministic PyTorch-style uniform(-1/sqrt(fan), 1/sqrt(fan)) init (fused-gate form)."""
    H = hidden_dim
    params = {}
    ks = iter(jax.random.split(key, 4 + 4 * layer_dim))

    def u(k, shape, fan):
        bound = 1.0 / jnp.sqrt(fan)
        return jax.random.uniform(k, shape, jnp.float32, -bound, bound)

    params["w_emb"] = u(next(ks), (input_dim, H), input_dim)
    params["b_emb"] = u(next(ks), (1, H), input_dim)
    for k in range(layer_dim):
        in_k = output_dim if k == 0 else H
        params[f"w_ih_{k}"] = u(next(ks), (in_k, 3 * H), H)
        params[f"w_hh_{k}"] = u(next(ks), (H, 3 * H), H)
        params[f"b_ih_{k}"] = u(next(ks), (1, 3 * H), H)
        params[f"b_hh_{k}"] = u(next(ks), (1, 3 * H), H)
    params["w_out"] = u(next(ks), (H, output_dim), H)
    params["b_out"] = u(next(ks), (1, output_dim), H)
    return params


if __name__ == "__main__":
    # x: (B, layer_dim, input_dim); predictions: (B, forward_t, output_dim)
    key = jax.random.PRNGKey(0)

    def run_case(case_id, B, input_dim, hidden_dim, layer_dim, output_dim, forward_t):
        kx, kp = jax.random.split(jax.random.fold_in(key, case_id))
        x = jax.random.normal(kx, (B, layer_dim, input_dim), jnp.float32)
        params = init_params(kp, input_dim=input_dim, hidden_dim=hidden_dim,
                             layer_dim=layer_dim, output_dim=output_dim)
        preds = lstm_one_many_pallas(x, params, hidden_dim=hidden_dim, layer_dim=layer_dim,
                                     output_dim=output_dim, forward_t=forward_t)
        preds = jax.block_until_ready(preds)
        ref = lstm_one_many_ref(x, params, hidden_dim=hidden_dim, layer_dim=layer_dim,
                                output_dim=output_dim, forward_t=forward_t)
        assert preds.shape == (B, forward_t, output_dim)
        # kernel uses bf16 weights/activations on the MXU with f32 accumulation,
        # so compare against the f32 reference with a loosened tolerance.
        err = float(jnp.max(jnp.abs(preds - ref)))
        assert jnp.allclose(preds, ref, atol=5e-2, rtol=5e-2), \
            f"case {case_id}: mismatch vs JAX reference (max abs err {err:.4f})"

    # small config from the module (fully unrolled, batch-major lane-dense output)
    run_case(0, B=2, input_dim=8, hidden_dim=32, layer_dim=2, output_dim=8, forward_t=4)
    # longer horizon exercises the lax.fori_loop rollout (time-major output block)
    run_case(1, B=2, input_dim=8, hidden_dim=32, layer_dim=2, output_dim=8, forward_t=12)
    print("KERNEL_OK")
</pallas_src>

<mosaic_0001>
module attributes {stable_mosaic.version = 11 : i64} {
  func.func @kernel(%arg0: i32, %arg1: memref<2x2x8xbf16, #tpu.memory_space<vmem>>, %arg2: memref<8x128xbf16, #tpu.memory_space<vmem>>, %arg3: memref<1x128xf32, #tpu.memory_space<vmem>>, %arg4: memref<128x384xbf16, #tpu.memory_space<vmem>>, %arg5: memref<128x384xbf16, #tpu.memory_space<vmem>>, %arg6: memref<1x256xf32, #tpu.memory_space<vmem>>, %arg7: memref<1x128xf32, #tpu.memory_space<vmem>>, %arg8: memref<1x128xf32, #tpu.memory_space<vmem>>, %arg9: memref<128x384xbf16, #tpu.memory_space<vmem>>, %arg10: memref<128x384xbf16, #tpu.memory_space<vmem>>, %arg11: memref<1x256xf32, #tpu.memory_space<vmem>>, %arg12: memref<1x128xf32, #tpu.memory_space<vmem>>, %arg13: memref<1x128xf32, #tpu.memory_space<vmem>>, %arg14: memref<128x128xbf16, #tpu.memory_space<vmem>>, %arg15: memref<1x128xf32, #tpu.memory_space<vmem>>, %arg16: memref<2x512xf32, #tpu.memory_space<vmem>>) attributes {dimension_semantics = [#tpu.dimension_semantics<parallel>], iteration_bounds = array<i64: 1>, scalar_prefetch = 0 : i64, scratch_operands = 0 : i64, tpu.core_type = #tpu.core_type<tc>, window_params = [{transform_indices = @transform_0, window_bounds = array<i64: 2, 2, 8>}, {pipeline_mode = #tpu.pipeline_mode<synchronous>, transform_indices = @transform_1, window_bounds = array<i64: 8, 128>}, {pipeline_mode = #tpu.pipeline_mode<synchronous>, transform_indices = @transform_2, window_bounds = array<i64: 1, 128>}, {pipeline_mode = #tpu.pipeline_mode<synchronous>, transform_indices = @transform_3, window_bounds = array<i64: 128, 384>}, {pipeline_mode = #tpu.pipeline_mode<synchronous>, transform_indices = @transform_4, window_bounds = array<i64: 128, 384>}, {pipeline_mode = #tpu.pipeline_mode<synchronous>, transform_indices = @transform_5, window_bounds = array<i64: 1, 256>}, {pipeline_mode = #tpu.pipeline_mode<synchronous>, transform_indices = @transform_6, window_bounds = array<i64: 1, 128>}, {pipeline_mode = #tpu.pipeline_mode<synchronous>, transform_indices = @transform_7, window_bounds = array<i64: 1, 128>}, {pipeline_mode = #tpu.pipeline_mode<synchronous>, transform_indices = @transform_8, window_bounds = array<i64: 128, 384>}, {pipeline_mode = #tpu.pipeline_mode<synchronous>, transform_indices = @transform_9, window_bounds = array<i64: 128, 384>}, {pipeline_mode = #tpu.pipeline_mode<synchronous>, transform_indices = @transform_10, window_bounds = array<i64: 1, 256>}, {pipeline_mode = #tpu.pipeline_mode<synchronous>, transform_indices = @transform_11, window_bounds = array<i64: 1, 128>}, {pipeline_mode = #tpu.pipeline_mode<synchronous>, transform_indices = @transform_12, window_bounds = array<i64: 1, 128>}, {pipeline_mode = #tpu.pipeline_mode<synchronous>, transform_indices = @transform_13, window_bounds = array<i64: 128, 128>}, {pipeline_mode = #tpu.pipeline_mode<synchronous>, transform_indices = @transform_14, window_bounds = array<i64: 1, 128>}, {transform_indices = @transform_15, window_bounds = array<i64: 2, 512>}]} {
    %c0 = arith.constant 0 : index
    %c0_0 = arith.constant 0 : index
    %c0_1 = arith.constant 0 : index
    %0 = vector.load %arg1[%c0, %c0_0, %c0_1] : memref<2x2x8xbf16, #tpu.memory_space<vmem>>, vector<1x2x8xbf16>
    %1 = vector.shape_cast %0 : vector<1x2x8xbf16> to vector<2x8xbf16>
    %c0_2 = arith.constant 0 : index
    %c0_3 = arith.constant 0 : index
    %2 = vector.load %arg2[%c0_2, %c0_3] : memref<8x128xbf16, #tpu.memory_space<vmem>>, vector<8x128xbf16>
    %cst = arith.constant dense<0.000000e+00> : vector<2x128xf32>
    %3 = tpu.matmul %1, %2, %cst {dimension_numbers = #tpu.dot_dimension_numbers<[1], [0], [0], [1], [0, 0, 1, 1], [], []>} : vector<2x8xbf16>, vector<8x128xbf16>, vector<2x128xf32> -> vector<2x128xf32>
    %c0_4 = arith.constant 0 : index
    %c0_5 = arith.constant 0 : index
    %4 = vector.load %arg3[%c0_4, %c0_5] : memref<1x128xf32, #tpu.memory_space<vmem>>, vector<1x128xf32>
    %5 = vector.broadcast %4 : vector<1x128xf32> to vector<2x128xf32>
    %6 = arith.addf %3, %5 : vector<2x128xf32>
    %cst_6 = arith.constant 0.000000e+00 : f32
    %7 = vector.broadcast %cst_6 : f32 to vector<2x128xf32>
    %8 = arith.maximumf %6, %7 : vector<2x128xf32>
    %c1 = arith.constant 1 : index
    %c0_7 = arith.constant 0 : index
    %c0_8 = arith.constant 0 : index
    %9 = vector.load %arg1[%c1, %c0_7, %c0_8] : memref<2x2x8xbf16, #tpu.memory_space<vmem>>, vector<1x2x8xbf16>
    %10 = vector.shape_cast %9 : vector<1x2x8xbf16> to vector<2x8xbf16>
    %c0_9 = arith.constant 0 : index
    %c0_10 = arith.constant 0 : index
    %11 = vector.load %arg2[%c0_9, %c0_10] : memref<8x128xbf16, #tpu.memory_space<vmem>>, vector<8x128xbf16>
    %cst_11 = arith.constant dense<0.000000e+00> : vector<2x128xf32>
    %12 = tpu.matmul %10, %11, %cst_11 {dimension_numbers = #tpu.dot_dimension_numbers<[1], [0], [0], [1], [0, 0, 1, 1], [], []>} : vector<2x8xbf16>, vector<8x128xbf16>, vector<2x128xf32> -> vector<2x128xf32>
    %c0_12 = arith.constant 0 : index
    %c0_13 = arith.constant 0 : index
    %13 = vector.load %arg3[%c0_12, %c0_13] : memref<1x128xf32, #tpu.memory_space<vmem>>, vector<1x128xf32>
    %14 = vector.broadcast %13 : vector<1x128xf32> to vector<2x128xf32>
    %15 = arith.addf %12, %14 : vector<2x128xf32>
    %cst_14 = arith.constant 0.000000e+00 : f32
    %16 = vector.broadcast %cst_14 : f32 to vector<2x128xf32>
    %17 = arith.maximumf %15, %16 : vector<2x128xf32>
    %18 = arith.truncf %8 : vector<2x128xf32> to vector<2x128xbf16>
    %19 = arith.truncf %17 : vector<2x128xf32> to vector<2x128xbf16>
    %c0_15 = arith.constant 0 : index
    %c0_16 = arith.constant 0 : index
    %20 = vector.load %arg5[%c0_15, %c0_16] : memref<128x384xbf16, #tpu.memory_space<vmem>>, vector<128x384xbf16>
    %cst_17 = arith.constant dense<0.000000e+00> : vector<2x384xf32>
    %21 = tpu.matmul %18, %20, %cst_17 {dimension_numbers = #tpu.dot_dimension_numbers<[1], [0], [0], [1], [0, 0, 1, 1], [], []>} : vector<2x128xbf16>, vector<128x384xbf16>, vector<2x384xf32> -> vector<2x384xf32>
    %22 = vector.extract_strided_slice %21 {offsets = [0, 0], sizes = [2, 256], strides = [1, 1]} : vector<2x384xf32> to vector<2x256xf32>
    %c0_18 = arith.constant 0 : index
    %c0_19 = arith.constant 0 : index
    %23 = vector.load %arg6[%c0_18, %c0_19] : memref<1x256xf32, #tpu.memory_space<vmem>>, vector<1x256xf32>
    %24 = vector.broadcast %23 : vector<1x256xf32> to vector<2x256xf32>
    %25 = arith.addf %22, %24 : vector<2x256xf32>
    %c0_20 = arith.constant 0 : index
    %c0_21 = arith.constant 0 : index
    %26 = vector.load %arg7[%c0_20, %c0_21] : memref<1x128xf32, #tpu.memory_space<vmem>>, vector<1x128xf32>
    %27 = arith.negf %25 : vector<2x256xf32>
    %28 = math.exp %27 : vector<2x256xf32>
    %cst_22 = arith.constant 1.000000e+00 : f32
    %29 = vector.broadcast %cst_22 : f32 to vector<2x256xf32>
    %30 = arith.addf %29, %28 : vector<2x256xf32>
    %31 = arith.divf %29, %30 : vector<2x256xf32>
    %32 = vector.extract_strided_slice %31 {offsets = [0, 0], sizes = [2, 128], strides = [1, 1]} : vector<2x256xf32> to vector<2x128xf32>
    %33 = vector.extract_strided_slice %31 {offsets = [0, 128], sizes = [2, 128], strides = [1, 1]} : vector<2x256xf32> to vector<2x128xf32>
    %34 = vector.extract_strided_slice %21 {offsets = [0, 256], sizes = [2, 128], strides = [1, 1]} : vector<2x384xf32> to vector<2x128xf32>
    %c0_23 = arith.constant 0 : index
    %c0_24 = arith.constant 0 : index
    %35 = vector.load %arg8[%c0_23, %c0_24] : memref<1x128xf32, #tpu.memory_space<vmem>>, vector<1x128xf32>
    %36 = vector.broadcast %35 : vector<1x128xf32> to vector<2x128xf32>
    %37 = arith.addf %34, %36 : vector<2x128xf32>
    %38 = arith.mulf %32, %37 : vector<2x128xf32>
    %39 = vector.broadcast %26 : vector<1x128xf32> to vector<2x128xf32>
    %40 = arith.addf %39, %38 : vector<2x128xf32>
    %41 = math.tanh %40 : vector<2x128xf32>
    %42 = arith.subf %8, %41 : vector<2x128xf32>
    %43 = arith.mulf %33, %42 : vector<2x128xf32>
    %44 = arith.addf %41, %43 : vector<2x128xf32>
    %45 = arith.truncf %44 : vector<2x128xf32> to vector<2x128xbf16>
    %c0_25 = arith.constant 0 : index
    %c0_26 = arith.constant 0 : index
    %46 = vector.load %arg10[%c0_25, %c0_26] : memref<128x384xbf16, #tpu.memory_space<vmem>>, vector<128x384xbf16>
    %cst_27 = arith.constant dense<0.000000e+00> : vector<2x384xf32>
    %47 = tpu.matmul %19, %46, %cst_27 {dimension_numbers = #tpu.dot_dimension_numbers<[1], [0], [0], [1], [0, 0, 1, 1], [], []>} : vector<2x128xbf16>, vector<128x384xbf16>, vector<2x384xf32> -> vector<2x384xf32>
    %c0_28 = arith.constant 0 : index
    %c0_29 = arith.constant 0 : index
    %48 = vector.load %arg9[%c0_28, %c0_29] : memref<128x384xbf16, #tpu.memory_space<vmem>>, vector<128x384xbf16>
    %cst_30 = arith.constant dense<0.000000e+00> : vector<2x384xf32>
    %49 = tpu.matmul %45, %48, %cst_30 {dimension_numbers = #tpu.dot_dimension_numbers<[1], [0], [0], [1], [0, 0, 1, 1], [], []>} : vector<2x128xbf16>, vector<128x384xbf16>, vector<2x384xf32> -> vector<2x384xf32>
    %50 = vector.extract_strided_slice %49 {offsets = [0, 0], sizes = [2, 256], strides = [1, 1]} : vector<2x384xf32> to vector<2x256xf32>
    %51 = vector.extract_strided_slice %47 {offsets = [0, 0], sizes = [2, 256], strides = [1, 1]} : vector<2x384xf32> to vector<2x256xf32>
    %52 = arith.addf %50, %51 : vector<2x256xf32>
    %c0_31 = arith.constant 0 : index
    %c0_32 = arith.constant 0 : index
    %53 = vector.load %arg11[%c0_31, %c0_32] : memref<1x256xf32, #tpu.memory_space<vmem>>, vector<1x256xf32>
    %54 = vector.broadcast %53 : vector<1x256xf32> to vector<2x256xf32>
    %55 = arith.addf %52, %54 : vector<2x256xf32>
    %56 = vector.extract_strided_slice %49 {offsets = [0, 256], sizes = [2, 128], strides = [1, 1]} : vector<2x384xf32> to vector<2x128xf32>
    %c0_33 = arith.constant 0 : index
    %c0_34 = arith.constant 0 : index
    %57 = vector.load %arg12[%c0_33, %c0_34] : memref<1x128xf32, #tpu.memory_space<vmem>>, vector<1x128xf32>
    %58 = vector.broadcast %57 : vector<1x128xf32> to vector<2x128xf32>
    %59 = arith.addf %56, %58 : vector<2x128xf32>
    %60 = arith.negf %55 : vector<2x256xf32>
    %61 = math.exp %60 : vector<2x256xf32>
    %cst_35 = arith.constant 1.000000e+00 : f32
    %62 = vector.broadcast %cst_35 : f32 to vector<2x256xf32>
    %63 = arith.addf %62, %61 : vector<2x256xf32>
    %64 = arith.divf %62, %63 : vector<2x256xf32>
    %65 = vector.extract_strided_slice %64 {offsets = [0, 0], sizes = [2, 128], strides = [1, 1]} : vector<2x256xf32> to vector<2x128xf32>
    %66 = vector.extract_strided_slice %64 {offsets = [0, 128], sizes = [2, 128], strides = [1, 1]} : vector<2x256xf32> to vector<2x128xf32>
    %67 = vector.extract_strided_slice %47 {offsets = [0, 256], sizes = [2, 128], strides = [1, 1]} : vector<2x384xf32> to vector<2x128xf32>
    %c0_36 = arith.constant 0 : index
    %c0_37 = arith.constant 0 : index
    %68 = vector.load %arg13[%c0_36, %c0_37] : memref<1x128xf32, #tpu.memory_space<vmem>>, vector<1x128xf32>
    %69 = vector.broadcast %68 : vector<1x128xf32> to vector<2x128xf32>
    %70 = arith.addf %67, %69 : vector<2x128xf32>
    %71 = arith.mulf %65, %70 : vector<2x128xf32>
    %72 = arith.addf %59, %71 : vector<2x128xf32>
    %73 = math.tanh %72 : vector<2x128xf32>
    %74 = arith.subf %17, %73 : vector<2x128xf32>
    %75 = arith.mulf %66, %74 : vector<2x128xf32>
    %76 = arith.addf %73, %75 : vector<2x128xf32>
    %77 = arith.truncf %76 : vector<2x128xf32> to vector<2x128xbf16>
    %c0_38 = arith.constant 0 : index
    %c0_39 = arith.constant 0 : index
    %78 = vector.load %arg5[%c0_38, %c0_39] : memref<128x384xbf16, #tpu.memory_space<vmem>>, vector<128x384xbf16>
    %cst_40 = arith.constant dense<0.000000e+00> : vector<2x384xf32>
    %79 = tpu.matmul %45, %78, %cst_40 {dimension_numbers = #tpu.dot_dimension_numbers<[1], [0], [0], [1], [0, 0, 1, 1], [], []>} : vector<2x128xbf16>, vector<128x384xbf16>, vector<2x384xf32> -> vector<2x384xf32>
    %80 = vector.extract_strided_slice %79 {offsets = [0, 0], sizes = [2, 256], strides = [1, 1]} : vector<2x384xf32> to vector<2x256xf32>
    %c0_41 = arith.constant 0 : index
    %c0_42 = arith.constant 0 : index
    %81 = vector.load %arg6[%c0_41, %c0_42] : memref<1x256xf32, #tpu.memory_space<vmem>>, vector<1x256xf32>
    %82 = vector.broadcast %81 : vector<1x256xf32> to vector<2x256xf32>
    %83 = arith.addf %80, %82 : vector<2x256xf32>
    %c0_43 = arith.constant 0 : index
    %c0_44 = arith.constant 0 : index
    %84 = vector.load %arg7[%c0_43, %c0_44] : memref<1x128xf32, #tpu.memory_space<vmem>>, vector<1x128xf32>
    %85 = arith.negf %83 : vector<2x256xf32>
    %86 = math.exp %85 : vector<2x256xf32>
    %cst_45 = arith.constant 1.000000e+00 : f32
    %87 = vector.broadcast %cst_45 : f32 to vector<2x256xf32>
    %88 = arith.addf %87, %86 : vector<2x256xf32>
    %89 = arith.divf %87, %88 : vector<2x256xf32>
    %90 = vector.extract_strided_slice %89 {offsets = [0, 0], sizes = [2, 128], strides = [1, 1]} : vector<2x256xf32> to vector<2x128xf32>
    %91 = vector.extract_strided_slice %89 {offsets = [0, 128], sizes = [2, 128], strides = [1, 1]} : vector<2x256xf32> to vector<2x128xf32>
    %92 = vector.extract_strided_slice %79 {offsets = [0, 256], sizes = [2, 128], strides = [1, 1]} : vector<2x384xf32> to vector<2x128xf32>
    %c0_46 = arith.constant 0 : index
    %c0_47 = arith.constant 0 : index
    %93 = vector.load %arg8[%c0_46, %c0_47] : memref<1x128xf32, #tpu.memory_space<vmem>>, vector<1x128xf32>
    %94 = vector.broadcast %93 : vector<1x128xf32> to vector<2x128xf32>
    %95 = arith.addf %92, %94 : vector<2x128xf32>
    %96 = arith.mulf %90, %95 : vector<2x128xf32>
    %97 = vector.broadcast %84 : vector<1x128xf32> to vector<2x128xf32>
    %98 = arith.addf %97, %96 : vector<2x128xf32>
    %99 = math.tanh %98 : vector<2x128xf32>
    %100 = arith.subf %44, %99 : vector<2x128xf32>
    %101 = arith.mulf %91, %100 : vector<2x128xf32>
    %102 = arith.addf %99, %101 : vector<2x128xf32>
    %103 = arith.truncf %102 : vector<2x128xf32> to vector<2x128xbf16>
    %c0_48 = arith.constant 0 : index
    %c0_49 = arith.constant 0 : index
    %104 = vector.load %arg10[%c0_48, %c0_49] : memref<128x384xbf16, #tpu.memory_space<vmem>>, vector<128x384xbf16>
    %cst_50 = arith.constant dense<0.000000e+00> : vector<2x384xf32>
    %105 = tpu.matmul %77, %104, %cst_50 {dimension_numbers = #tpu.dot_dimension_numbers<[1], [0], [0], [1], [0, 0, 1, 1], [], []>} : vector<2x128xbf16>, vector<128x384xbf16>, vector<2x384xf32> -> vector<2x384xf32>
    %c0_51 = arith.constant 0 : index
    %c0_52 = arith.constant 0 : index
    %106 = vector.load %arg9[%c0_51, %c0_52] : memref<128x384xbf16, #tpu.memory_space<vmem>>, vector<128x384xbf16>
    %cst_53 = arith.constant dense<0.000000e+00> : vector<2x384xf32>
    %107 = tpu.matmul %103, %106, %cst_53 {dimension_numbers = #tpu.dot_dimension_numbers<[1], [0], [0], [1], [0, 0, 1, 1], [], []>} : vector<2x128xbf16>, vector<128x384xbf16>, vector<2x384xf32> -> vector<2x384xf32>
    %108 = vector.extract_strided_slice %107 {offsets = [0, 0], sizes = [2, 256], strides = [1, 1]} : vector<2x384xf32> to vector<2x256xf32>
    %109 = vector.extract_strided_slice %105 {offsets = [0, 0], sizes = [2, 256], strides = [1, 1]} : vector<2x384xf32> to vector<2x256xf32>
    %110 = arith.addf %108, %109 : vector<2x256xf32>
    %c0_54 = arith.constant 0 : index
    %c0_55 = arith.constant 0 : index
    %111 = vector.load %arg11[%c0_54, %c0_55] : memref<1x256xf32, #tpu.memory_space<vmem>>, vector<1x256xf32>
    %112 = vector.broadcast %111 : vector<1x256xf32> to vector<2x256xf32>
    %113 = arith.addf %110, %112 : vector<2x256xf32>
    %114 = vector.extract_strided_slice %107 {offsets = [0, 256], sizes = [2, 128], strides = [1, 1]} : vector<2x384xf32> to vector<2x128xf32>
    %c0_56 = arith.constant 0 : index
    %c0_57 = arith.constant 0 : index
    %115 = vector.load %arg12[%c0_56, %c0_57] : memref<1x128xf32, #tpu.memory_space<vmem>>, vector<1x128xf32>
    %116 = vector.broadcast %115 : vector<1x128xf32> to vector<2x128xf32>
    %117 = arith.addf %114, %116 : vector<2x128xf32>
    %118 = arith.negf %113 : vector<2x256xf32>
    %119 = math.exp %118 : vector<2x256xf32>
    %cst_58 = arith.constant 1.000000e+00 : f32
    %120 = vector.broadcast %cst_58 : f32 to vector<2x256xf32>
    %121 = arith.addf %120, %119 : vector<2x256xf32>
    %122 = arith.divf %120, %121 : vector<2x256xf32>
    %123 = vector.extract_strided_slice %122 {offsets = [0, 0], sizes = [2, 128], strides = [1, 1]} : vector<2x256xf32> to vector<2x128xf32>
    %124 = vector.extract_strided_slice %122 {offsets = [0, 128], sizes = [2, 128], strides = [1, 1]} : vector<2x256xf32> to vector<2x128xf32>
    %125 = vector.extract_strided_slice %105 {offsets = [0, 256], sizes = [2, 128], strides = [1, 1]} : vector<2x384xf32> to vector<2x128xf32>
    %c0_59 = arith.constant 0 : index
    %c0_60 = arith.constant 0 : index
    %126 = vector.load %arg13[%c0_59, %c0_60] : memref<1x128xf32, #tpu.memory_space<vmem>>, vector<1x128xf32>
    %127 = vector.broadcast %126 : vector<1x128xf32> to vector<2x128xf32>
    %128 = arith.addf %125, %127 : vector<2x128xf32>
    %129 = arith.mulf %123, %128 : vector<2x128xf32>
    %130 = arith.addf %117, %129 : vector<2x128xf32>
    %131 = math.tanh %130 : vector<2x128xf32>
    %132 = arith.subf %76, %131 : vector<2x128xf32>
    %133 = arith.mulf %124, %132 : vector<2x128xf32>
    %134 = arith.addf %131, %133 : vector<2x128xf32>
    %135 = arith.truncf %134 : vector<2x128xf32> to vector<2x128xbf16>
    %c0_61 = arith.constant 0 : index
    %c0_62 = arith.constant 0 : index
    %136 = vector.load %arg14[%c0_61, %c0_62] : memref<128x128xbf16, #tpu.memory_space<vmem>>, vector<128x128xbf16>
    %cst_63 = arith.constant dense<0.000000e+00> : vector<2x128xf32>
    %137 = tpu.matmul %135, %136, %cst_63 {dimension_numbers = #tpu.dot_dimension_numbers<[1], [0], [0], [1], [0, 0, 1, 1], [], []>} : vector<2x128xbf16>, vector<128x128xbf16>, vector<2x128xf32> -> vector<2x128xf32>
    %c0_64 = arith.constant 0 : index
    %c0_65 = arith.constant 0 : index
    %138 = vector.load %arg15[%c0_64, %c0_65] : memref<1x128xf32, #tpu.memory_space<vmem>>, vector<1x128xf32>
    %139 = vector.broadcast %138 : vector<1x128xf32> to vector<2x128xf32>
    %140 = arith.addf %137, %139 : vector<2x128xf32>
    %c0_66 = arith.constant 0 : index
    %c0_67 = arith.constant 0 : index
    %141 = vector.load %arg16[%c0_66, %c0_67] : memref<2x512xf32, #tpu.memory_space<vmem>>, vector<2x128xf32>
    tpu.vector_store %arg16[%c0_66, %c0_67], %140 {strides = array<i32>} : memref<2x512xf32, #tpu.memory_space<vmem>>, vector<2x128xf32>,
    %142 = arith.truncf %140 : vector<2x128xf32> to vector<2x128xbf16>
    %c0_68 = arith.constant 0 : index
    %c0_69 = arith.constant 0 : index
    %143 = vector.load %arg5[%c0_68, %c0_69] : memref<128x384xbf16, #tpu.memory_space<vmem>>, vector<128x384xbf16>
    %cst_70 = arith.constant dense<0.000000e+00> : vector<2x384xf32>
    %144 = tpu.matmul %103, %143, %cst_70 {dimension_numbers = #tpu.dot_dimension_numbers<[1], [0], [0], [1], [0, 0, 1, 1], [], []>} : vector<2x128xbf16>, vector<128x384xbf16>, vector<2x384xf32> -> vector<2x384xf32>
    %c0_71 = arith.constant 0 : index
    %c0_72 = arith.constant 0 : index
    %145 = vector.load %arg4[%c0_71, %c0_72] : memref<128x384xbf16, #tpu.memory_space<vmem>>, vector<128x384xbf16>
    %cst_73 = arith.constant dense<0.000000e+00> : vector<2x384xf32>
    %146 = tpu.matmul %142, %145, %cst_73 {dimension_numbers = #tpu.dot_dimension_numbers<[1], [0], [0], [1], [0, 0, 1, 1], [], []>} : vector<2x128xbf16>, vector<128x384xbf16>, vector<2x384xf32> -> vector<2x384xf32>
    %147 = vector.extract_strided_slice %146 {offsets = [0, 0], sizes = [2, 256], strides = [1, 1]} : vector<2x384xf32> to vector<2x256xf32>
    %148 = vector.extract_strided_slice %144 {offsets = [0, 0], sizes = [2, 256], strides = [1, 1]} : vector<2x384xf32> to vector<2x256xf32>
    %149 = arith.addf %147, %148 : vector<2x256xf32>
    %c0_74 = arith.constant 0 : index
    %c0_75 = arith.constant 0 : index
    %150 = vector.load %arg6[%c0_74, %c0_75] : memref<1x256xf32, #tpu.memory_space<vmem>>, vector<1x256xf32>
    %151 = vector.broadcast %150 : vector<1x256xf32> to vector<2x256xf32>
    %152 = arith.addf %149, %151 : vector<2x256xf32>
    %153 = vector.extract_strided_slice %146 {offsets = [0, 256], sizes = [2, 128], strides = [1, 1]} : vector<2x384xf32> to vector<2x128xf32>
    %c0_76 = arith.constant 0 : index
    %c0_77 = arith.constant 0 : index
    %154 = vector.load %arg7[%c0_76, %c0_77] : memref<1x128xf32, #tpu.memory_space<vmem>>, vector<1x128xf32>
    %155 = vector.broadcast %154 : vector<1x128xf32> to vector<2x128xf32>
    %156 = arith.addf %153, %155 : vector<2x128xf32>
    %157 = arith.negf %152 : vector<2x256xf32>
    %158 = math.exp %157 : vector<2x256xf32>
    %cst_78 = arith.constant 1.000000e+00 : f32
    %159 = vector.broadcast %cst_78 : f32 to vector<2x256xf32>
    %160 = arith.addf %159, %158 : vector<2x256xf32>
    %161 = arith.divf %159, %160 : vector<2x256xf32>
    %162 = vector.extract_strided_slice %161 {offsets = [0, 0], sizes = [2, 128], strides = [1, 1]} : vector<2x256xf32> to vector<2x128xf32>
    %163 = vector.extract_strided_slice %161 {offsets = [0, 128], sizes = [2, 128], strides = [1, 1]} : vector<2x256xf32> to vector<2x128xf32>
    %164 = vector.extract_strided_slice %144 {offsets = [0, 256], sizes = [2, 128], strides = [1, 1]} : vector<2x384xf32> to vector<2x128xf32>
    %c0_79 = arith.constant 0 : index
    %c0_80 = arith.constant 0 : index
    %165 = vector.load %arg8[%c0_79, %c0_80] : memref<1x128xf32, #tpu.memory_space<vmem>>, vector<1x128xf32>
    %166 = vector.broadcast %165 : vector<1x128xf32> to vector<2x128xf32>
    %167 = arith.addf %164, %166 : vector<2x128xf32>
    %168 = arith.mulf %162, %167 : vector<2x128xf32>
    %169 = arith.addf %156, %168 : vector<2x128xf32>
    %170 = math.tanh %169 : vector<2x128xf32>
    %171 = arith.subf %102, %170 : vector<2x128xf32>
    %172 = arith.mulf %163, %171 : vector<2x128xf32>
    %173 = arith.addf %170, %172 : vector<2x128xf32>
    %174 = arith.truncf %173 : vector<2x128xf32> to vector<2x128xbf16>
    %c0_81 = arith.constant 0 : index
    %c0_82 = arith.constant 0 : index
    %175 = vector.load %arg10[%c0_81, %c0_82] : memref<128x384xbf16, #tpu.memory_space<vmem>>, vector<128x384xbf16>
    %cst_83 = arith.constant dense<0.000000e+00> : vector<2x384xf32>
    %176 = tpu.matmul %135, %175, %cst_83 {dimension_numbers = #tpu.dot_dimension_numbers<[1], [0], [0], [1], [0, 0, 1, 1], [], []>} : vector<2x128xbf16>, vector<128x384xbf16>, vector<2x384xf32> -> vector<2x384xf32>
    %c0_84 = arith.constant 0 : index
    %c0_85 = arith.constant 0 : index
    %177 = vector.load %arg9[%c0_84, %c0_85] : memref<128x384xbf16, #tpu.memory_space<vmem>>, vector<128x384xbf16>
    %cst_86 = arith.constant dense<0.000000e+00> : vector<2x384xf32>
    %178 = tpu.matmul %174, %177, %cst_86 {dimension_numbers = #tpu.dot_dimension_numbers<[1], [0], [0], [1], [0, 0, 1, 1], [], []>} : vector<2x128xbf16>, vector<128x384xbf16>, vector<2x384xf32> -> vector<2x384xf32>
    %179 = vector.extract_strided_slice %178 {offsets = [0, 0], sizes = [2, 256], strides = [1, 1]} : vector<2x384xf32> to vector<2x256xf32>
    %180 = vector.extract_strided_slice %176 {offsets = [0, 0], sizes = [2, 256], strides = [1, 1]} : vector<2x384xf32> to vector<2x256xf32>
    %181 = arith.addf %179, %180 : vector<2x256xf32>
    %c0_87 = arith.constant 0 : index
    %c0_88 = arith.constant 0 : index
    %182 = vector.load %arg11[%c0_87, %c0_88] : memref<1x256xf32, #tpu.memory_space<vmem>>, vector<1x256xf32>
    %183 = vector.broadcast %182 : vector<1x256xf32> to vector<2x256xf32>
    %184 = arith.addf %181, %183 : vector<2x256xf32>
    %185 = vector.extract_strided_slice %178 {offsets = [0, 256], sizes = [2, 128], strides = [1, 1]} : vector<2x384xf32> to vector<2x128xf32>
    %c0_89 = arith.constant 0 : index
    %c0_90 = arith.constant 0 : index
    %186 = vector.load %arg12[%c0_89, %c0_90] : memref<1x128xf32, #tpu.memory_space<vmem>>, vector<1x128xf32>
    %187 = vector.broadcast %186 : vector<1x128xf32> to vector<2x128xf32>
    %188 = arith.addf %185, %187 : vector<2x128xf32>
    %189 = arith.negf %184 : vector<2x256xf32>
    %190 = math.exp %189 : vector<2x256xf32>
    %cst_91 = arith.constant 1.000000e+00 : f32
    %191 = vector.broadcast %cst_91 : f32 to vector<2x256xf32>
    %192 = arith.addf %191, %190 : vector<2x256xf32>
    %193 = arith.divf %191, %192 : vector<2x256xf32>
    %194 = vector.extract_strided_slice %193 {offsets = [0, 0], sizes = [2, 128], strides = [1, 1]} : vector<2x256xf32> to vector<2x128xf32>
    %195 = vector.extract_strided_slice %193 {offsets = [0, 128], sizes = [2, 128], strides = [1, 1]} : vector<2x256xf32> to vector<2x128xf32>
    %196 = vector.extract_strided_slice %176 {offsets = [0, 256], sizes = [2, 128], strides = [1, 1]} : vector<2x384xf32> to vector<2x128xf32>
    %c0_92 = arith.constant 0 : index
    %c0_93 = arith.constant 0 : index
    %197 = vector.load %arg13[%c0_92, %c0_93] : memref<1x128xf32, #tpu.memory_space<vmem>>, vector<1x128xf32>
    %198 = vector.broadcast %197 : vector<1x128xf32> to vector<2x128xf32>
    %199 = arith.addf %196, %198 : vector<2x128xf32>
    %200 = arith.mulf %194, %199 : vector<2x128xf32>
    %201 = arith.addf %188, %200 : vector<2x128xf32>
    %202 = math.tanh %201 : vector<2x128xf32>
    %203 = arith.subf %134, %202 : vector<2x128xf32>
    %204 = arith.mulf %195, %203 : vector<2x128xf32>
    %205 = arith.addf %202, %204 : vector<2x128xf32>
    %206 = arith.truncf %205 : vector<2x128xf32> to vector<2x128xbf16>
    %c0_94 = arith.constant 0 : index
    %c0_95 = arith.constant 0 : index
    %207 = vector.load %arg14[%c0_94, %c0_95] : memref<128x128xbf16, #tpu.memory_space<vmem>>, vector<128x128xbf16>
    %cst_96 = arith.constant dense<0.000000e+00> : vector<2x128xf32>
    %208 = tpu.matmul %206, %207, %cst_96 {dimension_numbers = #tpu.dot_dimension_numbers<[1], [0], [0], [1], [0, 0, 1, 1], [], []>} : vector<2x128xbf16>, vector<128x128xbf16>, vector<2x128xf32> -> vector<2x128xf32>
    %c0_97 = arith.constant 0 : index
    %c0_98 = arith.constant 0 : index
    %209 = vector.load %arg15[%c0_97, %c0_98] : memref<1x128xf32, #tpu.memory_space<vmem>>, vector<1x128xf32>
    %210 = vector.broadcast %209 : vector<1x128xf32> to vector<2x128xf32>
    %211 = arith.addf %208, %210 : vector<2x128xf32>
    %c0_99 = arith.constant 0 : index
    %c128 = arith.constant 128 : index
    %212 = vector.load %arg16[%c0_99, %c128] : memref<2x512xf32, #tpu.memory_space<vmem>>, vector<2x128xf32>
    tpu.vector_store %arg16[%c0_99, %c128], %211 {strides = array<i32>} : memref<2x512xf32, #tpu.memory_space<vmem>>, vector<2x128xf32>,
    %213 = arith.truncf %211 : vector<2x128xf32> to vector<2x128xbf16>
    %c0_100 = arith.constant 0 : index
    %c0_101 = arith.constant 0 : index
    %214 = vector.load %arg5[%c0_100, %c0_101] : memref<128x384xbf16, #tpu.memory_space<vmem>>, vector<128x384xbf16>
    %cst_102 = arith.constant dense<0.000000e+00> : vector<2x384xf32>
    %215 = tpu.matmul %174, %214, %cst_102 {dimension_numbers = #tpu.dot_dimension_numbers<[1], [0], [0], [1], [0, 0, 1, 1], [], []>} : vector<2x128xbf16>, vector<128x384xbf16>, vector<2x384xf32> -> vector<2x384xf32>
    %c0_103 = arith.constant 0 : index
    %c0_104 = arith.constant 0 : index
    %216 = vector.load %arg4[%c0_103, %c0_104] : memref<128x384xbf16, #tpu.memory_space<vmem>>, vector<128x384xbf16>
    %cst_105 = arith.constant dense<0.000000e+00> : vector<2x384xf32>
    %217 = tpu.matmul %213, %216, %cst_105 {dimension_numbers = #tpu.dot_dimension_numbers<[1], [0], [0], [1], [0, 0, 1, 1], [], []>} : vector<2x128xbf16>, vector<128x384xbf16>, vector<2x384xf32> -> vector<2x384xf32>
    %218 = vector.extract_strided_slice %217 {offsets = [0, 0], sizes = [2, 256], strides = [1, 1]} : vector<2x384xf32> to vector<2x256xf32>
    %219 = vector.extract_strided_slice %215 {offsets = [0, 0], sizes = [2, 256], strides = [1, 1]} : vector<2x384xf32> to vector<2x256xf32>
    %220 = arith.addf %218, %219 : vector<2x256xf32>
    %c0_106 = arith.constant 0 : index
    %c0_107 = arith.constant 0 : index
    %221 = vector.load %arg6[%c0_106, %c0_107] : memref<1x256xf32, #tpu.memory_space<vmem>>, vector<1x256xf32>
    %222 = vector.broadcast %221 : vector<1x256xf32> to vector<2x256xf32>
    %223 = arith.addf %220, %222 : vector<2x256xf32>
    %224 = vector.extract_strided_slice %217 {offsets = [0, 256], sizes = [2, 128], strides = [1, 1]} : vector<2x384xf32> to vector<2x128xf32>
    %c0_108 = arith.constant 0 : index
    %c0_109 = arith.constant 0 : index
    %225 = vector.load %arg7[%c0_108, %c0_109] : memref<1x128xf32, #tpu.memory_space<vmem>>, vector<1x128xf32>
    %226 = vector.broadcast %225 : vector<1x128xf32> to vector<2x128xf32>
    %227 = arith.addf %224, %226 : vector<2x128xf32>
    %228 = arith.negf %223 : vector<2x256xf32>
    %229 = math.exp %228 : vector<2x256xf32>
    %cst_110 = arith.constant 1.000000e+00 : f32
    %230 = vector.broadcast %cst_110 : f32 to vector<2x256xf32>
    %231 = arith.addf %230, %229 : vector<2x256xf32>
    %232 = arith.divf %230, %231 : vector<2x256xf32>
    %233 = vector.extract_strided_slice %232 {offsets = [0, 0], sizes = [2, 128], strides = [1, 1]} : vector<2x256xf32> to vector<2x128xf32>
    %234 = vector.extract_strided_slice %232 {offsets = [0, 128], sizes = [2, 128], strides = [1, 1]} : vector<2x256xf32> to vector<2x128xf32>
    %235 = vector.extract_strided_slice %215 {offsets = [0, 256], sizes = [2, 128], strides = [1, 1]} : vector<2x384xf32> to vector<2x128xf32>
    %c0_111 = arith.constant 0 : index
    %c0_112 = arith.constant 0 : index
    %236 = vector.load %arg8[%c0_111, %c0_112] : memref<1x128xf32, #tpu.memory_space<vmem>>, vector<1x128xf32>
    %237 = vector.broadcast %236 : vector<1x128xf32> to vector<2x128xf32>
    %238 = arith.addf %235, %237 : vector<2x128xf32>
    %239 = arith.mulf %233, %238 : vector<2x128xf32>
    %240 = arith.addf %227, %239 : vector<2x128xf32>
    %241 = math.tanh %240 : vector<2x128xf32>
    %242 = arith.subf %173, %241 : vector<2x128xf32>
    %243 = arith.mulf %234, %242 : vector<2x128xf32>
    %244 = arith.addf %241, %243 : vector<2x128xf32>
    %245 = arith.truncf %244 : vector<2x128xf32> to vector<2x128xbf16>
    %c0_113 = arith.constant 0 : index
    %c0_114 = arith.constant 0 : index
    %246 = vector.load %arg10[%c0_113, %c0_114] : memref<128x384xbf16, #tpu.memory_space<vmem>>, vector<128x384xbf16>
    %cst_115 = arith.constant dense<0.000000e+00> : vector<2x384xf32>
    %247 = tpu.matmul %206, %246, %cst_115 {dimension_numbers = #tpu.dot_dimension_numbers<[1], [0], [0], [1], [0, 0, 1, 1], [], []>} : vector<2x128xbf16>, vector<128x384xbf16>, vector<2x384xf32> -> vector<2x384xf32>
    %c0_116 = arith.constant 0 : index
    %c0_117 = arith.constant 0 : index
    %248 = vector.load %arg9[%c0_116, %c0_117] : memref<128x384xbf16, #tpu.memory_space<vmem>>, vector<128x384xbf16>
    %cst_118 = arith.constant dense<0.000000e+00> : vector<2x384xf32>
    %249 = tpu.matmul %245, %248, %cst_118 {dimension_numbers = #tpu.dot_dimension_numbers<[1], [0], [0], [1], [0, 0, 1, 1], [], []>} : vector<2x128xbf16>, vector<128x384xbf16>, vector<2x384xf32> -> vector<2x384xf32>
    %250 = vector.extract_strided_slice %249 {offsets = [0, 0], sizes = [2, 256], strides = [1, 1]} : vector<2x384xf32> to vector<2x256xf32>
    %251 = vector.extract_strided_slice %247 {offsets = [0, 0], sizes = [2, 256], strides = [1, 1]} : vector<2x384xf32> to vector<2x256xf32>
    %252 = arith.addf %250, %251 : vector<2x256xf32>
    %c0_119 = arith.constant 0 : index
    %c0_120 = arith.constant 0 : index
    %253 = vector.load %arg11[%c0_119, %c0_120] : memref<1x256xf32, #tpu.memory_space<vmem>>, vector<1x256xf32>
    %254 = vector.broadcast %253 : vector<1x256xf32> to vector<2x256xf32>
    %255 = arith.addf %252, %254 : vector<2x256xf32>
    %256 = vector.extract_strided_slice %249 {offsets = [0, 256], sizes = [2, 128], strides = [1, 1]} : vector<2x384xf32> to vector<2x128xf32>
    %c0_121 = arith.constant 0 : index
    %c0_122 = arith.constant 0 : index
    %257 = vector.load %arg12[%c0_121, %c0_122] : memref<1x128xf32, #tpu.memory_space<vmem>>, vector<1x128xf32>
    %258 = vector.broadcast %257 : vector<1x128xf32> to vector<2x128xf32>
    %259 = arith.addf %256, %258 : vector<2x128xf32>
    %260 = arith.negf %255 : vector<2x256xf32>
    %261 = math.exp %260 : vector<2x256xf32>
    %cst_123 = arith.constant 1.000000e+00 : f32
    %262 = vector.broadcast %cst_123 : f32 to vector<2x256xf32>
    %263 = arith.addf %262, %261 : vector<2x256xf32>
    %264 = arith.divf %262, %263 : vector<2x256xf32>
    %265 = vector.extract_strided_slice %264 {offsets = [0, 0], sizes = [2, 128], strides = [1, 1]} : vector<2x256xf32> to vector<2x128xf32>
    %266 = vector.extract_strided_slice %264 {offsets = [0, 128], sizes = [2, 128], strides = [1, 1]} : vector<2x256xf32> to vector<2x128xf32>
    %267 = vector.extract_strided_slice %247 {offsets = [0, 256], sizes = [2, 128], strides = [1, 1]} : vector<2x384xf32> to vector<2x128xf32>
    %c0_124 = arith.constant 0 : index
    %c0_125 = arith.constant 0 : index
    %268 = vector.load %arg13[%c0_124, %c0_125] : memref<1x128xf32, #tpu.memory_space<vmem>>, vector<1x128xf32>
    %269 = vector.broadcast %268 : vector<1x128xf32> to vector<2x128xf32>
    %270 = arith.addf %267, %269 : vector<2x128xf32>
    %271 = arith.mulf %265, %270 : vector<2x128xf32>
    %272 = arith.addf %259, %271 : vector<2x128xf32>
    %273 = math.tanh %272 : vector<2x128xf32>
    %274 = arith.subf %205, %273 : vector<2x128xf32>
    %275 = arith.mulf %266, %274 : vector<2x128xf32>
    %276 = arith.addf %273, %275 : vector<2x128xf32>
    %277 = arith.truncf %276 : vector<2x128xf32> to vector<2x128xbf16>
    %c0_126 = arith.constant 0 : index
    %c0_127 = arith.constant 0 : index
    %278 = vector.load %arg14[%c0_126, %c0_127] : memref<128x128xbf16, #tpu.memory_space<vmem>>, vector<128x128xbf16>
    %cst_128 = arith.constant dense<0.000000e+00> : vector<2x128xf32>
    %279 = tpu.matmul %277, %278, %cst_128 {dimension_numbers = #tpu.dot_dimension_numbers<[1], [0], [0], [1], [0, 0, 1, 1], [], []>} : vector<2x128xbf16>, vector<128x128xbf16>, vector<2x128xf32> -> vector<2x128xf32>
    %c0_129 = arith.constant 0 : index
    %c0_130 = arith.constant 0 : index
    %280 = vector.load %arg15[%c0_129, %c0_130] : memref<1x128xf32, #tpu.memory_space<vmem>>, vector<1x128xf32>
    %281 = vector.broadcast %280 : vector<1x128xf32> to vector<2x128xf32>
    %282 = arith.addf %279, %281 : vector<2x128xf32>
    %c0_131 = arith.constant 0 : index
    %c256 = arith.constant 256 : index
    %283 = vector.load %arg16[%c0_131, %c256] : memref<2x512xf32, #tpu.memory_space<vmem>>, vector<2x128xf32>
    tpu.vector_store %arg16[%c0_131, %c256], %282 {strides = array<i32>} : memref<2x512xf32, #tpu.memory_space<vmem>>, vector<2x128xf32>,
    %284 = arith.truncf %282 : vector<2x128xf32> to vector<2x128xbf16>
    %c0_132 = arith.constant 0 : index
    %c0_133 = arith.constant 0 : index
    %285 = vector.load %arg5[%c0_132, %c0_133] : memref<128x384xbf16, #tpu.memory_space<vmem>>, vector<128x384xbf16>
    %cst_134 = arith.constant dense<0.000000e+00> : vector<2x384xf32>
    %286 = tpu.matmul %245, %285, %cst_134 {dimension_numbers = #tpu.dot_dimension_numbers<[1], [0], [0], [1], [0, 0, 1, 1], [], []>} : vector<2x128xbf16>, vector<128x384xbf16>, vector<2x384xf32> -> vector<2x384xf32>
    %c0_135 = arith.constant 0 : index
    %c0_136 = arith.constant 0 : index
    %287 = vector.load %arg4[%c0_135, %c0_136] : memref<128x384xbf16, #tpu.memory_space<vmem>>, vector<128x384xbf16>
    %cst_137 = arith.constant dense<0.000000e+00> : vector<2x384xf32>
    %288 = tpu.matmul %284, %287, %cst_137 {dimension_numbers = #tpu.dot_dimension_numbers<[1], [0], [0], [1], [0, 0, 1, 1], [], []>} : vector<2x128xbf16>, vector<128x384xbf16>, vector<2x384xf32> -> vector<2x384xf32>
    %289 = vector.extract_strided_slice %288 {offsets = [0, 0], sizes = [2, 256], strides = [1, 1]} : vector<2x384xf32> to vector<2x256xf32>
    %290 = vector.extract_strided_slice %286 {offsets = [0, 0], sizes = [2, 256], strides = [1, 1]} : vector<2x384xf32> to vector<2x256xf32>
    %291 = arith.addf %289, %290 : vector<2x256xf32>
    %c0_138 = arith.constant 0 : index
    %c0_139 = arith.constant 0 : index
    %292 = vector.load %arg6[%c0_138, %c0_139] : memref<1x256xf32, #tpu.memory_space<vmem>>, vector<1x256xf32>
    %293 = vector.broadcast %292 : vector<1x256xf32> to vector<2x256xf32>
    %294 = arith.addf %291, %293 : vector<2x256xf32>
    %295 = vector.extract_strided_slice %288 {offsets = [0, 256], sizes = [2, 128], strides = [1, 1]} : vector<2x384xf32> to vector<2x128xf32>
    %c0_140 = arith.constant 0 : index
    %c0_141 = arith.constant 0 : index
    %296 = vector.load %arg7[%c0_140, %c0_141] : memref<1x128xf32, #tpu.memory_space<vmem>>, vector<1x128xf32>
    %297 = vector.broadcast %296 : vector<1x128xf32> to vector<2x128xf32>
    %298 = arith.addf %295, %297 : vector<2x128xf32>
    %299 = arith.negf %294 : vector<2x256xf32>
    %300 = math.exp %299 : vector<2x256xf32>
    %cst_142 = arith.constant 1.000000e+00 : f32
    %301 = vector.broadcast %cst_142 : f32 to vector<2x256xf32>
    %302 = arith.addf %301, %300 : vector<2x256xf32>
    %303 = arith.divf %301, %302 : vector<2x256xf32>
    %304 = vector.extract_strided_slice %303 {offsets = [0, 0], sizes = [2, 128], strides = [1, 1]} : vector<2x256xf32> to vector<2x128xf32>
    %305 = vector.extract_strided_slice %303 {offsets = [0, 128], sizes = [2, 128], strides = [1, 1]} : vector<2x256xf32> to vector<2x128xf32>
    %306 = vector.extract_strided_slice %286 {offsets = [0, 256], sizes = [2, 128], strides = [1, 1]} : vector<2x384xf32> to vector<2x128xf32>
    %c0_143 = arith.constant 0 : index
    %c0_144 = arith.constant 0 : index
    %307 = vector.load %arg8[%c0_143, %c0_144] : memref<1x128xf32, #tpu.memory_space<vmem>>, vector<1x128xf32>
    %308 = vector.broadcast %307 : vector<1x128xf32> to vector<2x128xf32>
    %309 = arith.addf %306, %308 : vector<2x128xf32>
    %310 = arith.mulf %304, %309 : vector<2x128xf32>
    %311 = arith.addf %298, %310 : vector<2x128xf32>
    %312 = math.tanh %311 : vector<2x128xf32>
    %313 = arith.subf %244, %312 : vector<2x128xf32>
    %314 = arith.mulf %305, %313 : vector<2x128xf32>
    %315 = arith.addf %312, %314 : vector<2x128xf32>
    %316 = arith.truncf %315 : vector<2x128xf32> to vector<2x128xbf16>
    %c0_145 = arith.constant 0 : index
    %c0_146 = arith.constant 0 : index
    %317 = vector.load %arg10[%c0_145, %c0_146] : memref<128x384xbf16, #tpu.memory_space<vmem>>, vector<128x384xbf16>
    %cst_147 = arith.constant dense<0.000000e+00> : vector<2x384xf32>
    %318 = tpu.matmul %277, %317, %cst_147 {dimension_numbers = #tpu.dot_dimension_numbers<[1], [0], [0], [1], [0, 0, 1, 1], [], []>} : vector<2x128xbf16>, vector<128x384xbf16>, vector<2x384xf32> -> vector<2x384xf32>
    %c0_148 = arith.constant 0 : index
    %c0_149 = arith.constant 0 : index
    %319 = vector.load %arg9[%c0_148, %c0_149] : memref<128x384xbf16, #tpu.memory_space<vmem>>, vector<128x384xbf16>
    %cst_150 = arith.constant dense<0.000000e+00> : vector<2x384xf32>
    %320 = tpu.matmul %316, %319, %cst_150 {dimension_numbers = #tpu.dot_dimension_numbers<[1], [0], [0], [1], [0, 0, 1, 1], [], []>} : vector<2x128xbf16>, vector<128x384xbf16>, vector<2x384xf32> -> vector<2x384xf32>
    %321 = vector.extract_strided_slice %320 {offsets = [0, 0], sizes = [2, 256], strides = [1, 1]} : vector<2x384xf32> to vector<2x256xf32>
    %322 = vector.extract_strided_slice %318 {offsets = [0, 0], sizes = [2, 256], strides = [1, 1]} : vector<2x384xf32> to vector<2x256xf32>
    %323 = arith.addf %321, %322 : vector<2x256xf32>
    %c0_151 = arith.constant 0 : index
    %c0_152 = arith.constant 0 : index
    %324 = vector.load %arg11[%c0_151, %c0_152] : memref<1x256xf32, #tpu.memory_space<vmem>>, vector<1x256xf32>
    %325 = vector.broadcast %324 : vector<1x256xf32> to vector<2x256xf32>
    %326 = arith.addf %323, %325 : vector<2x256xf32>
    %327 = vector.extract_strided_slice %320 {offsets = [0, 256], sizes = [2, 128], strides = [1, 1]} : vector<2x384xf32> to vector<2x128xf32>
    %c0_153 = arith.constant 0 : index
    %c0_154 = arith.constant 0 : index
    %328 = vector.load %arg12[%c0_153, %c0_154] : memref<1x128xf32, #tpu.memory_space<vmem>>, vector<1x128xf32>
    %329 = vector.broadcast %328 : vector<1x128xf32> to vector<2x128xf32>
    %330 = arith.addf %327, %329 : vector<2x128xf32>
    %331 = arith.negf %326 : vector<2x256xf32>
    %332 = math.exp %331 : vector<2x256xf32>
    %cst_155 = arith.constant 1.000000e+00 : f32
    %333 = vector.broadcast %cst_155 : f32 to vector<2x256xf32>
    %334 = arith.addf %333, %332 : vector<2x256xf32>
    %335 = arith.divf %333, %334 : vector<2x256xf32>
    %336 = vector.extract_strided_slice %335 {offsets = [0, 0], sizes = [2, 128], strides = [1, 1]} : vector<2x256xf32> to vector<2x128xf32>
    %337 = vector.extract_strided_slice %335 {offsets = [0, 128], sizes = [2, 128], strides = [1, 1]} : vector<2x256xf32> to vector<2x128xf32>
    %338 = vector.extract_strided_slice %318 {offsets = [0, 256], sizes = [2, 128], strides = [1, 1]} : vector<2x384xf32> to vector<2x128xf32>
    %c0_156 = arith.constant 0 : index
    %c0_157 = arith.constant 0 : index
    %339 = vector.load %arg13[%c0_156, %c0_157] : memref<1x128xf32, #tpu.memory_space<vmem>>, vector<1x128xf32>
    %340 = vector.broadcast %339 : vector<1x128xf32> to vector<2x128xf32>
    %341 = arith.addf %338, %340 : vector<2x128xf32>
    %342 = arith.mulf %336, %341 : vector<2x128xf32>
    %343 = arith.addf %330, %342 : vector<2x128xf32>
    %344 = math.tanh %343 : vector<2x128xf32>
    %345 = arith.subf %276, %344 : vector<2x128xf32>
    %346 = arith.mulf %337, %345 : vector<2x128xf32>
    %347 = arith.addf %344, %346 : vector<2x128xf32>
    %348 = arith.truncf %347 : vector<2x128xf32> to vector<2x128xbf16>
    %c0_158 = arith.constant 0 : index
    %c0_159 = arith.constant 0 : index
    %349 = vector.load %arg14[%c0_158, %c0_159] : memref<128x128xbf16, #tpu.memory_space<vmem>>, vector<128x128xbf16>
    %cst_160 = arith.constant dense<0.000000e+00> : vector<2x128xf32>
    %350 = tpu.matmul %348, %349, %cst_160 {dimension_numbers = #tpu.dot_dimension_numbers<[1], [0], [0], [1], [0, 0, 1, 1], [], []>} : vector<2x128xbf16>, vector<128x128xbf16>, vector<2x128xf32> -> vector<2x128xf32>
    %c0_161 = arith.constant 0 : index
    %c0_162 = arith.constant 0 : index
    %351 = vector.load %arg15[%c0_161, %c0_162] : memref<1x128xf32, #tpu.memory_space<vmem>>, vector<1x128xf32>
    %352 = vector.broadcast %351 : vector<1x128xf32> to vector<2x128xf32>
    %353 = arith.addf %350, %352 : vector<2x128xf32>
    %c0_163 = arith.constant 0 : index
    %c384 = arith.constant 384 : index
    %354 = vector.load %arg16[%c0_163, %c384] : memref<2x512xf32, #tpu.memory_space<vmem>>, vector<2x128xf32>
    tpu.vector_store %arg16[%c0_163, %c384], %353 {strides = array<i32>} : memref<2x512xf32, #tpu.memory_space<vmem>>, vector<2x128xf32>,
    return
  }
  func.func @transform_0(%arg0: i32) -> (i32, i32, i32) {
    %c0_i32 = arith.constant 0 : i32
    %c0_i32_0 = arith.constant 0 : i32
    %c0_i32_1 = arith.constant 0 : i32
    return %c0_i32, %arg0, %c0_i32_0 : i32, i32, i32
  }
  func.func @transform_1(%arg0: i32) -> (i32, i32) {
    %c0_i32 = arith.constant 0 : i32
    %c0_i32_0 = arith.constant 0 : i32
    %c0_i32_1 = arith.constant 0 : i32
    return %c0_i32, %c0_i32_0 : i32, i32
  }
  func.func @transform_2(%arg0: i32) -> (i32, i32) {
    %c0_i32 = arith.constant 0 : i32
    %c0_i32_0 = arith.constant 0 : i32
    %c0_i32_1 = arith.constant 0 : i32
    return %c0_i32, %c0_i32_0 : i32, i32
  }
  func.func @transform_3(%arg0: i32) -> (i32, i32) {
    %c0_i32 = arith.constant 0 : i32
    %c0_i32_0 = arith.constant 0 : i32
    %c0_i32_1 = arith.constant 0 : i32
    return %c0_i32, %c0_i32_0 : i32, i32
  }
  func.func @transform_4(%arg0: i32) -> (i32, i32) {
    %c0_i32 = arith.constant 0 : i32
    %c0_i32_0 = arith.constant 0 : i32
    %c0_i32_1 = arith.constant 0 : i32
    return %c0_i32, %c0_i32_0 : i32, i32
  }
  func.func @transform_5(%arg0: i32) -> (i32, i32) {
    %c0_i32 = arith.constant 0 : i32
    %c0_i32_0 = arith.constant 0 : i32
    %c0_i32_1 = arith.constant 0 : i32
    return %c0_i32, %c0_i32_0 : i32, i32
  }
  func.func @transform_6(%arg0: i32) -> (i32, i32) {
    %c0_i32 = arith.constant 0 : i32
    %c0_i32_0 = arith.constant 0 : i32
    %c0_i32_1 = arith.constant 0 : i32
    return %c0_i32, %c0_i32_0 : i32, i32
  }
  func.func @transform_7(%arg0: i32) -> (i32, i32) {
    %c0_i32 = arith.constant 0 : i32
    %c0_i32_0 = arith.constant 0 : i32
    %c0_i32_1 = arith.constant 0 : i32
    return %c0_i32, %c0_i32_0 : i32, i32
  }
  func.func @transform_8(%arg0: i32) -> (i32, i32) {
    %c0_i32 = arith.constant 0 : i32
    %c0_i32_0 = arith.constant 0 : i32
    %c0_i32_1 = arith.constant 0 : i32
    return %c0_i32, %c0_i32_0 : i32, i32
  }
  func.func @transform_9(%arg0: i32) -> (i32, i32) {
    %c0_i32 = arith.constant 0 : i32
    %c0_i32_0 = arith.constant 0 : i32
    %c0_i32_1 = arith.constant 0 : i32
    return %c0_i32, %c0_i32_0 : i32, i32
  }
  func.func @transform_10(%arg0: i32) -> (i32, i32) {
    %c0_i32 = arith.constant 0 : i32
    %c0_i32_0 = arith.constant 0 : i32
    %c0_i32_1 = arith.constant 0 : i32
    return %c0_i32, %c0_i32_0 : i32, i32
  }
  func.func @transform_11(%arg0: i32) -> (i32, i32) {
    %c0_i32 = arith.constant 0 : i32
    %c0_i32_0 = arith.constant 0 : i32
    %c0_i32_1 = arith.constant 0 : i32
    return %c0_i32, %c0_i32_0 : i32, i32
  }
  func.func @transform_12(%arg0: i32) -> (i32, i32) {
    %c0_i32 = arith.constant 0 : i32
    %c0_i32_0 = arith.constant 0 : i32
    %c0_i32_1 = arith.constant 0 : i32
    return %c0_i32, %c0_i32_0 : i32, i32
  }
  func.func @transform_13(%arg0: i32) -> (i32, i32) {
    %c0_i32 = arith.constant 0 : i32
    %c0_i32_0 = arith.constant 0 : i32
    %c0_i32_1 = arith.constant 0 : i32
    return %c0_i32, %c0_i32_0 : i32, i32
  }
  func.func @transform_14(%arg0: i32) -> (i32, i32) {
    %c0_i32 = arith.constant 0 : i32
    %c0_i32_0 = arith.constant 0 : i32
    %c0_i32_1 = arith.constant 0 : i32
    return %c0_i32, %c0_i32_0 : i32, i32
  }
  func.func @transform_15(%arg0: i32) -> (i32, i32) {
    %c0_i32 = arith.constant 0 : i32
    %c0_i32_0 = arith.constant 0 : i32
    return %arg0, %c0_i32 : i32, i32
  }
}

</mosaic_0001>

<bundles_post_ra>
// kernel: tpu_custom_call.1
= control target key start
LH: loop header
LB: loop body
LE: loop exit
PB: predicated region body
PF: predicated region fallthrough
CT: control target
= control target key end

     0   :  { %20 = vsyncpa [#allocation3], 0  ;;  %s7999_s0 = inlined_call_operand.hbm [shape: bf16[2,2,8], index: 0, kind: input, shape index: {}]   ;;  %s8000_s1 = inlined_call_operand.hbm [shape: bf16[8,128], index: 1, kind: input, shape index: {}]   ;;  %s8001_s2 = inlined_call_operand.vmem [shape: f32[1,128], index: 2, kind: input, shape index: {}]   ;;  %s8002_s3 = inlined_call_operand.hbm [shape: bf16[128,384], index: 3, kind: input, shape index: {}]   ;;  %s8003_s4 = inlined_call_operand.hbm [shape: bf16[128,384], index: 4, kind: input, shape index: {}]   ;;  %s8004_s5 = inlined_call_operand.vmem [shape: f32[1,256], index: 5, kind: input, shape index: {}]   ;;  %s8005_s6 = inlined_call_operand.vmem [shape: f32[1,128], index: 6, kind: input, shape index: {}]   ;;  %s8006_s7 = inlined_call_operand.vmem [shape: f32[1,128], index: 7, kind: input, shape index: {}]   ;;  %s8007_s8 = inlined_call_operand.hbm [shape: bf16[128,384], index: 8, kind: input, shape index: {}]   ;;  %s8008_s9 = inlined_call_operand.hbm [shape: bf16[128,384], index: 9, kind: input, shape index: {}]   ;;  %s8009_s10 = inlined_call_operand.vmem [shape: f32[1,256], index: 10, kind: input, shape index: {}]   ;;  %s8010_s11 = inlined_call_operand.vmem [shape: f32[1,128], index: 11, kind: input, shape index: {}]   ;;  %s8011_s12 = inlined_call_operand.vmem [shape: f32[1,128], index: 12, kind: input, shape index: {}]   ;;  %s8012_s13 = inlined_call_operand.hbm [shape: bf16[128,128], index: 13, kind: input, shape index: {}]   ;;  %s8013_s14 = inlined_call_operand.vmem [shape: f32[1,128], index: 14, kind: input, shape index: {}]   ;;  %s8014_s15 = inlined_call_operand.hbm [shape: f32[2,512], index: 15, kind: output, shape index: {}]  }
   0x1   :  { %21 = vsyncpa [#allocation6], 0 }
   0x2   :  { %22 = vsyncpa [#allocation9], 0 }
   0x3   :  { %23 = vsyncpa [#allocation12], 0 }
   0x4   :  { %24 = vsyncpa [#allocation4], 0  ;;  %s6821_s18 = smov [#allocation5]  }
   0x5   :  { %s43_s19 = sshll.u32 %s6821_s18, 4  ;;  %s44_s19 = int_to_ptr.vmem [resolvable:$true] %s43_s19 }
   0x6   :  { %s6659_s20 = scalar_lea.vmem %s44_s19, 64  ;;  %p6664_p1 = scmp.lt.s32.totalorder %s44_s19, %s44_s19 }
   0x7   :  { %p6660_p0 = scmp.ne.s32.totalorder %s44_s19, %s6659_s20  ;;  %p6665_p2 = scmp.lt.s32.totalorder %s6659_s20, %s6659_s20 }
   0x9   :  { %p6666_p3 = por %p6665_p2, %p6664_p1 }
   0xb   :  { %p6667_p4 = pnand %p6666_p3, %p6660_p0 }
   0xd   :  { %6670 = shalt.err (!%p6667_p4)
}
   0xe   :  { %46 = dma.hbm_to_vmem [thread:$0]  %s8000_s1, 64, %s44_s19, [#allocation6]  }
   0xf   :  { %s6822_s23 = smov [#allocation8]   ;;  %s6823_s25 = smov [#allocation11]  }
  0x10   :  { %s66_s24 = sshll.u32 %s6822_s23, 4  ;;  %s96_s26 = sshll.u32 %s6823_s25, 4  ;;  %s67_s24 = int_to_ptr.vmem [resolvable:$true] %s66_s24  ;;  %s97_s26 = int_to_ptr.vmem [resolvable:$true] %s96_s26 }
  0x11   :  { %s6679_s27 = scalar_lea.vmem %s67_s24, 3072  ;;  %p6684_p6 = scmp.lt.s32.totalorder %s67_s24, %s67_s24 }
  0x12   :  { %p6680_p5 = scmp.ne.s32.totalorder %s67_s24, %s6679_s27  ;;  %p6685_p7 = scmp.lt.s32.totalorder %s6679_s27, %s6679_s27 }
  0x14   :  { %p6686_p8 = por %p6685_p7, %p6684_p6 }
  0x16   :  { %p6687_p9 = pnand %p6686_p8, %p6680_p5 }
  0x18   :  { %6690 = shalt.err (!%p6687_p9)
}
  0x19   :  { %s6824_s28 = smov 192   ;;  %s6825_s29 = smov 12  }
  0x1a   :  { %72 = dma.hbm_to_vmem [thread:$0]  %s8003_s4, 3072, %s67_s24, [#allocation9], %s6824_s28, %s6824_s28, %s6825_s29  }
  0x1b   :  { %s6699_s1 = scalar_lea.vmem %s97_s26, 3072  ;;  %p6704_p11 = scmp.lt.s32.totalorder %s97_s26, %s97_s26 }
  0x1c   :  { %p6700_p10 = scmp.ne.s32.totalorder %s97_s26, %s6699_s1  ;;  %p6705_p12 = scmp.lt.s32.totalorder %s6699_s1, %s6699_s1 }
  0x1e   :  { %p6706_p13 = por %p6705_p12, %p6704_p11 }
  0x20   :  { %p6707_p0 = pnand %p6706_p13, %p6700_p10 }
  0x22   :  { %6710 = shalt.err (!%p6707_p0)
}
  0x23   :  { %102 = dma.hbm_to_vmem [thread:$0]  %s8008_s9, 3072, %s97_s26, [#allocation12], %s6824_s28, %s6824_s28, %s6825_s29  }
  0x24   :  { %s6826_s19 = smov [#allocation2]  }
  0x25   :  { %s30_s20 = sshll.u32 %s6826_s19, 4  ;;  %s31_s20 = int_to_ptr.vmem [resolvable:$true] %s30_s20 }
  0x26   :  { %s6719_s21 = scalar_lea.vmem %s31_s20, 32  ;;  %p6724_p2 = scmp.lt.s32.totalorder %s31_s20, %s31_s20 }
  0x27   :  { %p6720_p1 = scmp.ne.s32.totalorder %s31_s20, %s6719_s21  ;;  %p6725_p3 = scmp.lt.s32.totalorder %s6719_s21, %s6719_s21 }
  0x29   :  { %p6726_p4 = por %p6725_p3, %p6724_p2 }
  0x2b   :  { %p6727_p5 = pnand %p6726_p4, %p6720_p1 }
  0x2d   :  { %6730 = shalt.err (!%p6727_p5)
}
  0x2e   :  { %s6827_s4 = smov 16   ;;  %s6828_s22 = smov 1  }
  0x2f   :  { %36 = dma.hbm_to_vmem [thread:$0]  %s7999_s0, 32, %s31_s20, [#allocation3], %s6827_s4, %s6827_s4, %s6828_s22  }
  0x30   :  { %s6829_s25 = smov [#allocation7]   ;;  %s6830_s30 = smov [#allocation10]  }
  0x31   :  { %s54_s27 = sshll.u32 %s6829_s25, 4  ;;  %s84_s9 = sshll.u32 %s6830_s30, 4  ;;  %s55_s27 = int_to_ptr.vmem [resolvable:$true] %s54_s27  ;;  %s85_s9 = int_to_ptr.vmem [resolvable:$true] %s84_s9 }
  0x32   :  { %s6739_s26 = scalar_lea.vmem %s55_s27, 3072  ;;  %p6744_p7 = scmp.lt.s32.totalorder %s55_s27, %s55_s27 }
  0x33   :  { %p6740_p6 = scmp.ne.s32.totalorder %s55_s27, %s6739_s26  ;;  %p6745_p8 = scmp.lt.s32.totalorder %s6739_s26, %s6739_s26 }
  0x35   :  { %p6746_p9 = por %p6745_p8, %p6744_p7 }
  0x37   :  { %p6747_p10 = pnand %p6746_p9, %p6740_p6 }
  0x39   :  { %6750 = shalt.err (!%p6747_p10)
}
  0x3a   :  { %60 = dma.hbm_to_vmem [thread:$0]  %s8002_s3, 3072, %s55_s27, [#allocation6], %s6824_s28, %s6824_s28, %s6825_s29  }
  0x3b   :  { %s6759_s0 = scalar_lea.vmem %s85_s9, 3072  ;;  %p6764_p12 = scmp.lt.s32.totalorder %s85_s9, %s85_s9 }
  0x3c   :  { %p6760_p11 = scmp.ne.s32.totalorder %s85_s9, %s6759_s0  ;;  %p6765_p13 = scmp.lt.s32.totalorder %s6759_s0, %s6759_s0 }
  0x3e   :  { %p6766_p0 = por %p6765_p13, %p6764_p12 }
  0x40   :  { %p6767_p1 = pnand %p6766_p0, %p6760_p11 }
  0x42   :  { %6770 = shalt.err (!%p6767_p1)
}
  0x43   :  { %90 = dma.hbm_to_vmem [thread:$0]  %s8007_s8, 3072, %s85_s9, [#allocation9], %s6824_s28, %s6824_s28, %s6825_s29  }
  0x44   :  { %s6831_s19 = smov [#allocation13]  }
  0x45   :  { %s114_s20 = sshll.u32 %s6831_s19, 4  ;;  %s115_s20 = int_to_ptr.vmem [resolvable:$true] %s114_s20 }
  0x46   :  { %s6779_s21 = scalar_lea.vmem %s115_s20, 1024  ;;  %p6784_p3 = scmp.lt.s32.totalorder %s115_s20, %s115_s20 }
  0x47   :  { %p6780_p2 = scmp.ne.s32.totalorder %s115_s20, %s6779_s21  ;;  %p6785_p4 = scmp.lt.s32.totalorder %s6779_s21, %s6779_s21 }
  0x49   :  { %p6786_p5 = por %p6785_p4, %p6784_p3 }
  0x4b   :  { %p6787_p6 = pnand %p6786_p5, %p6780_p2 }
  0x4d   :  { %6790 = shalt.err (!%p6787_p6)
}
  0x4e   :  { %s6832_s3 = smov 64   ;;  %s6833_s4 = smov 4  }
  0x4f   :  { %120 = dma.hbm_to_vmem [thread:$0]  %s8012_s13, 1024, %s115_s20, [#allocation12], %s6832_s3, %s6832_s3, %s6833_s4  }
  0x50   :  { %6811 = dma.done.wait [#allocation3], 32  }
  0x51   :  { %6812 = vsyncadd [#allocation3], 4294967264 }
  0x52   :  { %6813 = dma.done.wait [#allocation6], 3136  }
  0x53   :  { %6814 = vsyncadd [#allocation6], 4294964160 }
  0x54   :  { %6815 = dma.done.wait [#allocation9], 6144  }
  0x55   :  { %6816 = vsyncadd [#allocation9], 4294961152 }
  0x56   :  { %6817 = dma.done.wait [#allocation12], 4096  }
  0x57   :  { %6818 = vsyncadd [#allocation12], 4294963200  ;;  %v8020_v0 = vmov 0.0   ;;  %vm6835_vm0 = vmmov 0   ;;  %vm158_vm1 = vcmask 1043456   ;;  %vm154_vm2 = vcmask 64512  }
  0x58   :  { %5667 = vmatprep.subr.bf16.mxu0 %v8020_v0  ;;  %5669 = vmatprep.mubr.msk.bf16.mxu0 %vm6835_vm0, %v8020_v0  ;;  %v146_v1 = vld [vmem:[#allocation5] sm:$0xf]  ;;  %v145_v2 = vld [vmem:[#allocation2] sm:$0x1]  ;;  %v6136_v4 = vld [vmem:[#allocation8 + $0xa8] ss:$12 sps:$4 sm:$0xff]  }
  0x59   :  { %5673 = vmatprep.subr.bf16.mxu1 %v8020_v0  ;;  %5675 = vmatprep.mubr.msk.bf16.mxu1 %vm6835_vm0, %v8020_v0  ;;  %v160_v3 = vsel %vm158_vm1, %v146_v1, 0  ;;  %v6138_v5 = vld [vmem:[#allocation8 + $0xac] ss:$12 sps:$4 sm:$0xff]   ;;  %v6139_v7 = vld [vmem:[#allocation8 + $0xb0] ss:$12 sps:$4 sm:$0xff]   ;;  %v8015_v29 = vmov 0  }
  0x5a   :  { %5668 = vmatpush3.bf16.msra.mxu0 %v160_v3  ;;  %5674 = vmatpush3.bf16.msra.mxu1 %v160_v3  ;;  %v204_v6 = vld [vmem:[#allocation2 + $0x1] sm:$0x1]  ;;  %v6142_v8 = vld [vmem:[#allocation8 + $0x94] ss:$12 sps:$4 sm:$0xff]   ;;  %v6140_v9 = vld [vmem:[#allocation8 + $0x90] ss:$12 sps:$4 sm:$0xff]  }
  0x5b   :  { %411 = vmatprep.subr.bf16.mxu0 %v6138_v5  ;;  %5679 = vmatprep.subr.bf16.mxu1 %v8020_v0  ;;  %v6143_v10 = vld [vmem:[#allocation8 + $0x98] ss:$12 sps:$4 sm:$0xff]   ;;  %v6146_v11 = vld [vmem:[#allocation8 + $0x7c] ss:$12 sps:$4 sm:$0xff]   ;;  %v6147_v13 = vld [vmem:[#allocation8 + $0x80] ss:$12 sps:$4 sm:$0xff]  }
  0x5c   :  { %v6144_v12 = vld [vmem:[#allocation8 + $0x78] ss:$12 sps:$4 sm:$0xff]   ;;  %v6148_v15 = vld [vmem:[#allocation8 + $0x60] ss:$12 sps:$4 sm:$0xff]   ;;  %v6151_v16 = vld [vmem:[#allocation8 + $0x68] ss:$12 sps:$4 sm:$0xff]  }
  0x5d   :  { %5670 = vmatmul.mubr.msk.bf16.vlgmr.msra.gmra.mxu0 %vm154_vm2, %v145_v2  ;;  %5676 = vmatmul.mubr.msk.bf16.vlgmr.msra.gmra.mxu1 %vm154_vm2, %v204_v6  ;;  %v6150_v14 = vld [vmem:[#allocation8 + $0x64] ss:$12 sps:$4 sm:$0xff]   ;;  %v6154_v17 = vld [vmem:[#allocation8 + $0x4c] ss:$12 sps:$4 sm:$0xff]   ;;  %v6152_v18 = vld [vmem:[#allocation8 + $0x48] ss:$12 sps:$4 sm:$0xff]  }
  0x5e   :  { %412 = vmatpush1.bf16.msra.mxu0 %v6136_v4  ;;  %5680 = vmatpush3.bf16.msra.mxu1 %v6139_v7  ;;  %v6155_v19 = vld [vmem:[#allocation8 + $0x50] ss:$12 sps:$4 sm:$0xff]   ;;  %v6158_v20 = vld [vmem:[#allocation8 + $0x34] ss:$12 sps:$4 sm:$0xff]   ;;  %v6159_v22 = vld [vmem:[#allocation8 + $0x38] ss:$12 sps:$4 sm:$0xff]  }
  0x5f   :  { %413 = vmatprep.subr.bf16.mxu0 %v6142_v8  ;;  %5681 = vmatprep.subr.bf16.mxu1 %v8020_v0  ;;  %v6156_v21 = vld [vmem:[#allocation8 + $0x30] ss:$12 sps:$4 sm:$0xff]   ;;  %v6160_v24 = vld [vmem:[#allocation8 + $0x18] ss:$12 sps:$4 sm:$0xff]   ;;  %v6163_v25 = vld [vmem:[#allocation8 + $0x20] ss:$12 sps:$4 sm:$0xff]  }
  0x60   :  { %5695 = vmatprep.mubr.msk.bf16.mxu1 %vm6835_vm0, %v8020_v0  ;;  %v6162_v23 = vld [vmem:[#allocation8 + $0x1c] ss:$12 sps:$4 sm:$0xff]   ;;  %v6966_v26 = vld [vmem:[#allocation8 + $0x4] ss:$12 sps:$4 sm:$0xff]   ;;  %v6969_v27 = vld [vmem:[#allocation8] ss:$12 sps:$4 sm:$0xff]   ;;  %443 = vmatprep.mubr.bf16.mxu0 %v8015_v29 }
  0x61   :  { %v6971_v28 = vld [vmem:[#allocation8 + $0x8] ss:$12 sps:$4 sm:$0xff]   ;;  %v6978_v30 = vld [vmem:[#allocation11 + $0xac] ss:$12 sps:$4 sm:$0xff]   ;;  %v6988_v40 = vld [vmem:[#allocation11 + $0xb0] ss:$12 sps:$4 sm:$0xff]  }
  0x62   :  { %414 = vmatpush1.bf16.msra.mxu0 %v6140_v9  ;;  %5682 = vmatpush3.bf16.msra.mxu1 %v6143_v10  ;;  %v5030_v31 = vld [vmem:[%s8001_s2] ss:$0 sm:$0xff]  ;;  %v6986_v39 = vld [vmem:[#allocation11 + $0xa8] ss:$12 sps:$4 sm:$0xff]   ;;  %v6996_v46 = vld [vmem:[#allocation11 + $0x90] ss:$12 sps:$4 sm:$0xff]  }
  0x63   :  { %415 = vmatprep.subr.bf16.mxu0 %v6146_v11  ;;  %5683 = vmatprep.subr.bf16.mxu1 %v8020_v0  ;;  %v6992_v43 = vld [vmem:[#allocation11 + $0x94] ss:$12 sps:$4 sm:$0xff]   ;;  %v6998_v47 = vld [vmem:[#allocation11 + $0x98] ss:$12 sps:$4 sm:$0xff]   ;;  %v7002_v48 = vld [vmem:[#allocation11 + $0x7c] ss:$12 sps:$4 sm:$0xff]  }
  0x64   :  { %v7009_v49 = vld [vmem:[#allocation11 + $0x78] ss:$12 sps:$4 sm:$0xff]   ;;  %v7011_v50 = vld [vmem:[#allocation11 + $0x80] ss:$12 sps:$4 sm:$0xff]   ;;  %v7021_v53 = vld [vmem:[#allocation11 + $0x68] ss:$12 sps:$4 sm:$0xff]  }
  0x65   :  { %v7015_v51 = vld [vmem:[#allocation11 + $0x64] ss:$12 sps:$4 sm:$0xff]   ;;  %v7019_v52 = vld [vmem:[#allocation11 + $0x60] ss:$12 sps:$4 sm:$0xff]   ;;  %v7029_v55 = vld [vmem:[#allocation11 + $0x48] ss:$12 sps:$4 sm:$0xff]  }
  0x66   :  { %416 = vmatpush1.bf16.msra.mxu0 %v6144_v12  ;;  %5684 = vmatpush3.bf16.msra.mxu1 %v6147_v13  ;;  %v7025_v54 = vld [vmem:[#allocation11 + $0x4c] ss:$12 sps:$4 sm:$0xff]   ;;  %v7031_v56 = vld [vmem:[#allocation11 + $0x50] ss:$12 sps:$4 sm:$0xff]   ;;  %v7035_v57 = vld [vmem:[#allocation11 + $0x34] ss:$12 sps:$4 sm:$0xff]  }
  0x67   :  { %417 = vmatprep.subr.bf16.mxu0 %v6150_v14  ;;  %5685 = vmatprep.subr.bf16.mxu1 %v8020_v0  ;;  %v7039_v58 = vld [vmem:[#allocation11 + $0x30] ss:$12 sps:$4 sm:$0xff]   ;;  %v7041_v59 = vld [vmem:[#allocation11 + $0x38] ss:$12 sps:$4 sm:$0xff]   ;;  %v7051_v63 = vld [vmem:[#allocation11 + $0x20] ss:$12 sps:$4 sm:$0xff]  }
  0x68   :  { %v7045_v60 = vld [vmem:[#allocation11 + $0x1c] ss:$12 sps:$4 sm:$0xff]   ;;  %v7049_v62 = vld [vmem:[#allocation11 + $0x18] ss:$12 sps:$4 sm:$0xff]   ;;  %v7061_v3 = vld [vmem:[#allocation11] ss:$12 sps:$4 sm:$0xff]  }
  0x69   :  { %v7055_v1 = vld [vmem:[#allocation11 + $0x4] ss:$12 sps:$4 sm:$0xff]   ;;  %v7063_v4 = vld [vmem:[#allocation11 + $0x8] ss:$12 sps:$4 sm:$0xff]   ;;  %v7075_v6 = vld [vmem:[#allocation10 + $0xac] ss:$12 sps:$4 sm:$0xff]  }
  0x6a   :  { %418 = vmatpush1.bf16.msra.mxu0 %v6148_v15  ;;  %5686 = vmatpush3.bf16.msra.mxu1 %v6151_v16  ;;  %v7077_v7 = vld [vmem:[#allocation10 + $0xa8] ss:$12 sps:$4 sm:$0xff]   ;;  %v7079_v8 = vld [vmem:[#allocation10 + $0xb0] ss:$12 sps:$4 sm:$0xff]   ;;  %v7089_v11 = vld [vmem:[#allocation10 + $0x98] ss:$12 sps:$4 sm:$0xff]  }
  0x6b   :  { %419 = vmatprep.subr.bf16.mxu0 %v6154_v17  ;;  %5687 = vmatprep.subr.bf16.mxu1 %v8020_v0  ;;  %v7084_v9 = vld [vmem:[#allocation10 + $0x94] ss:$12 sps:$4 sm:$0xff]   ;;  %v7087_v10 = vld [vmem:[#allocation10 + $0x90] ss:$12 sps:$4 sm:$0xff]   ;;  %v7097_v13 = vld [vmem:[#allocation10 + $0x78] ss:$12 sps:$4 sm:$0xff]  }
  0x6c   :  { %v7094_v12 = vld [vmem:[#allocation10 + $0x7c] ss:$12 sps:$4 sm:$0xff]   ;;  %v7099_v14 = vld [vmem:[#allocation10 + $0x80] ss:$12 sps:$4 sm:$0xff]   ;;  %v7104_v15 = vld [vmem:[#allocation10 + $0x64] ss:$12 sps:$4 sm:$0xff]  }
  0x6d   :  { %v7107_v16 = vld [vmem:[#allocation10 + $0x60] ss:$12 sps:$4 sm:$0xff]   ;;  %v7109_v17 = vld [vmem:[#allocation10 + $0x68] ss:$12 sps:$4 sm:$0xff]  }
  0x6e   :  { %420 = vmatpush1.bf16.msra.mxu0 %v6152_v18  ;;  %5688 = vmatpush3.bf16.msra.mxu1 %v6155_v19  ;;  %8051 = vst [vmem:[#allocation20_spill] sm:$0xff] %v7107_v16  ;;  %8052 = vst [vmem:[#allocation21_spill] sm:$0xff] %v7109_v17  ;;  %v7112_v18 = vld [vmem:[#allocation10 + $0x4c] ss:$12 sps:$4 sm:$0xff]   ;;  %v7116_v19 = vld [vmem:[#allocation10 + $0x48] ss:$12 sps:$4 sm:$0xff]  }
  0x6f   :  { %421 = vmatprep.subr.bf16.mxu0 %v6158_v20  ;;  %5689 = vmatprep.subr.bf16.mxu1 %v8020_v0  ;;  %8053 = vst [vmem:[#allocation22_spill] sm:$0xff] %v7112_v18  ;;  %8054 = vst [vmem:[#allocation23_spill] sm:$0xff] %v7116_v19  ;;  %v7118_v20 = vld [vmem:[#allocation10 + $0x50] ss:$12 sps:$4 sm:$0xff]  }
  0x70   :  { %8055 = vst [vmem:[#allocation24_spill] sm:$0xff] %v7118_v20 }
  0x72   :  { %422 = vmatpush1.bf16.msra.mxu0 %v6156_v21  ;;  %5690 = vmatpush3.bf16.msra.mxu1 %v6159_v22  ;;  %v7122_v21 = vld [vmem:[#allocation10 + $0x34] ss:$12 sps:$4 sm:$0xff]   ;;  %v7126_v22 = vld [vmem:[#allocation10 + $0x30] ss:$12 sps:$4 sm:$0xff]  }
  0x73   :  { %423 = vmatprep.subr.bf16.mxu0 %v6162_v23  ;;  %5691 = vmatprep.subr.bf16.mxu1 %v8020_v0  ;;  %8056 = vst [vmem:[#allocation25_spill] sm:$0xff] %v7122_v21  ;;  %8057 = vst [vmem:[#allocation26_spill] sm:$0xff] %v7126_v22  ;;  %v7128_v23 = vld [vmem:[#allocation10 + $0x38] ss:$12 sps:$4 sm:$0xff]  }
  0x74   :  { %8058 = vst [vmem:[#allocation27_spill] sm:$0xff] %v7128_v23 }
  0x76   :  { %424 = vmatpush1.bf16.msra.mxu0 %v6160_v24  ;;  %5692 = vmatpush3.bf16.msra.mxu1 %v6163_v25  ;;  %v7132_v24 = vld [vmem:[#allocation10 + $0x1c] ss:$12 sps:$4 sm:$0xff]   ;;  %v7136_v25 = vld [vmem:[#allocation10 + $0x18] ss:$12 sps:$4 sm:$0xff]  }
  0x77   :  { %5693 = vmatprep.subr.bf16.mxu1 %v8020_v0  ;;  %425 = vmatprep.subr.bf16.mxu0 %v6966_v26  ;;  %8059 = vst [vmem:[#allocation28_spill] sm:$0xff] %v7132_v24  ;;  %8060 = vst [vmem:[#allocation29_spill] sm:$0xff] %v7136_v25 }
  0x7a   :  { %426 = vmatpush1.bf16.msra.mxu0 %v6969_v27  ;;  %5694 = vmatpush3.bf16.msra.mxu1 %v6971_v28 }
  0x7b   :  { %5699 = vmatprep.subr.bf16.mxu1 %v8020_v0  ;;  %700 = vmatprep.subr.bf16.mxu0 %v6978_v30 }
 0x11d   :  { %v196_v32 = vpop.f32.mrf.mxu0  ;;  %v242_v33 = vpop.f32.mrf.mxu1 }
 0x11e   :  { %v197_v34 = vadd.f32 %v5030_v31, %v196_v32  ;;  %v243_v61 = vadd.f32 %v5030_v31, %v242_v33  ;;  %v7138_v31 = vld [vmem:[#allocation10 + $0x20] ss:$12 sps:$4 sm:$0xff]   ;;  %v7142_v32 = vld [vmem:[#allocation10 + $0x4] ss:$12 sps:$4 sm:$0xff]  }
 0x11f   :  { %v5671_v35 = vpop.f32.mrf.mxu0  ;;  %v5677_v36 = vpop.f32.mrf.mxu1  ;;  %8061 = vst [vmem:[#allocation30_spill] sm:$0xff] %v7138_v31  ;;  %8062 = vst [vmem:[#allocation31_spill] sm:$0xff] %v7142_v32  ;;  %v7146_v33 = vld [vmem:[#allocation10] ss:$12 sps:$4 sm:$0xff]  }
 0x120   :  { %v6984_v37 = vmax.f32 %v197_v34, 0.0  ;;  %v7057_v2 = vmax.f32 %v243_v61, 0.0  ;;  %8063 = vst [vmem:[#allocation32_spill] sm:$0xff] %v7146_v33  ;;  %v7148_v34 = vld [vmem:[#allocation10 + $0x8] ss:$12 sps:$4 sm:$0xff]   ;;  %v494_v36 = vlaneseq }
 0x121   :  { %v199_v38 = vpop.f32.mrf.mxu0  ;;  %v245_v41 = vpop.f32.mrf.mxu1  ;;  %8064 = vst [vmem:[#allocation33_spill] sm:$0xff] %v7148_v34  ;;  %v7154_v35 = vld [vmem:[#allocation8 + $0xac] ss:$12 sps:$4 sm:$0xff]  }
 0x122   :  { %v249_v42 = vpack.c.bf16 %v6984_v37, %v6984_v37  ;;  %v250_v5 = vpack.c.bf16 %v7057_v2, %v7057_v2  ;;  %8065 = vst [vmem:[#allocation34_spill] sm:$0xff] %v7154_v35  ;;  %v495_v38 = vshrl.u32 %v494_v36, 7 }
 0x123   :  { %v5672_v44 = vpop.f32.mrf.mxu0  ;;  %v5678_v45 = vpop.f32.mrf.mxu1 }
 0x124   :  { %444 = vmatmul.mubr.bf16.vlgmr.msra.gmra.mxu0 %v249_v42  ;;  %5696 = vmatmul.mubr.bf16.vlgmr.msra.gmra.mxu1 %v249_v42  ;;  %v7158_v41 = vsub.s32 0, %v495_v38  ;;  %v492_v42 = vld [vmem:[%s8004_s5] sm:$0x3] }
 0x125   :  { %701 = vmatpush1.bf16.msra.mxu0 %v6986_v39  ;;  %5700 = vmatpush3.bf16.msra.mxu1 %v6988_v40 }
 0x126   :  { %702 = vmatprep.subr.bf16.mxu0 %v6992_v43  ;;  %5701 = vmatprep.subr.bf16.mxu1 %v8020_v0  ;;  %v7164_v44 = vrot.slane %v492_v42, %v7158_v41 }
 0x127   :  { %732 = vmatprep.mubr.bf16.mxu0 %v8015_v29  ;;  %5715 = vmatprep.mubr.msk.bf16.mxu1 %vm6835_vm0, %v8020_v0 }
 0x129   :  { %703 = vmatpush1.bf16.msra.mxu0 %v6996_v46  ;;  %5702 = vmatpush3.bf16.msra.mxu1 %v6998_v47 }
 0x12a   :  { %704 = vmatprep.subr.bf16.mxu0 %v7002_v48  ;;  %5703 = vmatprep.subr.bf16.mxu1 %v8020_v0 }
 0x12d   :  { %705 = vmatpush1.bf16.msra.mxu0 %v7009_v49  ;;  %5704 = vmatpush3.bf16.msra.mxu1 %v7011_v50 }
 0x12e   :  { %706 = vmatprep.subr.bf16.mxu0 %v7015_v51  ;;  %5705 = vmatprep.subr.bf16.mxu1 %v8020_v0 }
 0x131   :  { %707 = vmatpush1.bf16.msra.mxu0 %v7019_v52  ;;  %5706 = vmatpush3.bf16.msra.mxu1 %v7021_v53 }
 0x132   :  { %708 = vmatprep.subr.bf16.mxu0 %v7025_v54  ;;  %5707 = vmatprep.subr.bf16.mxu1 %v8020_v0 }
 0x135   :  { %709 = vmatpush1.bf16.msra.mxu0 %v7029_v55  ;;  %5708 = vmatpush3.bf16.msra.mxu1 %v7031_v56 }
 0x136   :  { %710 = vmatprep.subr.bf16.mxu0 %v7035_v57  ;;  %5709 = vmatprep.subr.bf16.mxu1 %v8020_v0 }
 0x139   :  { %711 = vmatpush1.bf16.msra.mxu0 %v7039_v58  ;;  %5710 = vmatpush3.bf16.msra.mxu1 %v7041_v59 }
 0x13a   :  { %712 = vmatprep.subr.bf16.mxu0 %v7045_v60  ;;  %5711 = vmatprep.subr.bf16.mxu1 %v8020_v0 }
 0x13d   :  { %713 = vmatpush1.bf16.msra.mxu0 %v7049_v62  ;;  %5712 = vmatpush3.bf16.msra.mxu1 %v7051_v63 }
 0x13e   :  { %714 = vmatprep.subr.bf16.mxu0 %v7055_v1  ;;  %5713 = vmatprep.subr.bf16.mxu1 %v8020_v0 }
 0x141   :  { %715 = vmatpush1.bf16.msra.mxu0 %v7061_v3  ;;  %5714 = vmatpush3.bf16.msra.mxu1 %v7063_v4 }
 0x142   :  { %5719 = vmatprep.subr.bf16.mxu1 %v8020_v0  ;;  %941 = vmatprep.subr.bf16.mxu0 %v7075_v6 }
 0x144   :  { %733 = vmatmul.mubr.bf16.vlgmr.msra.gmra.mxu0 %v250_v5  ;;  %5716 = vmatmul.mubr.bf16.vlgmr.msra.gmra.mxu1 %v250_v5 }
 0x145   :  { %973 = vmatprep.mubr.bf16.mxu0 %v8015_v29  ;;  %5735 = vmatprep.mubr.msk.bf16.mxu1 %vm6835_vm0, %v8020_v0 }
 0x146   :  { %942 = vmatpush1.bf16.msra.mxu0 %v7077_v7  ;;  %5720 = vmatpush3.bf16.msra.mxu1 %v7079_v8 }
 0x147   :  { %5721 = vmatprep.subr.bf16.mxu1 %v8020_v0  ;;  %943 = vmatprep.subr.bf16.mxu0 %v7084_v9 }
 0x14a   :  { %944 = vmatpush1.bf16.msra.mxu0 %v7087_v10  ;;  %5722 = vmatpush3.bf16.msra.mxu1 %v7089_v11 }
 0x14b   :  { %5723 = vmatprep.subr.bf16.mxu1 %v8020_v0  ;;  %945 = vmatprep.subr.bf16.mxu0 %v7094_v12 }
 0x14e   :  { %946 = vmatpush1.bf16.msra.mxu0 %v7097_v13  ;;  %5724 = vmatpush3.bf16.msra.mxu1 %v7099_v14 }
 0x14f   :  { %5725 = vmatprep.subr.bf16.mxu1 %v8020_v0  ;;  %947 = vmatprep.subr.bf16.mxu0 %v7104_v15 }
 0x152   :  { %948 = vmatpush1.bf16.msra.mxu0 %v7107_v16  ;;  %5726 = vmatpush3.bf16.msra.mxu1 %v7109_v17 }
 0x153   :  { %949 = vmatprep.subr.bf16.mxu0 %v7112_v18  ;;  %5727 = vmatprep.subr.bf16.mxu1 %v8020_v0 }
 0x156   :  { %950 = vmatpush1.bf16.msra.mxu0 %v7116_v19  ;;  %5728 = vmatpush3.bf16.msra.mxu1 %v7118_v20 }
 0x157   :  { %951 = vmatprep.subr.bf16.mxu0 %v7122_v21  ;;  %5729 = vmatprep.subr.bf16.mxu1 %v8020_v0 }
 0x15a   :  { %952 = vmatpush1.bf16.msra.mxu0 %v7126_v22  ;;  %5730 = vmatpush3.bf16.msra.mxu1 %v7128_v23 }
 0x15b   :  { %953 = vmatprep.subr.bf16.mxu0 %v7132_v24  ;;  %5731 = vmatprep.subr.bf16.mxu1 %v8020_v0 }
 0x15e   :  { %954 = vmatpush1.bf16.msra.mxu0 %v7136_v25  ;;  %5732 = vmatpush3.bf16.msra.mxu1 %v7138_v31 }
 0x15f   :  { %955 = vmatprep.subr.bf16.mxu0 %v7142_v32  ;;  %5733 = vmatprep.subr.bf16.mxu1 %v8020_v0 }
 0x162   :  { %956 = vmatpush1.bf16.msra.mxu0 %v7146_v33  ;;  %5734 = vmatpush3.bf16.msra.mxu1 %v7148_v34  ;;  %v7167_v33 = vsub.s32 1, %v495_v38 }
 0x163   :  { %1073 = vmatprep.subr.bf16.mxu0 %v7154_v35  ;;  %5739 = vmatprep.subr.bf16.mxu1 %v8020_v0 }
 0x164   :  { %v7170_v25 = vrot.slane %v492_v42, %v7167_v33 }
 0x1e4   :  { %v445_v45 = vpop.f32.mrf.mxu0  ;;  %v486_v61 = vpop.f32.mrf.mxu1 }
 0x1e5   :  { %v504_v5 = vadd.f32 %v7164_v44, %v445_v45 }
 0x1e6   :  { %v447_v29 = vpop.f32.mrf.mxu0  ;;  %v5697_v34 = vpop.f32.mrf.mxu1 }
 0x1e7   :  { %v5057_v35 = vmul.f32 -1.442695, %v504_v5  ;;  %v505_v24 = vadd.f32 %v7170_v25, %v447_v29  ;;  %v7176_v34 = vld [vmem:[%s8006_s7] ss:$0 sm:$0xff] }
 0x1e8   :  { %v449_v0 = vpop.f32.mrf.mxu0  ;;  %v489_v36 = vpop.f32.mrf.mxu1  ;;  %v7186_v29 = vld [vmem:[%s8005_s6] ss:$0 sm:$0xff] }
 0x1e9   :  { %6528 = vpow2.f32 %v5057_v35  ;;  %v5058_v23 = vmul.f32 -1.442695, %v505_v24 }
 0x1ea   :  { %v450_v32 = vpop.f32.mrf.mxu0  ;;  %v5698_v31 = vpop.f32.mrf.mxu1 }
 0x1eb   :  { %6530 = vpow2.f32 %v5058_v23  ;;  %v526_v32 = vadd.f32 %v7176_v34, %v486_v61 }
 0x1f6   :  { %v6529_v22 = vpop.eup %6528 }
 0x1f7   :  { %v513_v21 = vadd.f32 1.0, %v6529_v22 }
 0x1f8   :  { %v6531_v31 = vpop.eup %6530 }
 0x1f9   :  { %6532 = vrcp.f32 %v513_v21  ;;  %v514_v5 = vadd.f32 1.0, %v6531_v31  ;;  %v6630_v31 = vld [vmem:[#allocation8 + $0xb0] ss:$12 sps:$4 sm:$0xff]  }
 0x204   :  { %v7178_v0 = vpop.f32.mrf.mxu0  ;;  %v7180_v35 = vpop.f32.mrf.mxu1 }
 0x206   :  { %v6533_v38 = vpop.eup %6532  ;;  %v7188_v22 = vpop.f32.mrf.mxu0 }
 0x207   :  { %v5717_v21 = vpop.f32.mrf.mxu1  ;;  %v527_v23 = vmul.f32 %v6533_v38, %v526_v32  ;;  %v7196_v32 = vld [vmem:[#allocation8 + $0xa8] ss:$12 sps:$4 sm:$0xff]  }
 0x208   :  { %v738_v24 = vpop.f32.mrf.mxu0  ;;  %v7209_v38 = vld [vmem:[#allocation8 + $0x7c] ss:$12 sps:$4 sm:$0xff]  }
 0x209   :  { %v778_v42 = vpop.f32.mrf.mxu1  ;;  %v534_v45 = vadd.f32 %v7186_v29, %v527_v23  ;;  %v7213_v23 = vld [vmem:[#allocation8 + $0x78] ss:$12 sps:$4 sm:$0xff]   ;;  %v6636_v24 = vld [vmem:[#allocation8 + $0x80] ss:$12 sps:$4 sm:$0xff]  }
 0x20a   :  { %v739_v36 = vpop.f32.mrf.mxu0  ;;  %v7216_v42 = vld [vmem:[#allocation8 + $0x64] ss:$12 sps:$4 sm:$0xff]  }
 0x20b   :  { %v5718_v20 = vpop.f32.mrf.mxu1  ;;  %6534 = vtanh.f32 %v534_v45  ;;  %v7220_v45 = vld [vmem:[#allocation8 + $0x60] ss:$12 sps:$4 sm:$0xff]  }
 0x20c   :  { %6536 = vrcp.f32 %v514_v5  ;;  %v7199_v20 = vld [vmem:[#allocation8 + $0x94] ss:$12 sps:$4 sm:$0xff]   ;;  %v7223_v36 = vld [vmem:[#allocation8 + $0x4c] ss:$12 sps:$4 sm:$0xff]  }
 0x20d   :  { %v6639_v5 = vld [vmem:[#allocation8 + $0x68] ss:$12 sps:$4 sm:$0xff]   ;;  %8068 = vst [vmem:[#allocation35_spill] sm:$0xff] %v7223_v36 }
 0x218   :  { %v6535_v61 = vpop.eup %6534 }
 0x219   :  { %v536_v19 = vsub.f32 %v6984_v37, %v6535_v61  ;;  %v6537_v18 = vpop.eup %6536  ;;  %v8066_v37 = vmov 0.0  }
 0x21b   :  { %v537_v17 = vmul.f32 %v6537_v18, %v536_v19  ;;  %v8067_v18 = vmov 0   ;;  %v6633_v19 = vld [vmem:[#allocation8 + $0x98] ss:$12 sps:$4 sm:$0xff]  }
 0x21d   :  { %v7192_v16 = vadd.f32 %v6535_v61, %v537_v17  ;;  %v7206_v17 = vld [vmem:[#allocation8 + $0x90] ss:$12 sps:$4 sm:$0xff]   ;;  %v7227_v61 = vld [vmem:[#allocation8 + $0x48] ss:$12 sps:$4 sm:$0xff]  }
 0x21e   :  { %8069 = vst [vmem:[#allocation36_spill] sm:$0xff] %v7227_v61 }
 0x21f   :  { %v539_v21 = vpack.c.bf16 %v7192_v16, %v7192_v16 }
 0x221   :  { %974 = vmatmul.mubr.bf16.vlgmr.msra.gmra.mxu0 %v539_v21  ;;  %5736 = vmatmul.mubr.bf16.vlgmr.msra.gmra.mxu1 %v539_v21 }
 0x222   :  { %1074 = vmatpush1.bf16.msra.mxu0 %v7196_v32  ;;  %5740 = vmatpush3.bf16.msra.mxu1 %v6630_v31  ;;  %v6642_v31 = vld [vmem:[#allocation8 + $0x50] ss:$12 sps:$4 sm:$0xff]  }
 0x223   :  { %1075 = vmatprep.subr.bf16.mxu0 %v7199_v20  ;;  %5741 = vmatprep.subr.bf16.mxu1 %v8066_v37 }
 0x224   :  { %1105 = vmatprep.mubr.bf16.mxu0 %v8067_v18  ;;  %5755 = vmatprep.mubr.msk.bf16.mxu1 %vm6835_vm0, %v8066_v37 }
 0x226   :  { %1076 = vmatpush1.bf16.msra.mxu0 %v7206_v17  ;;  %5742 = vmatpush3.bf16.msra.mxu1 %v6633_v19  ;;  %v7230_v19 = vld [vmem:[#allocation8 + $0x34] ss:$12 sps:$4 sm:$0xff]  }
 0x227   :  { %1077 = vmatprep.subr.bf16.mxu0 %v7209_v38  ;;  %5743 = vmatprep.subr.bf16.mxu1 %v8066_v37 }
 0x22a   :  { %1078 = vmatpush1.bf16.msra.mxu0 %v7213_v23  ;;  %5744 = vmatpush3.bf16.msra.mxu1 %v6636_v24  ;;  %v7234_v24 = vld [vmem:[#allocation8 + $0x30] ss:$12 sps:$4 sm:$0xff]  }
 0x22b   :  { %1079 = vmatprep.subr.bf16.mxu0 %v7216_v42  ;;  %5745 = vmatprep.subr.bf16.mxu1 %v8066_v37 }
 0x22e   :  { %1080 = vmatpush1.bf16.msra.mxu0 %v7220_v45  ;;  %5746 = vmatpush3.bf16.msra.mxu1 %v6639_v5  ;;  %v6645_v5 = vld [vmem:[#allocation8 + $0x38] ss:$12 sps:$4 sm:$0xff]  }
 0x22f   :  { %1081 = vmatprep.subr.bf16.mxu0 %v7223_v36  ;;  %5747 = vmatprep.subr.bf16.mxu1 %v8066_v37  ;;  %v7237_v36 = vld [vmem:[#allocation8 + $0x1c] ss:$12 sps:$4 sm:$0xff]  }
 0x232   :  { %1082 = vmatpush1.bf16.msra.mxu0 %v7227_v61  ;;  %5748 = vmatpush3.bf16.msra.mxu1 %v6642_v31  ;;  %v7241_v61 = vld [vmem:[#allocation8 + $0x18] ss:$12 sps:$4 sm:$0xff]   ;;  %v6648_v31 = vld [vmem:[#allocation8 + $0x20] ss:$12 sps:$4 sm:$0xff]  }
 0x233   :  { %1083 = vmatprep.subr.bf16.mxu0 %v7230_v19  ;;  %5749 = vmatprep.subr.bf16.mxu1 %v8066_v37 }
 0x236   :  { %1084 = vmatpush1.bf16.msra.mxu0 %v7234_v24  ;;  %5750 = vmatpush3.bf16.msra.mxu1 %v6645_v5 }
 0x237   :  { %1085 = vmatprep.subr.bf16.mxu0 %v7237_v36  ;;  %5751 = vmatprep.subr.bf16.mxu1 %v8066_v37 }
 0x23a   :  { %1086 = vmatpush1.bf16.msra.mxu0 %v7241_v61  ;;  %5752 = vmatpush3.bf16.msra.mxu1 %v6648_v31 }
 0x23b   :  { %1087 = vmatprep.subr.bf16.mxu0 %v6966_v26  ;;  %5753 = vmatprep.subr.bf16.mxu1 %v8066_v37  ;;  %v1024_v26 = vld [vmem:[%s8009_s10] sm:$0x3] }
 0x23e   :  { %1088 = vmatpush1.bf16.msra.mxu0 %v6969_v27  ;;  %5754 = vmatpush3.bf16.msra.mxu1 %v6971_v28  ;;  %v7289_v27 = vrot.slane %v1024_v26, %v7158_v41 }
 0x23f   :  { %1176 = vmatprep.subr.bf16.mxu0 %v6978_v30  ;;  %5759 = vmatprep.subr.bf16.mxu1 %v8066_v37 }
 0x241   :  { %1106 = vmatmul.mubr.bf16.vlgmr.msra.gmra.mxu0 %v539_v21  ;;  %5756 = vmatmul.mubr.bf16.vlgmr.msra.gmra.mxu1 %v539_v21 }
 0x242   :  { %1177 = vmatpush1.bf16.msra.mxu0 %v6986_v39  ;;  %5760 = vmatpush3.bf16.msra.mxu1 %v6988_v40 }
 0x243   :  { %1178 = vmatprep.subr.bf16.mxu0 %v6992_v43  ;;  %5761 = vmatprep.subr.bf16.mxu1 %v8066_v37 }
 0x244   :  { %1208 = vmatprep.mubr.bf16.mxu0 %v8067_v18  ;;  %5775 = vmatprep.mubr.msk.bf16.mxu1 %vm6835_vm0, %v8066_v37 }
 0x246   :  { %1179 = vmatpush1.bf16.msra.mxu0 %v6996_v46  ;;  %5762 = vmatpush3.bf16.msra.mxu1 %v6998_v47 }
 0x247   :  { %1180 = vmatprep.subr.bf16.mxu0 %v7002_v48  ;;  %5763 = vmatprep.subr.bf16.mxu1 %v8066_v37 }
 0x24a   :  { %1181 = vmatpush1.bf16.msra.mxu0 %v7009_v49  ;;  %5764 = vmatpush3.bf16.msra.mxu1 %v7011_v50 }
 0x24b   :  { %1182 = vmatprep.subr.bf16.mxu0 %v7015_v51  ;;  %5765 = vmatprep.subr.bf16.mxu1 %v8066_v37 }
 0x24e   :  { %1183 = vmatpush1.bf16.msra.mxu0 %v7019_v52  ;;  %5766 = vmatpush3.bf16.msra.mxu1 %v7021_v53  ;;  %v7295_v53 = vrot.slane %v1024_v26, %v7167_v33 }
 0x24f   :  { %1184 = vmatprep.subr.bf16.mxu0 %v7025_v54  ;;  %5767 = vmatprep.subr.bf16.mxu1 %v8066_v37 }
 0x252   :  { %1185 = vmatpush1.bf16.msra.mxu0 %v7029_v55  ;;  %5768 = vmatpush3.bf16.msra.mxu1 %v7031_v56 }
 0x253   :  { %1186 = vmatprep.subr.bf16.mxu0 %v7035_v57  ;;  %5769 = vmatprep.subr.bf16.mxu1 %v8066_v37 }
 0x256   :  { %1187 = vmatpush1.bf16.msra.mxu0 %v7039_v58  ;;  %5770 = vmatpush3.bf16.msra.mxu1 %v7041_v59  ;;  %v7301_v58 = vld [vmem:[%s8011_s12] ss:$0 sm:$0xff] }
 0x257   :  { %1188 = vmatprep.subr.bf16.mxu0 %v7045_v60  ;;  %5771 = vmatprep.subr.bf16.mxu1 %v8066_v37 }
 0x25a   :  { %1189 = vmatpush1.bf16.msra.mxu0 %v7049_v62  ;;  %5772 = vmatpush3.bf16.msra.mxu1 %v7051_v63  ;;  %v7307_v63 = vld [vmem:[%s8010_s11] ss:$0 sm:$0xff] }
 0x25b   :  { %1190 = vmatprep.subr.bf16.mxu0 %v7055_v1  ;;  %5773 = vmatprep.subr.bf16.mxu1 %v8066_v37 }
 0x25e   :  { %1191 = vmatpush1.bf16.msra.mxu0 %v7061_v3  ;;  %5774 = vmatpush3.bf16.msra.mxu1 %v7063_v4 }
 0x25f   :  { %1257 = vmatprep.subr.bf16.mxu0 %v7075_v6  ;;  %5779 = vmatprep.subr.bf16.mxu1 %v8066_v37  ;;  %v1065_v6 = vadd.f32 %v7301_v58, %v7180_v35 }
 0x2e1   :  { %v975_v28 = vpop.f32.mrf.mxu0  ;;  %v1016_v30 = vpop.f32.mrf.mxu1 }
 0x2e2   :  { %v1022_v39 = vadd.f32 %v975_v28, %v7178_v0  ;;  %v1045_v31 = vadd.f32 %v7307_v63, %v1016_v30 }
 0x2e3   :  { %v977_v40 = vpop.f32.mrf.mxu0  ;;  %v5737_v43 = vpop.f32.mrf.mxu1 }
 0x2e4   :  { %v1036_v46 = vadd.f32 %v7289_v27, %v1022_v39  ;;  %v1023_v52 = vadd.f32 %v977_v40, %v7188_v22 }
 0x2e5   :  { %v979_v47 = vpop.f32.mrf.mxu0  ;;  %v1019_v48 = vpop.f32.mrf.mxu1 }
 0x2e6   :  { %v5110_v49 = vmul.f32 -1.442695, %v1036_v46  ;;  %v1037_v54 = vadd.f32 %v7295_v53, %v1023_v52 }
 0x2e7   :  { %v980_v50 = vpop.f32.mrf.mxu0  ;;  %v5738_v51 = vpop.f32.mrf.mxu1 }
 0x2e8   :  { %6538 = vpow2.f32 %v5110_v49  ;;  %v5111_v55 = vmul.f32 -1.442695, %v1037_v54 }
 0x2ea   :  { %6540 = vpow2.f32 %v5111_v55 }
 0x2f5   :  { %v6539_v56 = vpop.eup %6538 }
 0x2f6   :  { %v1052_v57 = vadd.f32 1.0, %v6539_v56  ;;  %v8078_v56 = vld [vmem:[#allocation28_spill] sm:$0xff] }
 0x2f7   :  { %v6541_v4 = vpop.eup %6540 }
 0x2f8   :  { %6542 = vrcp.f32 %v1052_v57  ;;  %v1053_v40 = vadd.f32 1.0, %v6541_v4 }
 0x301   :  { %v1107_v59 = vpop.f32.mrf.mxu0  ;;  %v1148_v60 = vpop.f32.mrf.mxu1 }
 0x302   :  { %v1154_v62 = vadd.f32 %v1107_v59, %v7164_v44  ;;  %v1168_v54 = vadd.f32 %v7176_v34, %v1148_v60  ;;  %v8074_v34 = vld [vmem:[#allocation24_spill] sm:$0xff] }
 0x303   :  { %v1109_v1 = vpop.f32.mrf.mxu0  ;;  %v5757_v3 = vpop.f32.mrf.mxu1 }
 0x304   :  { %v5113_v0 = vmul.f32 -1.442695, %v1154_v62  ;;  %v1155_v43 = vadd.f32 %v1109_v1, %v7170_v25  ;;  %v8079_v62 = vld [vmem:[#allocation29_spill] sm:$0xff]  ;;  %v8080_v1 = vld [vmem:[#allocation30_spill] sm:$0xff]  ;;  %v8081_v3 = vld [vmem:[#allocation31_spill] sm:$0xff] }
 0x305   :  { %v6543_v22 = vpop.eup %6542  ;;  %v1111_v21 = vpop.f32.mrf.mxu0 }
 0x306   :  { %v1151_v5 = vpop.f32.mrf.mxu1  ;;  %v1066_v26 = vmul.f32 %v6543_v22, %v1065_v6  ;;  %6544 = vpow2.f32 %v5113_v0  ;;  %v5114_v46 = vmul.f32 -1.442695, %v1155_v43  ;;  %v8082_v6 = vld [vmem:[#allocation32_spill] sm:$0xff]  ;;  %v8083_v0 = vld [vmem:[#allocation33_spill] sm:$0xff]  ;;  %v8085_v21 = vld [vmem:[#allocation35_spill] sm:$0xff] }
 0x307   :  { %v1112_v44 = vpop.f32.mrf.mxu0  ;;  %v7390_v5 = vld [vmem:[#allocation7 + $0xa8] ss:$12 sps:$4 sm:$0xff]   ;;  %v7398_v43 = vld [vmem:[#allocation7 + $0x90] ss:$12 sps:$4 sm:$0xff]  }
 0x308   :  { %v5758_v28 = vpop.f32.mrf.mxu1  ;;  %v1067_v39 = vadd.f32 %v1066_v26, %v1045_v31  ;;  %v7392_v31 = vld [vmem:[#allocation7 + $0xac] ss:$12 sps:$4 sm:$0xff]  }
 0x309   :  { %v7394_v28 = vld [vmem:[#allocation7 + $0x94] ss:$12 sps:$4 sm:$0xff]  }
 0x30a   :  { %6546 = vtanh.f32 %v1067_v39 }
 0x30b   :  { %6548 = vrcp.f32 %v1053_v40 }
 0x30c   :  { %6550 = vpow2.f32 %v5114_v46 }
 0x313   :  { %v6545_v47 = vpop.eup %6544 }
 0x314   :  { %v1162_v48 = vadd.f32 1.0, %v6545_v47 }
 0x316   :  { %6552 = vrcp.f32 %v1162_v48  ;;  %v7401_v48 = vld [vmem:[#allocation7 + $0x7c] ss:$12 sps:$4 sm:$0xff]  }
 0x317   :  { %v6547_v35 = vpop.eup %6546 }
 0x318   :  { %v1069_v49 = vsub.f32 %v7057_v2, %v6547_v35  ;;  %v6549_v50 = vpop.eup %6548 }
 0x319   :  { %v6551_v25 = vpop.eup %6550 }
 0x31a   :  { %v1070_v30 = vmul.f32 %v6549_v50, %v1069_v49  ;;  %v7404_v50 = vld [vmem:[#allocation7 + $0x78] ss:$12 sps:$4 sm:$0xff]  }
 0x31c   :  { %v7314_v51 = vadd.f32 %v6547_v35, %v1070_v30  ;;  %v7407_v30 = vld [vmem:[#allocation7 + $0x64] ss:$12 sps:$4 sm:$0xff]  }
 0x31e   :  { %v1072_v52 = vpack.c.bf16 %v7314_v51, %v7314_v51 }
 0x320   :  { %1209 = vmatmul.mubr.bf16.vlgmr.msra.gmra.mxu0 %v1072_v52  ;;  %5776 = vmatmul.mubr.bf16.vlgmr.msra.gmra.mxu1 %v1072_v52  ;;  %v7410_v52 = vld [vmem:[#allocation7 + $0x60] ss:$12 sps:$4 sm:$0xff]  }
 0x321   :  { %1258 = vmatpush1.bf16.msra.mxu0 %v7077_v7  ;;  %5780 = vmatpush3.bf16.msra.mxu1 %v7079_v8  ;;  %v1163_v8 = vadd.f32 1.0, %v6551_v25  ;;  %v7413_v25 = vld [vmem:[#allocation7 + $0x4c] ss:$12 sps:$4 sm:$0xff]  }
 0x322   :  { %1259 = vmatprep.subr.bf16.mxu0 %v7084_v9  ;;  %5781 = vmatprep.subr.bf16.mxu1 %v8066_v37  ;;  %v8070_v9 = vld [vmem:[#allocation20_spill] sm:$0xff] }
 0x323   :  { %v6553_v2 = vpop.eup %6552  ;;  %1289 = vmatprep.mubr.bf16.mxu0 %v8067_v18  ;;  %5795 = vmatprep.mubr.msk.bf16.mxu1 %vm6835_vm0, %v8066_v37 }
 0x324   :  { %v1169_v55 = vmul.f32 %v6553_v2, %v1168_v54  ;;  %v7416_v54 = vld [vmem:[#allocation7 + $0x48] ss:$12 sps:$4 sm:$0xff]  }
 0x325   :  { %1260 = vmatpush1.bf16.msra.mxu0 %v7087_v10  ;;  %5782 = vmatpush3.bf16.msra.mxu1 %v7089_v11  ;;  %v8071_v10 = vld [vmem:[#allocation21_spill] sm:$0xff]  ;;  %v8072_v11 = vld [vmem:[#allocation22_spill] sm:$0xff] }
 0x326   :  { %v1170_v7 = vadd.f32 %v7186_v29, %v1169_v55  ;;  %1261 = vmatprep.subr.bf16.mxu0 %v7094_v12  ;;  %5783 = vmatprep.subr.bf16.mxu1 %v8066_v37  ;;  %v8073_v12 = vld [vmem:[#allocation23_spill] sm:$0xff]  ;;  %v7422_v55 = vld [vmem:[#allocation7 + $0x30] ss:$12 sps:$4 sm:$0xff]  }
 0x327   :  { %v8077_v29 = vld [vmem:[#allocation27_spill] sm:$0xff] }
 0x328   :  { %6554 = vtanh.f32 %v1170_v7  ;;  %v7419_v2 = vld [vmem:[#allocation7 + $0x34] ss:$12 sps:$4 sm:$0xff]   ;;  %v7425_v7 = vld [vmem:[#allocation7 + $0x1c] ss:$12 sps:$4 sm:$0xff]  }
 0x329   :  { %1262 = vmatpush1.bf16.msra.mxu0 %v7097_v13  ;;  %5784 = vmatpush3.bf16.msra.mxu1 %v7099_v14  ;;  %6556 = vrcp.f32 %v1163_v8  ;;  %v8075_v13 = vld [vmem:[#allocation25_spill] sm:$0xff]  ;;  %v7428_v8 = vld [vmem:[#allocation7 + $0x18] ss:$12 sps:$4 sm:$0xff]  }
 0x32a   :  { %1263 = vmatprep.subr.bf16.mxu0 %v7104_v15  ;;  %5785 = vmatprep.subr.bf16.mxu1 %v8066_v37  ;;  %v8076_v15 = vld [vmem:[#allocation26_spill] sm:$0xff] }
 0x32d   :  { %1264 = vmatpush1.bf16.msra.mxu0 %v8070_v9  ;;  %5786 = vmatpush3.bf16.msra.mxu1 %v8071_v10 }
 0x32e   :  { %1265 = vmatprep.subr.bf16.mxu0 %v8072_v11  ;;  %5787 = vmatprep.subr.bf16.mxu1 %v8066_v37 }
 0x331   :  { %1266 = vmatpush1.bf16.msra.mxu0 %v8073_v12  ;;  %5788 = vmatpush3.bf16.msra.mxu1 %v8074_v34 }
 0x332   :  { %1267 = vmatprep.subr.bf16.mxu0 %v8075_v13  ;;  %5789 = vmatprep.subr.bf16.mxu1 %v8066_v37 }
 0x335   :  { %v6555_v14 = vpop.eup %6554  ;;  %1268 = vmatpush1.bf16.msra.mxu0 %v8076_v15  ;;  %5790 = vmatpush3.bf16.msra.mxu1 %v8077_v29 }
 0x336   :  { %1269 = vmatprep.subr.bf16.mxu0 %v8078_v56  ;;  %5791 = vmatprep.subr.bf16.mxu1 %v8066_v37  ;;  %v1172_v57 = vsub.f32 %v7192_v16, %v6555_v14  ;;  %v6557_v59 = vpop.eup %6556  ;;  %v8084_v16 = vld [vmem:[#allocation34_spill] sm:$0xff] }
 0x338   :  { %v1173_v60 = vmul.f32 %v6557_v59, %v1172_v57 }
 0x339   :  { %1270 = vmatpush1.bf16.msra.mxu0 %v8079_v62  ;;  %5792 = vmatpush3.bf16.msra.mxu1 %v8080_v1 }
 0x33a   :  { %1271 = vmatprep.subr.bf16.mxu0 %v8081_v3  ;;  %5793 = vmatprep.subr.bf16.mxu1 %v8066_v37  ;;  %v7352_v4 = vadd.f32 %v6555_v14, %v1173_v60 }
 0x33c   :  { %v7358_v22 = vpack.c.bf16 %v7352_v4, %v7352_v4 }
 0x33d   :  { %1272 = vmatpush1.bf16.msra.mxu0 %v8082_v6  ;;  %5794 = vmatpush3.bf16.msra.mxu1 %v8083_v0 }
 0x33e   :  { %1636 = vmatprep.subr.bf16.mxu1 %v8084_v16  ;;  %5799 = vmatprep.subr.bf16.mxu0 %v8066_v37 }
 0x340   :  { %1290 = vmatmul.mubr.bf16.vlgmr.msra.gmra.mxu0 %v7358_v22  ;;  %5796 = vmatmul.mubr.bf16.vlgmr.msra.gmra.mxu1 %v7358_v22 }
 0x341   :  { %1637 = vmatpush1.bf16.msra.mxu1 %v7196_v32  ;;  %1668 = vmatprep.mubr.bf16.mxu1 %v8067_v18  ;;  %v8086_v32 = vld [vmem:[#allocation36_spill] sm:$0xff] }
 0x342   :  { %1638 = vmatprep.subr.bf16.mxu1 %v7199_v20  ;;  %5815 = vmatprep.mubr.msk.bf16.mxu0 %vm6835_vm0, %v8066_v37  ;;  %v6649_v20 = vld [vmem:[#allocation8 + $0x4] ss:$12 sps:$4 sm:$0xff]  }
 0x345   :  { %1639 = vmatpush1.bf16.msra.mxu1 %v7206_v17  ;;  %v6650_v17 = vld [vmem:[#allocation8] ss:$12 sps:$4 sm:$0xff]  }
 0x346   :  { %1640 = vmatprep.subr.bf16.mxu1 %v7209_v38  ;;  %v6232_v38 = vld [vmem:[#allocation13 + $0x38] sm:$0xff]  }
 0x347   :  { %5800 = vmatpush3.bf16.msra.mxu0 %v6232_v38 }
 0x348   :  { %5801 = vmatprep.subr.bf16.mxu0 %v8066_v37 }
 0x349   :  { %1641 = vmatpush1.bf16.msra.mxu1 %v7213_v23  ;;  %v6233_v23 = vld [vmem:[#allocation13 + $0x30] sm:$0xff]  }
 0x34a   :  { %1642 = vmatprep.subr.bf16.mxu1 %v7216_v42  ;;  %v6234_v42 = vld [vmem:[#allocation13 + $0x28] sm:$0xff]  }
 0x34b   :  { %5802 = vmatpush3.bf16.msra.mxu0 %v6233_v23 }
 0x34c   :  { %5803 = vmatprep.subr.bf16.mxu0 %v8066_v37 }
 0x34d   :  { %1643 = vmatpush1.bf16.msra.mxu1 %v7220_v45  ;;  %v6235_v45 = vld [vmem:[#allocation13 + $0x20] sm:$0xff]  }
 0x34e   :  { %1644 = vmatprep.subr.bf16.mxu1 %v8085_v21 }
 0x34f   :  { %5804 = vmatpush3.bf16.msra.mxu0 %v6234_v42 }
 0x350   :  { %5805 = vmatprep.subr.bf16.mxu0 %v8066_v37 }
 0x351   :  { %1645 = vmatpush1.bf16.msra.mxu1 %v8086_v32 }
 0x352   :  { %1646 = vmatprep.subr.bf16.mxu1 %v7230_v19  ;;  %v6238_v19 = vld [vmem:[#allocation13 + $0x8] sm:$0xff]  }
 0x353   :  { %5806 = vmatpush3.bf16.msra.mxu0 %v6235_v45 }
 0x354   :  { %5807 = vmatprep.subr.bf16.mxu0 %v8066_v37 }
 0x355   :  { %1647 = vmatpush1.bf16.msra.mxu1 %v7234_v24  ;;  %v6239_v24 = vld [vmem:[#allocation13] sm:$0xff]  }
 0x356   :  { %1648 = vmatprep.subr.bf16.mxu1 %v7237_v36  ;;  %v6236_v36 = vld [vmem:[#allocation13 + $0x18] sm:$0xff]  }
 0x357   :  { %5808 = vmatpush3.bf16.msra.mxu0 %v6236_v36 }
 0x358   :  { %5809 = vmatprep.subr.bf16.mxu0 %v8066_v37 }
 0x359   :  { %1649 = vmatpush1.bf16.msra.mxu1 %v7241_v61  ;;  %v6237_v61 = vld [vmem:[#allocation13 + $0x10] sm:$0xff]  }
 0x35a   :  { %1650 = vmatprep.subr.bf16.mxu1 %v6649_v20 }
 0x35b   :  { %5810 = vmatpush3.bf16.msra.mxu0 %v6237_v61 }
 0x35c   :  { %5811 = vmatprep.subr.bf16.mxu0 %v8066_v37 }
 0x35d   :  { %1651 = vmatpush1.bf16.msra.mxu1 %v6650_v17 }
 0x35e   :  { %1877 = vmatprep.subr.bf16.mxu1 %v7392_v31 }
 0x35f   :  { %5812 = vmatpush3.bf16.msra.mxu0 %v6238_v19 }
 0x360   :  { %1669 = vmatmul.mubr.bf16.vlgmr.msra.gmra.mxu1 %v7358_v22  ;;  %5813 = vmatprep.subr.bf16.mxu0 %v8066_v37 }
 0x361   :  { %1909 = vmatprep.mubr.bf16.mxu1 %v8067_v18  ;;  %1878 = vmatpush1.bf16.msra.mxu1 %v7390_v5 }
 0x362   :  { %1879 = vmatprep.subr.bf16.mxu1 %v7394_v28 }
 0x363   :  { %5814 = vmatpush3.bf16.msra.mxu0 %v6239_v24  ;;  %v6240_v24 = vld [vmem:[#allocation8 + $0xb0] ss:$12 sps:$4 sm:$0xff]  }
 0x364   :  { %5819 = vmatprep.subr.bf16.mxu0 %v8066_v37 }
 0x365   :  { %1880 = vmatpush1.bf16.msra.mxu1 %v7398_v43 }
 0x366   :  { %1881 = vmatprep.subr.bf16.mxu1 %v7401_v48 }
 0x369   :  { %1882 = vmatpush1.bf16.msra.mxu1 %v7404_v50 }
 0x36a   :  { %1883 = vmatprep.subr.bf16.mxu1 %v7407_v30 }
 0x36d   :  { %1884 = vmatpush1.bf16.msra.mxu1 %v7410_v52 }
 0x36e   :  { %1885 = vmatprep.subr.bf16.mxu1 %v7413_v25 }
 0x371   :  { %1886 = vmatpush1.bf16.msra.mxu1 %v7416_v54 }
 0x372   :  { %1887 = vmatprep.subr.bf16.mxu1 %v7419_v2 }
 0x375   :  { %1888 = vmatpush1.bf16.msra.mxu1 %v7422_v55 }
 0x376   :  { %1889 = vmatprep.subr.bf16.mxu1 %v7425_v7 }
 0x379   :  { %1890 = vmatpush1.bf16.msra.mxu1 %v7428_v8 }
 0x3e0   :  { %v1210_v26 = vpop.f32.mrf.mxu0  ;;  %v1251_v44 = vpop.f32.mrf.mxu1 }
 0x3e2   :  { %v1212_v39 = vpop.f32.mrf.mxu0  ;;  %v5777_v40 = vpop.f32.mrf.mxu1 }
 0x3e3   :  { %v6246_v40 = vld [vmem:[#allocation8 + $0x20] ss:$12 sps:$4 sm:$0xff]  }
 0x3e4   :  { %v1214_v46 = vpop.f32.mrf.mxu0  ;;  %v1254_v47 = vpop.f32.mrf.mxu1 }
 0x3e5   :  { %v6247_v46 = vld [vmem:[#allocation8 + $0x8] ss:$12 sps:$4 sm:$0xff]   ;;  %v6251_v47 = vld [vmem:[#allocation7 + $0xb0] ss:$12 sps:$4 sm:$0xff]  }
 0x3e6   :  { %v1215_v35 = vpop.f32.mrf.mxu0  ;;  %v5778_v49 = vpop.f32.mrf.mxu1 }
 0x3e7   :  { %v6255_v35 = vld [vmem:[#allocation7 + $0x98] ss:$12 sps:$4 sm:$0xff]   ;;  %v6259_v49 = vld [vmem:[#allocation7 + $0x80] ss:$12 sps:$4 sm:$0xff]  }
 0x400   :  { %v1291_v9 = vpop.f32.mrf.mxu0  ;;  %v1332_v10 = vpop.f32.mrf.mxu1 }
 0x401   :  { %v1338_v11 = vadd.f32 %v1291_v9, %v1210_v26  ;;  %v1342_v20 = vadd.f32 %v7307_v63, %v1332_v10  ;;  %v6241_v63 = vld [vmem:[#allocation8 + $0x98] ss:$12 sps:$4 sm:$0xff]   ;;  %v6243_v26 = vld [vmem:[#allocation8 + $0x68] ss:$12 sps:$4 sm:$0xff]   ;;  %v6267_v10 = vld [vmem:[#allocation7 + $0x50] ss:$12 sps:$4 sm:$0xff]  }
 0x402   :  { %v1293_v12 = vpop.f32.mrf.mxu0  ;;  %v5797_v34 = vpop.f32.mrf.mxu1  ;;  %v6263_v9 = vld [vmem:[#allocation7 + $0x68] ss:$12 sps:$4 sm:$0xff]  }
 0x403   :  { %v1340_v13 = vadd.f32 %v1338_v11, %v7289_v27  ;;  %v1339_v59 = vadd.f32 %v1293_v12, %v1212_v39  ;;  %v1355_v27 = vadd.f32 %v7301_v58, %v1251_v44  ;;  %v6244_v44 = vld [vmem:[#allocation8 + $0x50] ss:$12 sps:$4 sm:$0xff]   ;;  %v6245_v39 = vld [vmem:[#allocation8 + $0x38] ss:$12 sps:$4 sm:$0xff]   ;;  %v6275_v11 = vld [vmem:[#allocation7 + $0x20] ss:$12 sps:$4 sm:$0xff]  }
 0x404   :  { %v1295_v14 = vpop.f32.mrf.mxu0  ;;  %v1335_v15 = vpop.f32.mrf.mxu1  ;;  %v7468_v12 = vld [vmem:[#allocation7 + $0x4] ss:$12 sps:$4 sm:$0xff]   ;;  %v7470_v34 = vld [vmem:[#allocation7] ss:$12 sps:$4 sm:$0xff]  }
 0x405   :  { %v5115_v29 = vmul.f32 -1.442695, %v1340_v13  ;;  %v1341_v60 = vadd.f32 %v1339_v59, %v7295_v53  ;;  %v6279_v13 = vld [vmem:[#allocation7 + $0x8] ss:$12 sps:$4 sm:$0xff]   ;;  %1891 = vmatprep.subr.bf16.mxu1 %v7468_v12  ;;  %v7474_v14 = vld [vmem:[#allocation11 + $0xac] ss:$12 sps:$4 sm:$0xff]  }
 0x406   :  { %v1296_v56 = vpop.f32.mrf.mxu0  ;;  %v5798_v57 = vpop.f32.mrf.mxu1  ;;  %1892 = vmatpush1.bf16.msra.mxu1 %v7470_v34  ;;  %v7481_v15 = vld [vmem:[%s8013_s14] ss:$0 sm:$0xff]  ;;  %v7484_v59 = vld [vmem:[#allocation11 + $0xa8] ss:$12 sps:$4 sm:$0xff]  }
 0x407   :  { %6558 = vpow2.f32 %v5115_v29  ;;  %v5116_v62 = vmul.f32 -1.442695, %v1341_v60  ;;  %2169 = vmatprep.subr.bf16.mxu1 %v7474_v14  ;;  %v6283_v60 = vld [vmem:[#allocation11 + $0xb0] ss:$12 sps:$4 sm:$0xff]  }
 0x409   :  { %6560 = vpow2.f32 %v5116_v62 }
 0x414   :  { %v6559_v1 = vpop.eup %6558 }
 0x415   :  { %v1349_v3 = vadd.f32 1.0, %v6559_v1  ;;  %v7486_v1 = vld [vmem:[#allocation11 + $0x94] ss:$12 sps:$4 sm:$0xff]  }
 0x416   :  { %v6561_v16 = vpop.eup %6560 }
 0x417   :  { %6562 = vrcp.f32 %v1349_v3  ;;  %v1350_v53 = vadd.f32 1.0, %v6561_v16 }
 0x420   :  { %v7434_v6 = vpop.f32.mrf.mxu1 }
 0x422   :  { %v7436_v0 = vpop.f32.mrf.mxu1 }
 0x424   :  { %v6563_v21 = vpop.eup %6562  ;;  %v1674_v32 = vpop.f32.mrf.mxu1 }
 0x425   :  { %v1356_v17 = vmul.f32 %v6563_v21, %v1355_v27  ;;  %v7489_v27 = vld [vmem:[#allocation11 + $0x90] ss:$12 sps:$4 sm:$0xff]   ;;  %v6287_v21 = vld [vmem:[#allocation11 + $0x98] ss:$12 sps:$4 sm:$0xff]  }
 0x426   :  { %v1675_v38 = vpop.f32.mrf.mxu1  ;;  %v7493_v32 = vld [vmem:[#allocation11 + $0x7c] ss:$12 sps:$4 sm:$0xff]  }
 0x427   :  { %v1357_v23 = vadd.f32 %v1356_v17, %v1342_v20  ;;  %v7499_v20 = vld [vmem:[#allocation11 + $0x78] ss:$12 sps:$4 sm:$0xff]   ;;  %v6291_v17 = vld [vmem:[#allocation11 + $0x80] ss:$12 sps:$4 sm:$0xff]  }
 0x428   :  { %v7503_v38 = vld [vmem:[#allocation11 + $0x64] ss:$12 sps:$4 sm:$0xff]  }
 0x429   :  { %6564 = vtanh.f32 %v1357_v23  ;;  %v7506_v23 = vld [vmem:[#allocation11 + $0x60] ss:$12 sps:$4 sm:$0xff]  }
 0x42a   :  { %6566 = vrcp.f32 %v1350_v53  ;;  %v6295_v53 = vld [vmem:[#allocation11 + $0x68] ss:$12 sps:$4 sm:$0xff]  }
 0x436   :  { %v6565_v42 = vpop.eup %6564 }
 0x437   :  { %v1359_v45 = vsub.f32 %v7314_v51, %v6565_v42  ;;  %v6567_v36 = vpop.eup %6566  ;;  %v6242_v51 = vld [vmem:[#allocation8 + $0x80] ss:$12 sps:$4 sm:$0xff]  }
 0x439   :  { %v1360_v61 = vmul.f32 %v6567_v36, %v1359_v45  ;;  %v7513_v45 = vld [vmem:[#allocation11 + $0x48] ss:$12 sps:$4 sm:$0xff]   ;;  %v6299_v36 = vld [vmem:[#allocation11 + $0x50] ss:$12 sps:$4 sm:$0xff]  }
 0x43b   :  { %v7441_v19 = vadd.f32 %v6565_v42, %v1360_v61  ;;  %v7510_v42 = vld [vmem:[#allocation11 + $0x4c] ss:$12 sps:$4 sm:$0xff]   ;;  %v7517_v61 = vld [vmem:[#allocation11 + $0x34] ss:$12 sps:$4 sm:$0xff]  }
 0x43d   :  { %v7445_v58 = vpack.c.bf16 %v7441_v19, %v7441_v19 }
 0x43f   :  { %5816 = vmatmul.mubr.bf16.vlgmr.msra.gmra.mxu0 %v7445_v58 }
 0x440   :  { %5820 = vmatpush3.bf16.msra.mxu0 %v6240_v24  ;;  %5835 = vmatprep.mubr.msk.bf16.mxu0 %vm6835_vm0, %v8066_v37  ;;  %v7520_v24 = vld [vmem:[#allocation11 + $0x30] ss:$12 sps:$4 sm:$0xff]  }
 0x441   :  { %5821 = vmatprep.subr.bf16.mxu0 %v8066_v37 }
 0x444   :  { %5822 = vmatpush3.bf16.msra.mxu0 %v6241_v63  ;;  %v6303_v63 = vld [vmem:[#allocation11 + $0x38] ss:$12 sps:$4 sm:$0xff]  }
 0x445   :  { %5823 = vmatprep.subr.bf16.mxu0 %v8066_v37 }
 0x448   :  { %5824 = vmatpush3.bf16.msra.mxu0 %v6242_v51  ;;  %v7524_v51 = vld [vmem:[#allocation11 + $0x1c] ss:$12 sps:$4 sm:$0xff]  }
 0x449   :  { %5825 = vmatprep.subr.bf16.mxu0 %v8066_v37 }
 0x44c   :  { %5826 = vmatpush3.bf16.msra.mxu0 %v6243_v26  ;;  %v7527_v26 = vld [vmem:[#allocation11 + $0x18] ss:$12 sps:$4 sm:$0xff]  }
 0x44d   :  { %5827 = vmatprep.subr.bf16.mxu0 %v8066_v37 }
 0x450   :  { %5828 = vmatpush3.bf16.msra.mxu0 %v6244_v44  ;;  %v6307_v44 = vld [vmem:[#allocation11 + $0x20] ss:$12 sps:$4 sm:$0xff]  }
 0x451   :  { %5829 = vmatprep.subr.bf16.mxu0 %v8066_v37 }
 0x454   :  { %5830 = vmatpush3.bf16.msra.mxu0 %v6245_v39  ;;  %v7531_v39 = vld [vmem:[#allocation11 + $0x4] ss:$12 sps:$4 sm:$0xff]  }
 0x455   :  { %5831 = vmatprep.subr.bf16.mxu0 %v8066_v37 }
 0x458   :  { %5832 = vmatpush3.bf16.msra.mxu0 %v6246_v40  ;;  %v7534_v40 = vld [vmem:[#allocation11] ss:$12 sps:$4 sm:$0xff]  }
 0x459   :  { %5833 = vmatprep.subr.bf16.mxu0 %v8066_v37 }
 0x45c   :  { %5834 = vmatpush3.bf16.msra.mxu0 %v6247_v46  ;;  %v6311_v46 = vld [vmem:[#allocation11 + $0x8] ss:$12 sps:$4 sm:$0xff]  }
 0x45d   :  { %5839 = vmatprep.subr.bf16.mxu0 %v8066_v37 }
 0x45f   :  { %5836 = vmatmul.mubr.bf16.vlgmr.msra.gmra.mxu0 %v7358_v22  ;;  %v6271_v22 = vld [vmem:[#allocation7 + $0x38] ss:$12 sps:$4 sm:$0xff]  }
 0x460   :  { %5840 = vmatpush3.bf16.msra.mxu0 %v6251_v47  ;;  %5855 = vmatprep.mubr.msk.bf16.mxu0 %vm6835_vm0, %v8066_v37 }
 0x461   :  { %5841 = vmatprep.subr.bf16.mxu0 %v8066_v37 }
 0x464   :  { %5842 = vmatpush3.bf16.msra.mxu0 %v6255_v35 }
 0x465   :  { %5843 = vmatprep.subr.bf16.mxu0 %v8066_v37 }
 0x468   :  { %5844 = vmatpush3.bf16.msra.mxu0 %v6259_v49 }
 0x469   :  { %5845 = vmatprep.subr.bf16.mxu0 %v8066_v37 }
 0x46c   :  { %5846 = vmatpush3.bf16.msra.mxu0 %v6263_v9 }
 0x46d   :  { %5847 = vmatprep.subr.bf16.mxu0 %v8066_v37 }
 0x470   :  { %5848 = vmatpush3.bf16.msra.mxu0 %v6267_v10  ;;  %v7547_v10 = vld [vmem:[#allocation10 + $0xac] ss:$12 sps:$4 sm:$0xff]  }
 0x471   :  { %5849 = vmatprep.subr.bf16.mxu0 %v8066_v37 }
 0x474   :  { %5850 = vmatpush3.bf16.msra.mxu0 %v6271_v22  ;;  %v6315_v22 = vld [vmem:[#allocation10 + $0xb0] ss:$12 sps:$4 sm:$0xff]  }
 0x475   :  { %5851 = vmatprep.subr.bf16.mxu0 %v8066_v37 }
 0x478   :  { %5852 = vmatpush3.bf16.msra.mxu0 %v6275_v11  ;;  %v7549_v11 = vld [vmem:[#allocation10 + $0xa8] ss:$12 sps:$4 sm:$0xff]  }
 0x479   :  { %5853 = vmatprep.subr.bf16.mxu0 %v8066_v37 }
 0x47c   :  { %5854 = vmatpush3.bf16.msra.mxu0 %v6279_v13  ;;  %v7554_v13 = vld [vmem:[#allocation10 + $0x94] ss:$12 sps:$4 sm:$0xff]  }
 0x47d   :  { %5859 = vmatprep.subr.bf16.mxu0 %v8066_v37  ;;  %8087 = vst [vmem:[#allocation20_spill] sm:$0xff] %v7554_v13 }
 0x4ff   :  { %v1468_v29 = vpop.f32.mrf.mxu0 }
 0x500   :  { %v1469_v56 = vadd.f32 %v7481_v15, %v1468_v29  ;;  %v7556_v29 = vld [vmem:[#allocation10 + $0x90] ss:$12 sps:$4 sm:$0xff]  }
 0x501   :  { %v5817_v57 = vpop.f32.mrf.mxu0  ;;  %8088 = vst [vmem:[#allocation21_spill] sm:$0xff] %v7556_v29 }
 0x502   :  { %1474 = vst [vmem:[#allocation14] sm:$0x3] %v1469_v56  ;;  %v1475_v62 = vpack.c.bf16 %v1469_v56, %v1469_v56  ;;  %v7561_v56 = vld [vmem:[#allocation10 + $0x7c] ss:$12 sps:$4 sm:$0xff]   ;;  %v6323_v57 = vld [vmem:[#allocation10 + $0x80] ss:$12 sps:$4 sm:$0xff]  }
 0x503   :  { %v1471_v3 = vpop.f32.mrf.mxu0  ;;  %8089 = vst [vmem:[#allocation22_spill] sm:$0xff] %v7561_v56 }
 0x504   :  { %1910 = vmatmul.mubr.bf16.vlgmr.msra.gmra.mxu1 %v1475_v62  ;;  %5856 = vmatmul.mubr.bf16.vlgmr.msra.gmra.mxu0 %v1475_v62  ;;  %v7568_v62 = vld [vmem:[#allocation10 + $0x60] ss:$12 sps:$4 sm:$0xff]   ;;  %v7570_v3 = vld [vmem:[#allocation10 + $0x64] ss:$12 sps:$4 sm:$0xff]  }
 0x505   :  { %2170 = vmatpush1.bf16.msra.mxu1 %v7484_v59  ;;  %5860 = vmatpush3.bf16.msra.mxu0 %v6283_v60  ;;  %v5818_v16 = vpop.f32.mrf.mxu0  ;;  %v7563_v60 = vld [vmem:[#allocation10 + $0x78] ss:$12 sps:$4 sm:$0xff]   ;;  %8091 = vst [vmem:[#allocation24_spill] sm:$0xff] %v7568_v62  ;;  %8092 = vst [vmem:[#allocation25_spill] sm:$0xff] %v7570_v3 }
 0x506   :  { %2171 = vmatprep.subr.bf16.mxu1 %v7486_v1  ;;  %5861 = vmatprep.subr.bf16.mxu0 %v8066_v37  ;;  %8090 = vst [vmem:[#allocation23_spill] sm:$0xff] %v7563_v60  ;;  %v6327_v16 = vld [vmem:[#allocation10 + $0x68] ss:$12 sps:$4 sm:$0xff]  }
 0x507   :  { %2201 = vmatprep.mubr.bf16.mxu1 %v8067_v18  ;;  %5875 = vmatprep.mubr.msk.bf16.mxu0 %vm6835_vm0, %v8066_v37 }
 0x509   :  { %2172 = vmatpush1.bf16.msra.mxu1 %v7489_v27  ;;  %5862 = vmatpush3.bf16.msra.mxu0 %v6287_v21  ;;  %v7572_v21 = vld [vmem:[#allocation10 + $0x4c] ss:$12 sps:$4 sm:$0xff]  }
 0x50a   :  { %2173 = vmatprep.subr.bf16.mxu1 %v7493_v32  ;;  %5863 = vmatprep.subr.bf16.mxu0 %v8066_v37  ;;  %8093 = vst [vmem:[#allocation26_spill] sm:$0xff] %v7572_v21 }
 0x50d   :  { %2174 = vmatpush1.bf16.msra.mxu1 %v7499_v20  ;;  %5864 = vmatpush3.bf16.msra.mxu0 %v6291_v17  ;;  %v6331_v17 = vld [vmem:[#allocation10 + $0x50] ss:$12 sps:$4 sm:$0xff]  }
 0x50e   :  { %2175 = vmatprep.subr.bf16.mxu1 %v7503_v38  ;;  %5865 = vmatprep.subr.bf16.mxu0 %v8066_v37 }
 0x511   :  { %2176 = vmatpush1.bf16.msra.mxu1 %v7506_v23  ;;  %5866 = vmatpush3.bf16.msra.mxu0 %v6295_v53  ;;  %v7577_v53 = vld [vmem:[#allocation10 + $0x48] ss:$12 sps:$4 sm:$0xff]  }
 0x512   :  { %2177 = vmatprep.subr.bf16.mxu1 %v7510_v42  ;;  %5867 = vmatprep.subr.bf16.mxu0 %v8066_v37  ;;  %8094 = vst [vmem:[#allocation27_spill] sm:$0xff] %v7577_v53 }
 0x515   :  { %2178 = vmatpush1.bf16.msra.mxu1 %v7513_v45  ;;  %5868 = vmatpush3.bf16.msra.mxu0 %v6299_v36  ;;  %v7580_v36 = vld [vmem:[#allocation10 + $0x34] ss:$12 sps:$4 sm:$0xff]  }
 0x516   :  { %2179 = vmatprep.subr.bf16.mxu1 %v7517_v61  ;;  %5869 = vmatprep.subr.bf16.mxu0 %v8066_v37  ;;  %8095 = vst [vmem:[#allocation28_spill] sm:$0xff] %v7580_v36 }
 0x519   :  { %2180 = vmatpush1.bf16.msra.mxu1 %v7520_v24  ;;  %5870 = vmatpush3.bf16.msra.mxu0 %v6303_v63  ;;  %v6335_v63 = vld [vmem:[#allocation10 + $0x38] ss:$12 sps:$4 sm:$0xff]  }
 0x51a   :  { %2181 = vmatprep.subr.bf16.mxu1 %v7524_v51  ;;  %5871 = vmatprep.subr.bf16.mxu0 %v8066_v37 }
 0x51d   :  { %2182 = vmatpush1.bf16.msra.mxu1 %v7527_v26  ;;  %5872 = vmatpush3.bf16.msra.mxu0 %v6307_v44  ;;  %v7584_v44 = vld [vmem:[#allocation10 + $0x30] ss:$12 sps:$4 sm:$0xff]  }
 0x51e   :  { %2183 = vmatprep.subr.bf16.mxu1 %v7531_v39  ;;  %5873 = vmatprep.subr.bf16.mxu0 %v8066_v37  ;;  %8096 = vst [vmem:[#allocation29_spill] sm:$0xff] %v7584_v44 }
 0x51f   :  { %v7538_v47 = vpop.f32.mrf.mxu0 }
 0x521   :  { %v5837_v35 = vpop.f32.mrf.mxu0  ;;  %2184 = vmatpush1.bf16.msra.mxu1 %v7534_v40  ;;  %5874 = vmatpush3.bf16.msra.mxu0 %v6311_v46  ;;  %v7587_v46 = vld [vmem:[#allocation10 + $0x1c] ss:$12 sps:$4 sm:$0xff]  }
 0x522   :  { %5879 = vmatprep.subr.bf16.mxu0 %v8066_v37  ;;  %2410 = vmatprep.subr.bf16.mxu1 %v7547_v10  ;;  %8097 = vst [vmem:[#allocation30_spill] sm:$0xff] %v7587_v46  ;;  %v6339_v35 = vld [vmem:[#allocation10 + $0x20] ss:$12 sps:$4 sm:$0xff]  }
 0x523   :  { %v1714_v49 = vpop.f32.mrf.mxu0 }
 0x524   :  { %2202 = vmatmul.mubr.bf16.vlgmr.msra.gmra.mxu1 %v7445_v58  ;;  %5876 = vmatmul.mubr.bf16.vlgmr.msra.gmra.mxu0 %v7445_v58  ;;  %v6319_v58 = vld [vmem:[#allocation10 + $0x98] ss:$12 sps:$4 sm:$0xff]  }
 0x525   :  { %v5838_v9 = vpop.f32.mrf.mxu0  ;;  %2442 = vmatprep.mubr.bf16.mxu1 %v8067_v18  ;;  %5895 = vmatprep.mubr.msk.bf16.mxu0 %vm6835_vm0, %v8066_v37  ;;  %v7591_v49 = vld [vmem:[#allocation10 + $0x18] ss:$12 sps:$4 sm:$0xff]  }
 0x526   :  { %5880 = vmatpush3.bf16.msra.mxu0 %v6315_v22  ;;  %2411 = vmatpush1.bf16.msra.mxu1 %v7549_v11  ;;  %8098 = vst [vmem:[#allocation31_spill] sm:$0xff] %v7591_v49  ;;  %v7594_v9 = vld [vmem:[#allocation10 + $0x4] ss:$12 sps:$4 sm:$0xff]   ;;  %v6343_v22 = vld [vmem:[#allocation10 + $0x8] ss:$12 sps:$4 sm:$0xff]  }
 0x527   :  { %5881 = vmatprep.subr.bf16.mxu0 %v8066_v37  ;;  %2412 = vmatprep.subr.bf16.mxu1 %v7554_v13  ;;  %8099 = vst [vmem:[#allocation32_spill] sm:$0xff] %v7594_v9 }
 0x52a   :  { %5882 = vmatpush3.bf16.msra.mxu0 %v6319_v58  ;;  %2413 = vmatpush1.bf16.msra.mxu1 %v7556_v29  ;;  %v7598_v58 = vld [vmem:[#allocation10] ss:$12 sps:$4 sm:$0xff]  }
 0x52b   :  { %5883 = vmatprep.subr.bf16.mxu0 %v8066_v37  ;;  %2414 = vmatprep.subr.bf16.mxu1 %v7561_v56  ;;  %8100 = vst [vmem:[#allocation33_spill] sm:$0xff] %v7598_v58 }
 0x52e   :  { %5884 = vmatpush3.bf16.msra.mxu0 %v6323_v57  ;;  %2415 = vmatpush1.bf16.msra.mxu1 %v7563_v60  ;;  %v7600_v57 = vld [vmem:[#allocation8 + $0xac] ss:$12 sps:$4 sm:$0xff]  }
 0x52f   :  { %5885 = vmatprep.subr.bf16.mxu0 %v8066_v37  ;;  %2416 = vmatprep.subr.bf16.mxu1 %v7570_v3  ;;  %8101 = vst [vmem:[#allocation34_spill] sm:$0xff] %v7600_v57 }
 0x532   :  { %5886 = vmatpush3.bf16.msra.mxu0 %v6327_v16  ;;  %2417 = vmatpush1.bf16.msra.mxu1 %v7568_v62  ;;  %v1960_v16 = vld [vmem:[%s8004_s5] sm:$0x3] }
 0x533   :  { %5887 = vmatprep.subr.bf16.mxu0 %v8066_v37  ;;  %2418 = vmatprep.subr.bf16.mxu1 %v7572_v21  ;;  %v1969_v62 = vrot.slane %v1960_v16, %v7167_v33 }
 0x536   :  { %5888 = vmatpush3.bf16.msra.mxu0 %v6331_v17  ;;  %2419 = vmatpush1.bf16.msra.mxu1 %v7577_v53  ;;  %v1965_v17 = vrot.slane %v1960_v16, %v7158_v41 }
 0x537   :  { %5889 = vmatprep.subr.bf16.mxu0 %v8066_v37  ;;  %2420 = vmatprep.subr.bf16.mxu1 %v7580_v36 }
 0x53a   :  { %5890 = vmatpush3.bf16.msra.mxu0 %v6335_v63  ;;  %2421 = vmatpush1.bf16.msra.mxu1 %v7584_v44 }
 0x53b   :  { %5891 = vmatprep.subr.bf16.mxu0 %v8066_v37  ;;  %2422 = vmatprep.subr.bf16.mxu1 %v7587_v46 }
 0x53e   :  { %5892 = vmatpush3.bf16.msra.mxu0 %v6339_v35  ;;  %2423 = vmatpush1.bf16.msra.mxu1 %v7591_v49 }
 0x53f   :  { %5893 = vmatprep.subr.bf16.mxu0 %v8066_v37  ;;  %2424 = vmatprep.subr.bf16.mxu1 %v7594_v9 }
 0x542   :  { %5894 = vmatpush3.bf16.msra.mxu0 %v6343_v22  ;;  %2425 = vmatpush1.bf16.msra.mxu1 %v7598_v58 }
 0x543   :  { %2815 = vmatprep.subr.bf16.mxu0 %v7600_v57  ;;  %5899 = vmatprep.subr.bf16.mxu1 %v8066_v37 }
 0x5c4   :  { %v1911_v63 = vpop.f32.mrf.mxu1  ;;  %v1952_v35 = vpop.f32.mrf.mxu0 }
 0x5c5   :  { %v1958_v49 = vadd.f32 %v1911_v63, %v7434_v6  ;;  %v7616_v6 = vld [vmem:[%s8006_s7] ss:$0 sm:$0xff] }
 0x5c6   :  { %v1913_v46 = vpop.f32.mrf.mxu1  ;;  %v5857_v44 = vpop.f32.mrf.mxu0 }
 0x5c7   :  { %v1972_v9 = vadd.f32 %v1965_v17, %v1958_v49  ;;  %v1959_v21 = vadd.f32 %v1913_v46, %v7436_v0  ;;  %v7625_v0 = vld [vmem:[%s8005_s6] ss:$0 sm:$0xff] }
 0x5c8   :  { %v1915_v22 = vpop.f32.mrf.mxu1  ;;  %v1955_v36 = vpop.f32.mrf.mxu0  ;;  %v1981_v46 = vadd.f32 %v7625_v0, %v1952_v35  ;;  %v7641_v35 = vld [vmem:[#allocation8 + $0x94] ss:$12 sps:$4 sm:$0xff]  }
 0x5c9   :  { %v5175_v58 = vmul.f32 -1.442695, %v1972_v9  ;;  %v1973_v3 = vadd.f32 %v1969_v62, %v1959_v21 }
 0x5ca   :  { %v1916_v53 = vpop.f32.mrf.mxu1  ;;  %v5858_v57 = vpop.f32.mrf.mxu0 }
 0x5cb   :  { %6568 = vpow2.f32 %v5175_v58  ;;  %v5176_v60 = vmul.f32 -1.442695, %v1973_v3 }
 0x5cd   :  { %6570 = vpow2.f32 %v5176_v60 }
 0x5d8   :  { %v6569_v56 = vpop.eup %6568 }
 0x5d9   :  { %v1988_v29 = vadd.f32 1.0, %v6569_v56 }
 0x5da   :  { %v6571_v56 = vpop.eup %6570 }
 0x5db   :  { %6572 = vrcp.f32 %v1988_v29  ;;  %v2001_v29 = vadd.f32 %v7616_v6, %v7538_v47  ;;  %v1989_v16 = vadd.f32 1.0, %v6571_v56  ;;  %v7635_v47 = vld [vmem:[#allocation8 + $0xa8] ss:$12 sps:$4 sm:$0xff]   ;;  %v7646_v56 = vld [vmem:[#allocation8 + $0x90] ss:$12 sps:$4 sm:$0xff]  }
 0x5e4   :  { %v7618_v36 = vpop.f32.mrf.mxu1  ;;  %v7620_v53 = vpop.f32.mrf.mxu0 }
 0x5e6   :  { %v7627_v62 = vpop.f32.mrf.mxu1  ;;  %v5877_v3 = vpop.f32.mrf.mxu0 }
 0x5e8   :  { %v6573_v60 = vpop.eup %6572  ;;  %v2207_v21 = vpop.f32.mrf.mxu1 }
 0x5e9   :  { %v2247_v44 = vpop.f32.mrf.mxu0  ;;  %v2002_v49 = vmul.f32 %v6573_v60, %v2001_v29  ;;  %v7655_v29 = vld [vmem:[#allocation8 + $0x78] ss:$12 sps:$4 sm:$0xff]  }
 0x5ea   :  { %v2208_v9 = vpop.f32.mrf.mxu1  ;;  %v7658_v60 = vld [vmem:[#allocation8 + $0x64] ss:$12 sps:$4 sm:$0xff]   ;;  %v7661_v44 = vld [vmem:[#allocation8 + $0x60] ss:$12 sps:$4 sm:$0xff]  }
 0x5eb   :  { %v5878_v58 = vpop.f32.mrf.mxu0  ;;  %v2003_v57 = vadd.f32 %v2002_v49, %v1981_v46  ;;  %v7664_v46 = vld [vmem:[#allocation8 + $0x4c] ss:$12 sps:$4 sm:$0xff]   ;;  %v7667_v49 = vld [vmem:[#allocation8 + $0x48] ss:$12 sps:$4 sm:$0xff]  }
 0x5ec   :  { %v7670_v9 = vld [vmem:[#allocation8 + $0x34] ss:$12 sps:$4 sm:$0xff]   ;;  %v7673_v58 = vld [vmem:[#allocation8 + $0x30] ss:$12 sps:$4 sm:$0xff]  }
 0x5ed   :  { %6574 = vtanh.f32 %v2003_v57  ;;  %v7676_v57 = vld [vmem:[#allocation8 + $0x1c] ss:$12 sps:$4 sm:$0xff]  }
 0x5ee   :  { %6576 = vrcp.f32 %v1989_v16  ;;  %v7679_v16 = vld [vmem:[#allocation8 + $0x18] ss:$12 sps:$4 sm:$0xff]  }
 0x5fa   :  { %v6575_v17 = vpop.eup %6574 }
 0x5fb   :  { %v2005_v63 = vsub.f32 %v7352_v4, %v6575_v17  ;;  %v6577_v22 = vpop.eup %6576  ;;  %v7650_v4 = vld [vmem:[#allocation8 + $0x7c] ss:$12 sps:$4 sm:$0xff]  }
 0x5fd   :  { %v2006_v3 = vmul.f32 %v6577_v22, %v2005_v63  ;;  %v7685_v63 = vld [vmem:[#allocation8] ss:$12 sps:$4 sm:$0xff]  }
 0x5ff   :  { %v7633_v13 = vadd.f32 %v6575_v17, %v2006_v3  ;;  %v7682_v17 = vld [vmem:[#allocation8 + $0x4] ss:$12 sps:$4 sm:$0xff]  }
 0x601   :  { %v7639_v21 = vpack.c.bf16 %v7633_v13, %v7633_v13 }
 0x603   :  { %2443 = vmatmul.mubr.bf16.vlgmr.msra.gmra.mxu1 %v7639_v21  ;;  %5896 = vmatmul.mubr.bf16.vlgmr.msra.gmra.mxu0 %v7639_v21 }
 0x604   :  { %2816 = vmatpush1.bf16.msra.mxu0 %v7635_v47  ;;  %2847 = vmatprep.mubr.bf16.mxu0 %v8067_v18 }
 0x605   :  { %2817 = vmatprep.subr.bf16.mxu0 %v7641_v35  ;;  %5915 = vmatprep.mubr.msk.bf16.mxu1 %vm6835_vm0, %v8066_v37 }
 0x608   :  { %2818 = vmatpush1.bf16.msra.mxu0 %v7646_v56 }
 0x609   :  { %2819 = vmatprep.subr.bf16.mxu0 %v7650_v4 }
 0x60c   :  { %2820 = vmatpush1.bf16.msra.mxu0 %v7655_v29 }
 0x60d   :  { %2821 = vmatprep.subr.bf16.mxu0 %v7658_v60 }
 0x610   :  { %2822 = vmatpush1.bf16.msra.mxu0 %v7661_v44 }
 0x611   :  { %2823 = vmatprep.subr.bf16.mxu0 %v7664_v46 }
 0x614   :  { %2824 = vmatpush1.bf16.msra.mxu0 %v7667_v49 }
 0x615   :  { %2825 = vmatprep.subr.bf16.mxu0 %v7670_v9 }
 0x618   :  { %2826 = vmatpush1.bf16.msra.mxu0 %v7673_v58 }
 0x619   :  { %2827 = vmatprep.subr.bf16.mxu0 %v7676_v57 }
 0x61c   :  { %2828 = vmatpush1.bf16.msra.mxu0 %v7679_v16 }
 0x61d   :  { %2829 = vmatprep.subr.bf16.mxu0 %v7682_v17 }
 0x620   :  { %2830 = vmatpush1.bf16.msra.mxu0 %v7685_v63 }
 0x621   :  { %3056 = vmatprep.subr.bf16.mxu0 %v7392_v31  ;;  %v6369_v31 = vld [vmem:[#allocation13 + $0x30] sm:$0xff]  }
 0x623   :  { %2848 = vmatmul.mubr.bf16.vlgmr.msra.gmra.mxu0 %v7639_v21 }
 0x624   :  { %3057 = vmatpush1.bf16.msra.mxu0 %v7390_v5  ;;  %3088 = vmatprep.mubr.bf16.mxu0 %v8067_v18  ;;  %v6368_v5 = vld [vmem:[#allocation13 + $0x38] sm:$0xff]  }
 0x625   :  { %3058 = vmatprep.subr.bf16.mxu0 %v7394_v28  ;;  %5900 = vmatpush3.bf16.msra.mxu1 %v6368_v5  ;;  %v6370_v28 = vld [vmem:[#allocation13 + $0x28] sm:$0xff]  }
 0x626   :  { %5901 = vmatprep.subr.bf16.mxu1 %v8066_v37 }
 0x628   :  { %3059 = vmatpush1.bf16.msra.mxu0 %v7398_v43  ;;  %v6371_v43 = vld [vmem:[#allocation13 + $0x20] sm:$0xff]  }
 0x629   :  { %3060 = vmatprep.subr.bf16.mxu0 %v7401_v48  ;;  %5902 = vmatpush3.bf16.msra.mxu1 %v6369_v31  ;;  %v6372_v48 = vld [vmem:[#allocation13 + $0x18] sm:$0xff]  }
 0x62a   :  { %5903 = vmatprep.subr.bf16.mxu1 %v8066_v37 }
 0x62c   :  { %3061 = vmatpush1.bf16.msra.mxu0 %v7404_v50  ;;  %v6373_v50 = vld [vmem:[#allocation13 + $0x10] sm:$0xff]  }
 0x62d   :  { %3062 = vmatprep.subr.bf16.mxu0 %v7407_v30  ;;  %5904 = vmatpush3.bf16.msra.mxu1 %v6370_v28  ;;  %v6374_v30 = vld [vmem:[#allocation13 + $0x8] sm:$0xff]  }
 0x62e   :  { %5905 = vmatprep.subr.bf16.mxu1 %v8066_v37 }
 0x630   :  { %3063 = vmatpush1.bf16.msra.mxu0 %v7410_v52  ;;  %v6375_v52 = vld [vmem:[#allocation13] sm:$0xff]  }
 0x631   :  { %3064 = vmatprep.subr.bf16.mxu0 %v7413_v25  ;;  %5906 = vmatpush3.bf16.msra.mxu1 %v6371_v43  ;;  %v2493_v25 = vld [vmem:[%s8009_s10] sm:$0x3] }
 0x632   :  { %5907 = vmatprep.subr.bf16.mxu1 %v8066_v37  ;;  %v2502_v43 = vrot.slane %v2493_v25, %v7167_v33 }
 0x634   :  { %3065 = vmatpush1.bf16.msra.mxu0 %v7416_v54  ;;  %v2498_v54 = vrot.slane %v2493_v25, %v7158_v41 }
 0x635   :  { %3066 = vmatprep.subr.bf16.mxu0 %v7419_v2  ;;  %5908 = vmatpush3.bf16.msra.mxu1 %v6372_v48 }
 0x636   :  { %5909 = vmatprep.subr.bf16.mxu1 %v8066_v37 }
 0x638   :  { %3067 = vmatpush1.bf16.msra.mxu0 %v7422_v55 }
 0x639   :  { %3068 = vmatprep.subr.bf16.mxu0 %v7425_v7  ;;  %5910 = vmatpush3.bf16.msra.mxu1 %v6373_v50 }
 0x63a   :  { %5911 = vmatprep.subr.bf16.mxu1 %v8066_v37 }
 0x63c   :  { %3069 = vmatpush1.bf16.msra.mxu0 %v7428_v8 }
 0x63d   :  { %3070 = vmatprep.subr.bf16.mxu0 %v7468_v12  ;;  %5912 = vmatpush3.bf16.msra.mxu1 %v6374_v30 }
 0x63e   :  { %5913 = vmatprep.subr.bf16.mxu1 %v8066_v37 }
 0x640   :  { %3071 = vmatpush1.bf16.msra.mxu0 %v7470_v34 }
 0x641   :  { %3348 = vmatprep.subr.bf16.mxu0 %v7474_v14  ;;  %5914 = vmatpush3.bf16.msra.mxu1 %v6375_v52 }
 0x642   :  { %5919 = vmatprep.subr.bf16.mxu1 %v8066_v37 }
 0x6c3   :  { %v2444_v2 = vpop.f32.mrf.mxu1  ;;  %v2485_v55 = vpop.f32.mrf.mxu0 }
 0x6c4   :  { %v2491_v7 = vadd.f32 %v2444_v2, %v7618_v36  ;;  %v7726_v36 = vld [vmem:[%s8011_s12] ss:$0 sm:$0xff] }
 0x6c5   :  { %v2446_v8 = vpop.f32.mrf.mxu1  ;;  %v5897_v12 = vpop.f32.mrf.mxu0  ;;  %v7733_v2 = vld [vmem:[%s8010_s11] ss:$0 sm:$0xff] }
 0x6c6   :  { %v2505_v34 = vadd.f32 %v2498_v54, %v2491_v7  ;;  %v2492_v28 = vadd.f32 %v2446_v8, %v7627_v62  ;;  %v2534_v7 = vadd.f32 %v7726_v36, %v7620_v53 }
 0x6c7   :  { %v2448_v14 = vpop.f32.mrf.mxu1  ;;  %v2488_v22 = vpop.f32.mrf.mxu0 }
 0x6c8   :  { %v5227_v3 = vmul.f32 -1.442695, %v2505_v34  ;;  %v2506_v48 = vadd.f32 %v2502_v43, %v2492_v28  ;;  %v2514_v34 = vadd.f32 %v7733_v2, %v2485_v55  ;;  %v6377_v55 = vld [vmem:[#allocation8 + $0x98] ss:$12 sps:$4 sm:$0xff]  }
 0x6c9   :  { %v2449_v5 = vpop.f32.mrf.mxu1  ;;  %v5898_v31 = vpop.f32.mrf.mxu0 }
 0x6ca   :  { %6578 = vpow2.f32 %v5227_v3  ;;  %v5228_v50 = vmul.f32 -1.442695, %v2506_v48 }
 0x6cc   :  { %6580 = vpow2.f32 %v5228_v50 }
 0x6d7   :  { %v6579_v30 = vpop.eup %6578 }
 0x6d8   :  { %v2521_v52 = vadd.f32 1.0, %v6579_v30  ;;  %v6376_v30 = vld [vmem:[#allocation8 + $0xb0] ss:$12 sps:$4 sm:$0xff]  }
 0x6d9   :  { %v6581_v25 = vpop.eup %6580 }
 0x6da   :  { %6582 = vrcp.f32 %v2521_v52  ;;  %v2522_v5 = vadd.f32 1.0, %v6581_v25  ;;  %v6379_v52 = vld [vmem:[#allocation8 + $0x68] ss:$12 sps:$4 sm:$0xff]   ;;  %v6380_v25 = vld [vmem:[#allocation8 + $0x50] ss:$12 sps:$4 sm:$0xff]  }
 0x6e3   :  { %v7728_v54 = vpop.f32.mrf.mxu0 }
 0x6e5   :  { %v7735_v62 = vpop.f32.mrf.mxu0 }
 0x6e7   :  { %v6583_v8 = vpop.eup %6582  ;;  %v2853_v12 = vpop.f32.mrf.mxu0 }
 0x6e8   :  { %v2535_v14 = vmul.f32 %v6583_v8, %v2534_v7  ;;  %v6381_v7 = vld [vmem:[#allocation8 + $0x38] ss:$12 sps:$4 sm:$0xff]   ;;  %v6382_v8 = vld [vmem:[#allocation8 + $0x20] ss:$12 sps:$4 sm:$0xff]   ;;  %v6383_v12 = vld [vmem:[#allocation8 + $0x8] ss:$12 sps:$4 sm:$0xff]  }
 0x6e9   :  { %v2854_v22 = vpop.f32.mrf.mxu0 }
 0x6ea   :  { %v2536_v3 = vadd.f32 %v2535_v14, %v2514_v34  ;;  %v6384_v34 = vld [vmem:[#allocation7 + $0xb0] ss:$12 sps:$4 sm:$0xff]   ;;  %v6385_v14 = vld [vmem:[#allocation7 + $0x98] ss:$12 sps:$4 sm:$0xff]   ;;  %v6386_v22 = vld [vmem:[#allocation7 + $0x80] ss:$12 sps:$4 sm:$0xff]  }
 0x6ec   :  { %6584 = vtanh.f32 %v2536_v3  ;;  %v6387_v3 = vld [vmem:[#allocation7 + $0x68] ss:$12 sps:$4 sm:$0xff]  }
 0x6ed   :  { %6586 = vrcp.f32 %v2522_v5  ;;  %v6388_v5 = vld [vmem:[#allocation7 + $0x50] ss:$12 sps:$4 sm:$0xff]  }
 0x6f9   :  { %v6585_v31 = vpop.eup %6584 }
 0x6fa   :  { %v2538_v28 = vsub.f32 %v7441_v19, %v6585_v31  ;;  %v6587_v43 = vpop.eup %6586  ;;  %v6378_v19 = vld [vmem:[#allocation8 + $0x80] ss:$12 sps:$4 sm:$0xff]  }
 0x6fc   :  { %v2539_v48 = vmul.f32 %v6587_v43, %v2538_v28  ;;  %v6391_v28 = vld [vmem:[#allocation7 + $0x8] ss:$12 sps:$4 sm:$0xff]  }
 0x6fe   :  { %v7741_v50 = vadd.f32 %v6585_v31, %v2539_v48  ;;  %v6390_v31 = vld [vmem:[#allocation7 + $0x20] ss:$12 sps:$4 sm:$0xff]  }
 0x700   :  { %v7745_v53 = vpack.c.bf16 %v7741_v50, %v7741_v50 }
 0x702   :  { %5916 = vmatmul.mubr.bf16.vlgmr.msra.gmra.mxu1 %v7745_v53 }
 0x703   :  { %5920 = vmatpush3.bf16.msra.mxu1 %v6376_v30  ;;  %5935 = vmatprep.mubr.msk.bf16.mxu1 %vm6835_vm0, %v8066_v37 }
 0x704   :  { %5921 = vmatprep.subr.bf16.mxu1 %v8066_v37 }
 0x707   :  { %5922 = vmatpush3.bf16.msra.mxu1 %v6377_v55  ;;  %v6392_v55 = vld [vmem:[#allocation11 + $0xb0] ss:$12 sps:$4 sm:$0xff]  }
 0x708   :  { %5923 = vmatprep.subr.bf16.mxu1 %v8066_v37 }
 0x70b   :  { %5924 = vmatpush3.bf16.msra.mxu1 %v6378_v19 }
 0x70c   :  { %5925 = vmatprep.subr.bf16.mxu1 %v8066_v37 }
 0x70f   :  { %5926 = vmatpush3.bf16.msra.mxu1 %v6379_v52 }
 0x710   :  { %5927 = vmatprep.subr.bf16.mxu1 %v8066_v37 }
 0x713   :  { %5928 = vmatpush3.bf16.msra.mxu1 %v6380_v25 }
 0x714   :  { %5929 = vmatprep.subr.bf16.mxu1 %v8066_v37 }
 0x717   :  { %5930 = vmatpush3.bf16.msra.mxu1 %v6381_v7  ;;  %v6393_v7 = vld [vmem:[#allocation11 + $0x98] ss:$12 sps:$4 sm:$0xff]  }
 0x718   :  { %5931 = vmatprep.subr.bf16.mxu1 %v8066_v37 }
 0x71b   :  { %5932 = vmatpush3.bf16.msra.mxu1 %v6382_v8  ;;  %v8111_v8 = vld [vmem:[#allocation29_spill] sm:$0xff] }
 0x71c   :  { %5933 = vmatprep.subr.bf16.mxu1 %v8066_v37 }
 0x71f   :  { %5934 = vmatpush3.bf16.msra.mxu1 %v6383_v12  ;;  %v8112_v12 = vld [vmem:[#allocation30_spill] sm:$0xff] }
 0x720   :  { %5939 = vmatprep.subr.bf16.mxu1 %v8066_v37 }
 0x722   :  { %5936 = vmatmul.mubr.bf16.vlgmr.msra.gmra.mxu1 %v7639_v21  ;;  %v6389_v21 = vld [vmem:[#allocation7 + $0x38] ss:$12 sps:$4 sm:$0xff]  }
 0x723   :  { %5940 = vmatpush3.bf16.msra.mxu1 %v6384_v34  ;;  %5955 = vmatprep.mubr.msk.bf16.mxu1 %vm6835_vm0, %v8066_v37  ;;  %v8113_v34 = vld [vmem:[#allocation31_spill] sm:$0xff] }
 0x724   :  { %5941 = vmatprep.subr.bf16.mxu1 %v8066_v37 }
 0x727   :  { %5942 = vmatpush3.bf16.msra.mxu1 %v6385_v14  ;;  %v8114_v14 = vld [vmem:[#allocation32_spill] sm:$0xff] }
 0x728   :  { %5943 = vmatprep.subr.bf16.mxu1 %v8066_v37 }
 0x72b   :  { %5944 = vmatpush3.bf16.msra.mxu1 %v6386_v22  ;;  %v8115_v22 = vld [vmem:[#allocation33_spill] sm:$0xff] }
 0x72c   :  { %5945 = vmatprep.subr.bf16.mxu1 %v8066_v37 }
 0x72f   :  { %5946 = vmatpush3.bf16.msra.mxu1 %v6387_v3  ;;  %v6400_v3 = vld [vmem:[#allocation10 + $0xb0] ss:$12 sps:$4 sm:$0xff]  }
 0x730   :  { %5947 = vmatprep.subr.bf16.mxu1 %v8066_v37 }
 0x733   :  { %5948 = vmatpush3.bf16.msra.mxu1 %v6388_v5  ;;  %v6401_v5 = vld [vmem:[#allocation10 + $0x98] ss:$12 sps:$4 sm:$0xff]  }
 0x734   :  { %5949 = vmatprep.subr.bf16.mxu1 %v8066_v37 }
 0x737   :  { %5950 = vmatpush3.bf16.msra.mxu1 %v6389_v21  ;;  %v6402_v21 = vld [vmem:[#allocation10 + $0x80] ss:$12 sps:$4 sm:$0xff]  }
 0x738   :  { %5951 = vmatprep.subr.bf16.mxu1 %v8066_v37 }
 0x73b   :  { %5952 = vmatpush3.bf16.msra.mxu1 %v6390_v31  ;;  %v6403_v31 = vld [vmem:[#allocation10 + $0x68] ss:$12 sps:$4 sm:$0xff]  }
 0x73c   :  { %5953 = vmatprep.subr.bf16.mxu1 %v8066_v37 }
 0x73f   :  { %5954 = vmatpush3.bf16.msra.mxu1 %v6391_v28  ;;  %v6404_v28 = vld [vmem:[#allocation10 + $0x50] ss:$12 sps:$4 sm:$0xff]  }
 0x740   :  { %5959 = vmatprep.subr.bf16.mxu1 %v8066_v37 }
 0x7c2   :  { %v2647_v43 = vpop.f32.mrf.mxu1 }
 0x7c3   :  { %v2648_v48 = vadd.f32 %v7481_v15, %v2647_v43  ;;  %v6394_v15 = vld [vmem:[#allocation11 + $0x80] ss:$12 sps:$4 sm:$0xff]   ;;  %v6405_v43 = vld [vmem:[#allocation10 + $0x38] ss:$12 sps:$4 sm:$0xff]  }
 0x7c4   :  { %v5917_v30 = vpop.f32.mrf.mxu1 }
 0x7c5   :  { %2653 = vst [vmem:[#allocation14 + $0x2] sm:$0x3] %v2648_v48  ;;  %v2654_v19 = vpack.c.bf16 %v2648_v48, %v2648_v48  ;;  %v6406_v48 = vld [vmem:[#allocation10 + $0x20] ss:$12 sps:$4 sm:$0xff]   ;;  %v6407_v30 = vld [vmem:[#allocation10 + $0x8] ss:$12 sps:$4 sm:$0xff]  }
 0x7c6   :  { %v2650_v52 = vpop.f32.mrf.mxu1 }
 0x7c7   :  { %3089 = vmatmul.mubr.bf16.vlgmr.msra.gmra.mxu0 %v2654_v19  ;;  %5956 = vmatmul.mubr.bf16.vlgmr.msra.gmra.mxu1 %v2654_v19  ;;  %v3139_v19 = vld [vmem:[%s8004_s5] sm:$0x3] }
 0x7c8   :  { %3349 = vmatpush1.bf16.msra.mxu0 %v7484_v59  ;;  %5960 = vmatpush3.bf16.msra.mxu1 %v6392_v55  ;;  %v5918_v25 = vpop.f32.mrf.mxu1  ;;  %v6395_v59 = vld [vmem:[#allocation11 + $0x68] ss:$12 sps:$4 sm:$0xff]   ;;  %v8116_v55 = vld [vmem:[#allocation34_spill] sm:$0xff]  ;;  %v3144_v52 = vrot.slane %v3139_v19, %v7158_v41 }
 0x7c9   :  { %3350 = vmatprep.subr.bf16.mxu0 %v7486_v1  ;;  %5961 = vmatprep.subr.bf16.mxu1 %v8066_v37  ;;  %v6396_v1 = vld [vmem:[#allocation11 + $0x50] ss:$12 sps:$4 sm:$0xff]  }
 0x7ca   :  { %3380 = vmatprep.mubr.bf16.mxu0 %v8067_v18  ;;  %5975 = vmatprep.mubr.msk.bf16.mxu1 %vm6835_vm0, %v8066_v37 }
 0x7cc   :  { %3351 = vmatpush1.bf16.msra.mxu0 %v7489_v27  ;;  %5962 = vmatpush3.bf16.msra.mxu1 %v6393_v7  ;;  %v6397_v27 = vld [vmem:[#allocation11 + $0x38] ss:$12 sps:$4 sm:$0xff]  }
 0x7cd   :  { %3352 = vmatprep.subr.bf16.mxu0 %v7493_v32  ;;  %5963 = vmatprep.subr.bf16.mxu1 %v8066_v37  ;;  %v6398_v32 = vld [vmem:[#allocation11 + $0x20] ss:$12 sps:$4 sm:$0xff]  }
 0x7d0   :  { %3353 = vmatpush1.bf16.msra.mxu0 %v7499_v20  ;;  %5964 = vmatpush3.bf16.msra.mxu1 %v6394_v15  ;;  %v6399_v20 = vld [vmem:[#allocation11 + $0x8] ss:$12 sps:$4 sm:$0xff]  }
 0x7d1   :  { %3354 = vmatprep.subr.bf16.mxu0 %v7503_v38  ;;  %5965 = vmatprep.subr.bf16.mxu1 %v8066_v37 }
 0x7d4   :  { %3355 = vmatpush1.bf16.msra.mxu0 %v7506_v23  ;;  %5966 = vmatpush3.bf16.msra.mxu1 %v6395_v59 }
 0x7d5   :  { %3356 = vmatprep.subr.bf16.mxu0 %v7510_v42  ;;  %5967 = vmatprep.subr.bf16.mxu1 %v8066_v37 }
 0x7d8   :  { %3357 = vmatpush1.bf16.msra.mxu0 %v7513_v45  ;;  %5968 = vmatpush3.bf16.msra.mxu1 %v6396_v1 }
 0x7d9   :  { %3358 = vmatprep.subr.bf16.mxu0 %v7517_v61  ;;  %5969 = vmatprep.subr.bf16.mxu1 %v8066_v37  ;;  %v8102_v61 = vld [vmem:[#allocation20_spill] sm:$0xff] }
 0x7dc   :  { %3359 = vmatpush1.bf16.msra.mxu0 %v7520_v24  ;;  %5970 = vmatpush3.bf16.msra.mxu1 %v6397_v27  ;;  %v8103_v24 = vld [vmem:[#allocation21_spill] sm:$0xff] }
 0x7dd   :  { %3360 = vmatprep.subr.bf16.mxu0 %v7524_v51  ;;  %5971 = vmatprep.subr.bf16.mxu1 %v8066_v37  ;;  %v8104_v51 = vld [vmem:[#allocation22_spill] sm:$0xff] }
 0x7e0   :  { %3361 = vmatpush1.bf16.msra.mxu0 %v7527_v26  ;;  %5972 = vmatpush3.bf16.msra.mxu1 %v6398_v32  ;;  %v8105_v26 = vld [vmem:[#allocation23_spill] sm:$0xff] }
 0x7e1   :  { %3362 = vmatprep.subr.bf16.mxu0 %v7531_v39  ;;  %5973 = vmatprep.subr.bf16.mxu1 %v8066_v37  ;;  %v8106_v39 = vld [vmem:[#allocation25_spill] sm:$0xff] }
 0x7e2   :  { %v7794_v38 = vpop.f32.mrf.mxu1 }
 0x7e4   :  { %v5937_v23 = vpop.f32.mrf.mxu1  ;;  %3363 = vmatpush1.bf16.msra.mxu0 %v7534_v40  ;;  %5974 = vmatpush3.bf16.msra.mxu1 %v6399_v20  ;;  %v8107_v40 = vld [vmem:[#allocation24_spill] sm:$0xff] }
 0x7e5   :  { %5979 = vmatprep.subr.bf16.mxu1 %v8066_v37  ;;  %3589 = vmatprep.subr.bf16.mxu0 %v7547_v10  ;;  %v8108_v10 = vld [vmem:[#allocation26_spill] sm:$0xff] }
 0x7e6   :  { %v2893_v42 = vpop.f32.mrf.mxu1 }
 0x7e7   :  { %3381 = vmatmul.mubr.bf16.vlgmr.msra.gmra.mxu0 %v7745_v53  ;;  %5976 = vmatmul.mubr.bf16.vlgmr.msra.gmra.mxu1 %v7745_v53  ;;  %v8110_v53 = vld [vmem:[#allocation28_spill] sm:$0xff] }
 0x7e8   :  { %v5938_v45 = vpop.f32.mrf.mxu1  ;;  %3590 = vmatpush1.bf16.msra.mxu0 %v7549_v11  ;;  %3621 = vmatprep.mubr.bf16.mxu0 %v8067_v18  ;;  %v8109_v11 = vld [vmem:[#allocation27_spill] sm:$0xff] }
 0x7e9   :  { %3591 = vmatprep.subr.bf16.mxu0 %v8102_v61  ;;  %5995 = vmatprep.mubr.msk.bf16.mxu1 %vm6835_vm0, %v8066_v37 }
 0x7ea   :  { %5980 = vmatpush3.bf16.msra.mxu1 %v6400_v3 }
 0x7eb   :  { %5981 = vmatprep.subr.bf16.mxu1 %v8066_v37 }
 0x7ec   :  { %3592 = vmatpush1.bf16.msra.mxu0 %v8103_v24  ;;  %v3148_v24 = vrot.slane %v3139_v19, %v7167_v33 }
 0x7ed   :  { %3593 = vmatprep.subr.bf16.mxu0 %v8104_v51 }
 0x7ee   :  { %5982 = vmatpush3.bf16.msra.mxu1 %v6401_v5 }
 0x7ef   :  { %5983 = vmatprep.subr.bf16.mxu1 %v8066_v37 }
 0x7f0   :  { %3594 = vmatpush1.bf16.msra.mxu0 %v8105_v26 }
 0x7f1   :  { %3595 = vmatprep.subr.bf16.mxu0 %v8106_v39 }
 0x7f2   :  { %5984 = vmatpush3.bf16.msra.mxu1 %v6402_v21 }
 0x7f3   :  { %5985 = vmatprep.subr.bf16.mxu1 %v8066_v37 }
 0x7f4   :  { %3596 = vmatpush1.bf16.msra.mxu0 %v8107_v40 }
 0x7f5   :  { %3597 = vmatprep.subr.bf16.mxu0 %v8108_v10 }
 0x7f6   :  { %5986 = vmatpush3.bf16.msra.mxu1 %v6403_v31 }
 0x7f7   :  { %5987 = vmatprep.subr.bf16.mxu1 %v8066_v37 }
 0x7f8   :  { %3598 = vmatpush1.bf16.msra.mxu0 %v8109_v11 }
 0x7f9   :  { %3599 = vmatprep.subr.bf16.mxu0 %v8110_v53 }
 0x7fa   :  { %5988 = vmatpush3.bf16.msra.mxu1 %v6404_v28 }
 0x7fb   :  { %5989 = vmatprep.subr.bf16.mxu1 %v8066_v37 }
 0x7fc   :  { %3600 = vmatpush1.bf16.msra.mxu0 %v8111_v8 }
 0x7fd   :  { %3601 = vmatprep.subr.bf16.mxu0 %v8112_v12  ;;  %v3180_v12 = vadd.f32 %v7616_v6, %v7794_v38  ;;  %v6440_v38 = vld [vmem:[#allocation7 + $0x48] ss:$12 sps:$4 sm:$0xff]  }
 0x7fe   :  { %5990 = vmatpush3.bf16.msra.mxu1 %v6405_v43 }
 0x7ff   :  { %5991 = vmatprep.subr.bf16.mxu1 %v8066_v37 }
 0x800   :  { %3602 = vmatpush1.bf16.msra.mxu0 %v8113_v34 }
 0x801   :  { %3603 = vmatprep.subr.bf16.mxu0 %v8114_v14 }
 0x802   :  { %5992 = vmatpush3.bf16.msra.mxu1 %v6406_v48 }
 0x803   :  { %5993 = vmatprep.subr.bf16.mxu1 %v8066_v37 }
 0x804   :  { %3604 = vmatpush1.bf16.msra.mxu0 %v8115_v22 }
 0x805   :  { %5999 = vmatprep.subr.bf16.mxu0 %v8066_v37 }
 0x806   :  { %5994 = vmatpush3.bf16.msra.mxu1 %v6407_v30 }
 0x807   :  { %3994 = vmatprep.subr.bf16.mxu1 %v8116_v55 }
 0x887   :  { %v3090_v25 = vpop.f32.mrf.mxu0  ;;  %v3131_v7 = vpop.f32.mrf.mxu1 }
 0x888   :  { %v3137_v15 = vadd.f32 %v3090_v25, %v7728_v54  ;;  %v3160_v22 = vadd.f32 %v7625_v0, %v3131_v7  ;;  %v6409_v0 = vld [vmem:[#allocation13 + $0x30] sm:$0xff]   ;;  %v6450_v7 = vld [vmem:[#allocation7 + $0x1c] ss:$12 sps:$4 sm:$0xff]  }
 0x889   :  { %v3092_v59 = vpop.f32.mrf.mxu0  ;;  %v5957_v1 = vpop.f32.mrf.mxu1  ;;  %v6444_v25 = vld [vmem:[#allocation7 + $0x30] ss:$12 sps:$4 sm:$0xff]  }
 0x88a   :  { %v3151_v27 = vadd.f32 %v3144_v52, %v3137_v15  ;;  %v3138_v61 = vadd.f32 %v3092_v59, %v7735_v62  ;;  %v6446_v52 = vld [vmem:[#allocation7 + $0x34] ss:$12 sps:$4 sm:$0xff]   ;;  %v6448_v15 = vld [vmem:[#allocation7 + $0x18] ss:$12 sps:$4 sm:$0xff]  }
 0x88b   :  { %v3094_v32 = vpop.f32.mrf.mxu0  ;;  %v3134_v20 = vpop.f32.mrf.mxu1  ;;  %v3672_v59 = vld [vmem:[%s8009_s10] sm:$0x3] }
 0x88c   :  { %v5288_v23 = vmul.f32 -1.442695, %v3151_v27  ;;  %v3152_v51 = vadd.f32 %v3148_v24, %v3138_v61  ;;  %v3677_v1 = vrot.slane %v3672_v59, %v7158_v41 }
 0x88d   :  { %v3095_v42 = vpop.f32.mrf.mxu0  ;;  %v5958_v45 = vpop.f32.mrf.mxu1 }
 0x88e   :  { %6588 = vpow2.f32 %v5288_v23  ;;  %v5289_v26 = vmul.f32 -1.442695, %v3152_v51 }
 0x890   :  { %6590 = vpow2.f32 %v5289_v26 }
 0x89b   :  { %v6589_v39 = vpop.eup %6588 }
 0x89c   :  { %v3167_v40 = vadd.f32 1.0, %v6589_v39 }
 0x89d   :  { %v6591_v8 = vpop.eup %6590 }
 0x89e   :  { %6592 = vrcp.f32 %v3167_v40  ;;  %v3168_v28 = vadd.f32 1.0, %v6591_v8 }
 0x8a7   :  { %v7835_v54 = vpop.f32.mrf.mxu0  ;;  %v7837_v10 = vpop.f32.mrf.mxu1 }
 0x8a9   :  { %v7839_v11 = vpop.f32.mrf.mxu0  ;;  %v5977_v53 = vpop.f32.mrf.mxu1 }
 0x8aa   :  { %v3681_v53 = vrot.slane %v3672_v59, %v7167_v33  ;;  %v6456_v59 = vld [vmem:[#allocation11 + $0xa8] ss:$12 sps:$4 sm:$0xff]  }
 0x8ab   :  { %v6593_v62 = vpop.eup %6592  ;;  %v3386_v34 = vpop.f32.mrf.mxu0 }
 0x8ac   :  { %v3426_v14 = vpop.f32.mrf.mxu1  ;;  %v3181_v3 = vmul.f32 %v6593_v62, %v3180_v12 }
 0x8ad   :  { %v3387_v5 = vpop.f32.mrf.mxu0 }
 0x8ae   :  { %v5978_v21 = vpop.f32.mrf.mxu1  ;;  %v3182_v31 = vadd.f32 %v3181_v3, %v3160_v22  ;;  %v3713_v3 = vadd.f32 %v7726_v36, %v7837_v10  ;;  %v6419_v10 = vld [vmem:[#allocation8 + $0x68] ss:$12 sps:$4 sm:$0xff]  }
 0x8b0   :  { %6594 = vtanh.f32 %v3182_v31 }
 0x8b1   :  { %6596 = vrcp.f32 %v3168_v28 }
 0x8bd   :  { %v6595_v43 = vpop.eup %6594 }
 0x8be   :  { %v3184_v48 = vsub.f32 %v7633_v13, %v6595_v43  ;;  %v6597_v30 = vpop.eup %6596  ;;  %v6408_v13 = vld [vmem:[#allocation13 + $0x38] sm:$0xff]  }
 0x8c0   :  { %v3185_v55 = vmul.f32 %v6597_v30, %v3184_v48 }
 0x8c2   :  { %v7845_v19 = vadd.f32 %v6595_v43, %v3185_v55 }
 0x8c4   :  { %v7849_v6 = vpack.c.bf16 %v7845_v19, %v7845_v19 }
 0x8c6   :  { %3622 = vmatmul.mubr.bf16.vlgmr.msra.gmra.mxu0 %v7849_v6  ;;  %5996 = vmatmul.mubr.bf16.vlgmr.msra.gmra.mxu1 %v7849_v6 }
 0x8c7   :  { %3995 = vmatpush1.bf16.msra.mxu1 %v7635_v47  ;;  %4026 = vmatprep.mubr.bf16.mxu1 %v8067_v18  ;;  %v6410_v47 = vld [vmem:[#allocation13 + $0x28] sm:$0xff]  }
 0x8c8   :  { %3996 = vmatprep.subr.bf16.mxu1 %v7641_v35  ;;  %6015 = vmatprep.mubr.msk.bf16.mxu0 %vm6835_vm0, %v8066_v37  ;;  %v6411_v35 = vld [vmem:[#allocation13 + $0x20] sm:$0xff]  }
 0x8c9   :  { %6000 = vmatpush3.bf16.msra.mxu0 %v6408_v13 }
 0x8ca   :  { %6001 = vmatprep.subr.bf16.mxu0 %v8066_v37 }
 0x8cb   :  { %3997 = vmatpush1.bf16.msra.mxu1 %v7646_v56  ;;  %v6412_v56 = vld [vmem:[#allocation13 + $0x18] sm:$0xff]  }
 0x8cc   :  { %3998 = vmatprep.subr.bf16.mxu1 %v7650_v4  ;;  %v6413_v4 = vld [vmem:[#allocation13 + $0x10] sm:$0xff]  }
 0x8cd   :  { %6002 = vmatpush3.bf16.msra.mxu0 %v6409_v0 }
 0x8ce   :  { %6003 = vmatprep.subr.bf16.mxu0 %v8066_v37 }
 0x8cf   :  { %3999 = vmatpush1.bf16.msra.mxu1 %v7655_v29  ;;  %v6414_v29 = vld [vmem:[#allocation13 + $0x8] sm:$0xff]  }
 0x8d0   :  { %4000 = vmatprep.subr.bf16.mxu1 %v7658_v60  ;;  %v6415_v60 = vld [vmem:[#allocation13] sm:$0xff]  }
 0x8d1   :  { %6004 = vmatpush3.bf16.msra.mxu0 %v6410_v47 }
 0x8d2   :  { %6005 = vmatprep.subr.bf16.mxu0 %v8066_v37 }
 0x8d3   :  { %4001 = vmatpush1.bf16.msra.mxu1 %v7661_v44  ;;  %v6424_v44 = vld [vmem:[#allocation7 + $0xa8] ss:$12 sps:$4 sm:$0xff]  }
 0x8d4   :  { %4002 = vmatprep.subr.bf16.mxu1 %v7664_v46  ;;  %v6426_v46 = vld [vmem:[#allocation7 + $0xac] ss:$12 sps:$4 sm:$0xff]  }
 0x8d5   :  { %6006 = vmatpush3.bf16.msra.mxu0 %v6411_v35  ;;  %v6416_v35 = vld [vmem:[#allocation8 + $0xb0] ss:$12 sps:$4 sm:$0xff]  }
 0x8d6   :  { %6007 = vmatprep.subr.bf16.mxu0 %v8066_v37 }
 0x8d7   :  { %4003 = vmatpush1.bf16.msra.mxu1 %v7667_v49  ;;  %v6430_v49 = vld [vmem:[#allocation7 + $0x94] ss:$12 sps:$4 sm:$0xff]  }
 0x8d8   :  { %4004 = vmatprep.subr.bf16.mxu1 %v7670_v9  ;;  %v6428_v9 = vld [vmem:[#allocation7 + $0x90] ss:$12 sps:$4 sm:$0xff]  }
 0x8d9   :  { %6008 = vmatpush3.bf16.msra.mxu0 %v6412_v56  ;;  %v6420_v56 = vld [vmem:[#allocation8 + $0x50] ss:$12 sps:$4 sm:$0xff]  }
 0x8da   :  { %6009 = vmatprep.subr.bf16.mxu0 %v8066_v37 }
 0x8db   :  { %4005 = vmatpush1.bf16.msra.mxu1 %v7673_v58  ;;  %v6434_v58 = vld [vmem:[#allocation7 + $0x7c] ss:$12 sps:$4 sm:$0xff]  }
 0x8dc   :  { %4006 = vmatprep.subr.bf16.mxu1 %v7676_v57  ;;  %v6432_v57 = vld [vmem:[#allocation7 + $0x78] ss:$12 sps:$4 sm:$0xff]  }
 0x8dd   :  { %6010 = vmatpush3.bf16.msra.mxu0 %v6413_v4  ;;  %v6421_v4 = vld [vmem:[#allocation8 + $0x38] ss:$12 sps:$4 sm:$0xff]  }
 0x8de   :  { %6011 = vmatprep.subr.bf16.mxu0 %v8066_v37 }
 0x8df   :  { %4007 = vmatpush1.bf16.msra.mxu1 %v7679_v16  ;;  %v6438_v16 = vld [vmem:[#allocation7 + $0x64] ss:$12 sps:$4 sm:$0xff]  }
 0x8e0   :  { %4008 = vmatprep.subr.bf16.mxu1 %v7682_v17  ;;  %v6436_v17 = vld [vmem:[#allocation7 + $0x60] ss:$12 sps:$4 sm:$0xff]  }
 0x8e1   :  { %6012 = vmatpush3.bf16.msra.mxu0 %v6414_v29  ;;  %v6422_v29 = vld [vmem:[#allocation8 + $0x20] ss:$12 sps:$4 sm:$0xff]  }
 0x8e2   :  { %6013 = vmatprep.subr.bf16.mxu0 %v8066_v37 }
 0x8e3   :  { %4009 = vmatpush1.bf16.msra.mxu1 %v7685_v63  ;;  %v6442_v63 = vld [vmem:[#allocation7 + $0x4c] ss:$12 sps:$4 sm:$0xff]  }
 0x8e4   :  { %4235 = vmatprep.subr.bf16.mxu1 %v6426_v46  ;;  %v6431_v46 = vld [vmem:[#allocation7 + $0x98] ss:$12 sps:$4 sm:$0xff]  }
 0x8e5   :  { %6014 = vmatpush3.bf16.msra.mxu0 %v6415_v60  ;;  %v6423_v60 = vld [vmem:[#allocation8 + $0x8] ss:$12 sps:$4 sm:$0xff]  }
 0x8e6   :  { %4027 = vmatmul.mubr.bf16.vlgmr.msra.gmra.mxu1 %v7849_v6  ;;  %6019 = vmatprep.subr.bf16.mxu0 %v8066_v37 }
 0x8e7   :  { %4267 = vmatprep.mubr.bf16.mxu1 %v8067_v18  ;;  %4236 = vmatpush1.bf16.msra.mxu1 %v6424_v44  ;;  %v6427_v44 = vld [vmem:[#allocation7 + $0xb0] ss:$12 sps:$4 sm:$0xff]  }
 0x8e8   :  { %4237 = vmatprep.subr.bf16.mxu1 %v6430_v49  ;;  %v6435_v49 = vld [vmem:[#allocation7 + $0x80] ss:$12 sps:$4 sm:$0xff]  }
 0x8eb   :  { %4238 = vmatpush1.bf16.msra.mxu1 %v6428_v9  ;;  %v6439_v9 = vld [vmem:[#allocation7 + $0x68] ss:$12 sps:$4 sm:$0xff]  }
 0x8ec   :  { %4239 = vmatprep.subr.bf16.mxu1 %v6434_v58  ;;  %v6443_v58 = vld [vmem:[#allocation7 + $0x50] ss:$12 sps:$4 sm:$0xff]  }
 0x8ef   :  { %4240 = vmatpush1.bf16.msra.mxu1 %v6432_v57  ;;  %v6451_v57 = vld [vmem:[#allocation7 + $0x20] ss:$12 sps:$4 sm:$0xff]  }
 0x8f0   :  { %4241 = vmatprep.subr.bf16.mxu1 %v6438_v16  ;;  %v6454_v16 = vld [vmem:[#allocation7 + $0x4] ss:$12 sps:$4 sm:$0xff]  }
 0x8f3   :  { %4242 = vmatpush1.bf16.msra.mxu1 %v6436_v17  ;;  %v6452_v17 = vld [vmem:[#allocation7] ss:$12 sps:$4 sm:$0xff]  }
 0x8f4   :  { %4243 = vmatprep.subr.bf16.mxu1 %v6442_v63  ;;  %v6455_v63 = vld [vmem:[#allocation7 + $0x8] ss:$12 sps:$4 sm:$0xff]  }
 0x8f7   :  { %4244 = vmatpush1.bf16.msra.mxu1 %v6440_v38  ;;  %v6458_v38 = vld [vmem:[#allocation11 + $0xac] ss:$12 sps:$4 sm:$0xff]  }
 0x8f8   :  { %4245 = vmatprep.subr.bf16.mxu1 %v6446_v52  ;;  %v7927_v52 = vld [vmem:[%s8013_s14] ss:$0 sm:$0xff] }
 0x8fb   :  { %4246 = vmatpush1.bf16.msra.mxu1 %v6444_v25 }
 0x8fc   :  { %4247 = vmatprep.subr.bf16.mxu1 %v6450_v7 }
 0x8ff   :  { %4248 = vmatpush1.bf16.msra.mxu1 %v6448_v15 }
 0x900   :  { %4249 = vmatprep.subr.bf16.mxu1 %v6454_v16  ;;  %v6512_v16 = vld [vmem:[#allocation10 + $0x18] ss:$12 sps:$4 sm:$0xff]  }
 0x903   :  { %4250 = vmatpush1.bf16.msra.mxu1 %v6452_v17  ;;  %v6515_v17 = vld [vmem:[#allocation10 + $0x20] ss:$12 sps:$4 sm:$0xff]  }
 0x904   :  { %4527 = vmatprep.subr.bf16.mxu1 %v6458_v38  ;;  %v6516_v38 = vld [vmem:[#allocation10] ss:$12 sps:$4 sm:$0xff]  }
 0x986   :  { %v3623_v27 = vpop.f32.mrf.mxu0  ;;  %v3664_v32 = vpop.f32.mrf.mxu1 }
 0x987   :  { %v3670_v20 = vadd.f32 %v3623_v27, %v7835_v54 }
 0x988   :  { %v3625_v23 = vpop.f32.mrf.mxu0  ;;  %v5997_v42 = vpop.f32.mrf.mxu1 }
 0x989   :  { %v3684_v45 = vadd.f32 %v3677_v1, %v3670_v20  ;;  %v3671_v40 = vadd.f32 %v3625_v23, %v7839_v11  ;;  %v3693_v11 = vadd.f32 %v7733_v2, %v3664_v32  ;;  %v6417_v2 = vld [vmem:[#allocation8 + $0x98] ss:$12 sps:$4 sm:$0xff]   ;;  %v6459_v1 = vld [vmem:[#allocation11 + $0xb0] ss:$12 sps:$4 sm:$0xff]   ;;  %v6462_v32 = vld [vmem:[#allocation11 + $0x94] ss:$12 sps:$4 sm:$0xff]  }
 0x98a   :  { %v3627_v61 = vpop.f32.mrf.mxu0  ;;  %v3667_v24 = vpop.f32.mrf.mxu1  ;;  %v6460_v42 = vld [vmem:[#allocation11 + $0x90] ss:$12 sps:$4 sm:$0xff]  }
 0x98b   :  { %v5340_v51 = vmul.f32 -1.442695, %v3684_v45  ;;  %v3685_v8 = vadd.f32 %v3681_v53, %v3671_v40  ;;  %v6463_v45 = vld [vmem:[#allocation11 + $0x98] ss:$12 sps:$4 sm:$0xff]   ;;  %v6466_v61 = vld [vmem:[#allocation11 + $0x7c] ss:$12 sps:$4 sm:$0xff]  }
 0x98c   :  { %v3628_v26 = vpop.f32.mrf.mxu0  ;;  %v5998_v39 = vpop.f32.mrf.mxu1  ;;  %v6464_v24 = vld [vmem:[#allocation11 + $0x78] ss:$12 sps:$4 sm:$0xff]   ;;  %v6471_v40 = vld [vmem:[#allocation11 + $0x68] ss:$12 sps:$4 sm:$0xff]  }
 0x98d   :  { %6598 = vpow2.f32 %v5340_v51  ;;  %v5341_v12 = vmul.f32 -1.442695, %v3685_v8  ;;  %v6467_v51 = vld [vmem:[#allocation11 + $0x80] ss:$12 sps:$4 sm:$0xff]   ;;  %v6470_v26 = vld [vmem:[#allocation11 + $0x64] ss:$12 sps:$4 sm:$0xff]  }
 0x98e   :  { %v6468_v39 = vld [vmem:[#allocation11 + $0x60] ss:$12 sps:$4 sm:$0xff]   ;;  %v6472_v8 = vld [vmem:[#allocation11 + $0x48] ss:$12 sps:$4 sm:$0xff]  }
 0x98f   :  { %6600 = vpow2.f32 %v5341_v12  ;;  %v6474_v53 = vld [vmem:[#allocation11 + $0x4c] ss:$12 sps:$4 sm:$0xff]   ;;  %v6475_v12 = vld [vmem:[#allocation11 + $0x50] ss:$12 sps:$4 sm:$0xff]  }
 0x99a   :  { %v6599_v62 = vpop.eup %6598 }
 0x99b   :  { %v3700_v34 = vadd.f32 1.0, %v6599_v62  ;;  %v6478_v62 = vld [vmem:[#allocation11 + $0x34] ss:$12 sps:$4 sm:$0xff]  }
 0x99c   :  { %v6601_v22 = vpop.eup %6600 }
 0x99d   :  { %6602 = vrcp.f32 %v3700_v34  ;;  %v3701_v48 = vadd.f32 1.0, %v6601_v22  ;;  %v6476_v34 = vld [vmem:[#allocation11 + $0x30] ss:$12 sps:$4 sm:$0xff]   ;;  %v6479_v22 = vld [vmem:[#allocation11 + $0x38] ss:$12 sps:$4 sm:$0xff]  }
 0x9a6   :  { %v7888_v54 = vpop.f32.mrf.mxu1 }
 0x9a8   :  { %v7890_v14 = vpop.f32.mrf.mxu1 }
 0x9aa   :  { %v6603_v5 = vpop.eup %6602  ;;  %v4032_v21 = vpop.f32.mrf.mxu1 }
 0x9ab   :  { %v3714_v31 = vmul.f32 %v6603_v5, %v3713_v3  ;;  %v6482_v3 = vld [vmem:[#allocation11 + $0x1c] ss:$12 sps:$4 sm:$0xff]   ;;  %v6480_v5 = vld [vmem:[#allocation11 + $0x18] ss:$12 sps:$4 sm:$0xff]   ;;  %v6483_v21 = vld [vmem:[#allocation11 + $0x20] ss:$12 sps:$4 sm:$0xff]  }
 0x9ac   :  { %v4033_v28 = vpop.f32.mrf.mxu1 }
 0x9ad   :  { %v3715_v43 = vadd.f32 %v3714_v31, %v3693_v11  ;;  %v6486_v11 = vld [vmem:[#allocation11 + $0x4] ss:$12 sps:$4 sm:$0xff]   ;;  %v6484_v31 = vld [vmem:[#allocation11] ss:$12 sps:$4 sm:$0xff]   ;;  %v6487_v28 = vld [vmem:[#allocation11 + $0x8] ss:$12 sps:$4 sm:$0xff]  }
 0x9af   :  { %6604 = vtanh.f32 %v3715_v43 }
 0x9b0   :  { %6606 = vrcp.f32 %v3701_v48 }
 0x9bc   :  { %v6605_v30 = vpop.eup %6604 }
 0x9bd   :  { %v3717_v55 = vsub.f32 %v7741_v50, %v6605_v30  ;;  %v6607_v13 = vpop.eup %6606  ;;  %v6418_v50 = vld [vmem:[#allocation8 + $0x80] ss:$12 sps:$4 sm:$0xff]  }
 0x9bf   :  { %v3718_v0 = vmul.f32 %v6607_v13, %v3717_v55  ;;  %v6490_v13 = vld [vmem:[#allocation10 + $0xac] ss:$12 sps:$4 sm:$0xff]  }
 0x9c1   :  { %v7896_v47 = vadd.f32 %v6605_v30, %v3718_v0  ;;  %v6488_v0 = vld [vmem:[#allocation10 + $0xa8] ss:$12 sps:$4 sm:$0xff]  }
 0x9c3   :  { %v7900_v36 = vpack.c.bf16 %v7896_v47, %v7896_v47 }
 0x9c5   :  { %6016 = vmatmul.mubr.bf16.vlgmr.msra.gmra.mxu0 %v7900_v36 }
 0x9c6   :  { %6020 = vmatpush3.bf16.msra.mxu0 %v6416_v35  ;;  %6035 = vmatprep.mubr.msk.bf16.mxu0 %vm6835_vm0, %v8066_v37  ;;  %v6491_v35 = vld [vmem:[#allocation10 + $0xb0] ss:$12 sps:$4 sm:$0xff]  }
 0x9c7   :  { %6021 = vmatprep.subr.bf16.mxu0 %v8066_v37 }
 0x9ca   :  { %6022 = vmatpush3.bf16.msra.mxu0 %v6417_v2  ;;  %v6494_v2 = vld [vmem:[#allocation10 + $0x94] ss:$12 sps:$4 sm:$0xff]  }
 0x9cb   :  { %6023 = vmatprep.subr.bf16.mxu0 %v8066_v37 }
 0x9ce   :  { %6024 = vmatpush3.bf16.msra.mxu0 %v6418_v50  ;;  %v6492_v50 = vld [vmem:[#allocation10 + $0x90] ss:$12 sps:$4 sm:$0xff]  }
 0x9cf   :  { %6025 = vmatprep.subr.bf16.mxu0 %v8066_v37 }
 0x9d2   :  { %6026 = vmatpush3.bf16.msra.mxu0 %v6419_v10  ;;  %v6495_v10 = vld [vmem:[#allocation10 + $0x98] ss:$12 sps:$4 sm:$0xff]  }
 0x9d3   :  { %6027 = vmatprep.subr.bf16.mxu0 %v8066_v37 }
 0x9d6   :  { %6028 = vmatpush3.bf16.msra.mxu0 %v6420_v56  ;;  %v6499_v56 = vld [vmem:[#allocation10 + $0x80] ss:$12 sps:$4 sm:$0xff]  }
 0x9d7   :  { %6029 = vmatprep.subr.bf16.mxu0 %v8066_v37 }
 0x9da   :  { %6030 = vmatpush3.bf16.msra.mxu0 %v6421_v4  ;;  %v6500_v4 = vld [vmem:[#allocation10 + $0x60] ss:$12 sps:$4 sm:$0xff]  }
 0x9db   :  { %6031 = vmatprep.subr.bf16.mxu0 %v8066_v37 }
 0x9de   :  { %6032 = vmatpush3.bf16.msra.mxu0 %v6422_v29  ;;  %v6502_v29 = vld [vmem:[#allocation10 + $0x64] ss:$12 sps:$4 sm:$0xff]  }
 0x9df   :  { %6033 = vmatprep.subr.bf16.mxu0 %v8066_v37 }
 0x9e2   :  { %6034 = vmatpush3.bf16.msra.mxu0 %v6423_v60  ;;  %v6503_v60 = vld [vmem:[#allocation10 + $0x68] ss:$12 sps:$4 sm:$0xff]  }
 0x9e3   :  { %6039 = vmatprep.subr.bf16.mxu0 %v8066_v37 }
 0x9e5   :  { %6036 = vmatmul.mubr.bf16.vlgmr.msra.gmra.mxu0 %v7849_v6  ;;  %v6447_v6 = vld [vmem:[#allocation7 + $0x38] ss:$12 sps:$4 sm:$0xff]  }
 0x9e6   :  { %6040 = vmatpush3.bf16.msra.mxu0 %v6427_v44  ;;  %6055 = vmatprep.mubr.msk.bf16.mxu0 %vm6835_vm0, %v8066_v37  ;;  %v6506_v44 = vld [vmem:[#allocation10 + $0x4c] ss:$12 sps:$4 sm:$0xff]  }
 0x9e7   :  { %6041 = vmatprep.subr.bf16.mxu0 %v8066_v37 }
 0x9ea   :  { %6042 = vmatpush3.bf16.msra.mxu0 %v6431_v46  ;;  %v6504_v46 = vld [vmem:[#allocation10 + $0x48] ss:$12 sps:$4 sm:$0xff]  }
 0x9eb   :  { %6043 = vmatprep.subr.bf16.mxu0 %v8066_v37 }
 0x9ee   :  { %6044 = vmatpush3.bf16.msra.mxu0 %v6435_v49  ;;  %v6507_v49 = vld [vmem:[#allocation10 + $0x50] ss:$12 sps:$4 sm:$0xff]  }
 0x9ef   :  { %6045 = vmatprep.subr.bf16.mxu0 %v8066_v37 }
 0x9f2   :  { %6046 = vmatpush3.bf16.msra.mxu0 %v6439_v9  ;;  %v6510_v9 = vld [vmem:[#allocation10 + $0x34] ss:$12 sps:$4 sm:$0xff]  }
 0x9f3   :  { %6047 = vmatprep.subr.bf16.mxu0 %v8066_v37 }
 0x9f6   :  { %6048 = vmatpush3.bf16.msra.mxu0 %v6443_v58  ;;  %v6508_v58 = vld [vmem:[#allocation10 + $0x30] ss:$12 sps:$4 sm:$0xff]  }
 0x9f7   :  { %6049 = vmatprep.subr.bf16.mxu0 %v8066_v37 }
 0x9fa   :  { %6050 = vmatpush3.bf16.msra.mxu0 %v6447_v6  ;;  %v6511_v6 = vld [vmem:[#allocation10 + $0x38] ss:$12 sps:$4 sm:$0xff]  }
 0x9fb   :  { %6051 = vmatprep.subr.bf16.mxu0 %v8066_v37 }
 0x9fe   :  { %6052 = vmatpush3.bf16.msra.mxu0 %v6451_v57  ;;  %v6514_v57 = vld [vmem:[#allocation10 + $0x1c] ss:$12 sps:$4 sm:$0xff]  }
 0x9ff   :  { %6053 = vmatprep.subr.bf16.mxu0 %v8066_v37 }
 0xa02   :  { %6054 = vmatpush3.bf16.msra.mxu0 %v6455_v63  ;;  %v6518_v63 = vld [vmem:[#allocation10 + $0x4] ss:$12 sps:$4 sm:$0xff]  }
 0xa03   :  { %6059 = vmatprep.subr.bf16.mxu0 %v8066_v37 }
 0xa85   :  { %v3826_v25 = vpop.f32.mrf.mxu0 }
 0xa86   :  { %v3827_v7 = vadd.f32 %v7927_v52, %v3826_v25  ;;  %v6519_v25 = vld [vmem:[#allocation10 + $0x8] ss:$12 sps:$4 sm:$0xff]  }
 0xa87   :  { %v6017_v15 = vpop.f32.mrf.mxu0 }
 0xa88   :  { %3832 = vst [vmem:[#allocation14 + $0x4] sm:$0x3] %v3827_v7  ;;  %v3833_v27 = vpack.c.bf16 %v3827_v7, %v3827_v7  ;;  %v4318_v7 = vld [vmem:[%s8004_s5] sm:$0x3] }
 0xa89   :  { %v3829_v20 = vpop.f32.mrf.mxu0  ;;  %v4323_v15 = vrot.slane %v4318_v7, %v7158_v41 }
 0xa8a   :  { %4268 = vmatmul.mubr.bf16.vlgmr.msra.gmra.mxu1 %v3833_v27  ;;  %6056 = vmatmul.mubr.bf16.vlgmr.msra.gmra.mxu0 %v3833_v27 }
 0xa8b   :  { %4528 = vmatpush1.bf16.msra.mxu1 %v6456_v59  ;;  %6060 = vmatpush3.bf16.msra.mxu0 %v6459_v1  ;;  %v6018_v23 = vpop.f32.mrf.mxu0 }
 0xa8c   :  { %4529 = vmatprep.subr.bf16.mxu1 %v6462_v32  ;;  %6061 = vmatprep.subr.bf16.mxu0 %v8066_v37 }
 0xa8d   :  { %4559 = vmatprep.mubr.bf16.mxu1 %v8067_v18  ;;  %6075 = vmatprep.mubr.msk.bf16.mxu0 %vm6835_vm0, %v8066_v37 }
 0xa8f   :  { %4530 = vmatpush1.bf16.msra.mxu1 %v6460_v42  ;;  %6062 = vmatpush3.bf16.msra.mxu0 %v6463_v45 }
 0xa90   :  { %4531 = vmatprep.subr.bf16.mxu1 %v6466_v61  ;;  %6063 = vmatprep.subr.bf16.mxu0 %v8066_v37 }
 0xa93   :  { %4532 = vmatpush1.bf16.msra.mxu1 %v6464_v24  ;;  %6064 = vmatpush3.bf16.msra.mxu0 %v6467_v51 }
 0xa94   :  { %4533 = vmatprep.subr.bf16.mxu1 %v6470_v26  ;;  %6065 = vmatprep.subr.bf16.mxu0 %v8066_v37 }
 0xa97   :  { %4534 = vmatpush1.bf16.msra.mxu1 %v6468_v39  ;;  %6066 = vmatpush3.bf16.msra.mxu0 %v6471_v40  ;;  %v4327_v39 = vrot.slane %v4318_v7, %v7167_v33 }
 0xa98   :  { %4535 = vmatprep.subr.bf16.mxu1 %v6474_v53  ;;  %6067 = vmatprep.subr.bf16.mxu0 %v8066_v37 }
 0xa9b   :  { %4536 = vmatpush1.bf16.msra.mxu1 %v6472_v8  ;;  %6068 = vmatpush3.bf16.msra.mxu0 %v6475_v12 }
 0xa9c   :  { %4537 = vmatprep.subr.bf16.mxu1 %v6478_v62  ;;  %6069 = vmatprep.subr.bf16.mxu0 %v8066_v37 }
 0xa9f   :  { %4538 = vmatpush1.bf16.msra.mxu1 %v6476_v34  ;;  %6070 = vmatpush3.bf16.msra.mxu0 %v6479_v22  ;;  %v5400_v22 = vld [vmem:[%s8005_s6] ss:$0 sm:$0xff] }
 0xaa0   :  { %4539 = vmatprep.subr.bf16.mxu1 %v6482_v3  ;;  %6071 = vmatprep.subr.bf16.mxu0 %v8066_v37 }
 0xaa3   :  { %4540 = vmatpush1.bf16.msra.mxu1 %v6480_v5  ;;  %6072 = vmatpush3.bf16.msra.mxu0 %v6483_v21 }
 0xaa4   :  { %4541 = vmatprep.subr.bf16.mxu1 %v6486_v11  ;;  %6073 = vmatprep.subr.bf16.mxu0 %v8066_v37 }
 0xaa5   :  { %v7940_v43 = vpop.f32.mrf.mxu0 }
 0xaa7   :  { %v6037_v48 = vpop.f32.mrf.mxu0  ;;  %4542 = vmatpush1.bf16.msra.mxu1 %v6484_v31  ;;  %6074 = vmatpush3.bf16.msra.mxu0 %v6487_v28 }
 0xaa8   :  { %6079 = vmatprep.subr.bf16.mxu0 %v8066_v37  ;;  %4768 = vmatprep.subr.bf16.mxu1 %v6490_v13 }
 0xaa9   :  { %v4072_v30 = vpop.f32.mrf.mxu0 }
 0xaaa   :  { %4560 = vmatmul.mubr.bf16.vlgmr.msra.gmra.mxu1 %v7900_v36  ;;  %6076 = vmatmul.mubr.bf16.vlgmr.msra.gmra.mxu0 %v7900_v36  ;;  %v6498_v36 = vld [vmem:[#allocation10 + $0x7c] ss:$12 sps:$4 sm:$0xff]  }
 0xaab   :  { %v6038_v55 = vpop.f32.mrf.mxu0  ;;  %4800 = vmatprep.mubr.bf16.mxu1 %v8067_v18  ;;  %6095 = vmatprep.mubr.msk.bf16.mxu0 %vm6835_vm0, %v8066_v37  ;;  %v6496_v18 = vld [vmem:[#allocation10 + $0x78] ss:$12 sps:$4 sm:$0xff]  }
 0xaac   :  { %4769 = vmatpush1.bf16.msra.mxu1 %v6488_v0  ;;  %6080 = vmatpush3.bf16.msra.mxu0 %v6491_v35 }
 0xaad   :  { %6081 = vmatprep.subr.bf16.mxu0 %v8066_v37  ;;  %4770 = vmatprep.subr.bf16.mxu1 %v6494_v2 }
 0xab0   :  { %4771 = vmatpush1.bf16.msra.mxu1 %v6492_v50  ;;  %6082 = vmatpush3.bf16.msra.mxu0 %v6495_v10 }
 0xab1   :  { %6083 = vmatprep.subr.bf16.mxu0 %v8066_v37  ;;  %4772 = vmatprep.subr.bf16.mxu1 %v6498_v36 }
 0xab4   :  { %4773 = vmatpush1.bf16.msra.mxu1 %v6496_v18  ;;  %6084 = vmatpush3.bf16.msra.mxu0 %v6499_v56 }
 0xab5   :  { %6085 = vmatprep.subr.bf16.mxu0 %v8066_v37  ;;  %4774 = vmatprep.subr.bf16.mxu1 %v6502_v29  ;;  %v6522_v29 = vld [vmem:[#allocation13 + $0x28] sm:$0xff]  }
 0xab8   :  { %4775 = vmatpush1.bf16.msra.mxu1 %v6500_v4  ;;  %6086 = vmatpush3.bf16.msra.mxu0 %v6503_v60  ;;  %v6521_v4 = vld [vmem:[#allocation13 + $0x30] sm:$0xff]   ;;  %v6524_v60 = vld [vmem:[#allocation13 + $0x18] sm:$0xff]  }
 0xab9   :  { %4776 = vmatprep.subr.bf16.mxu1 %v6506_v44  ;;  %6087 = vmatprep.subr.bf16.mxu0 %v8066_v37  ;;  %v6525_v44 = vld [vmem:[#allocation13 + $0x10] sm:$0xff]  }
 0xabc   :  { %4777 = vmatpush1.bf16.msra.mxu1 %v6504_v46  ;;  %6088 = vmatpush3.bf16.msra.mxu0 %v6507_v49  ;;  %v6526_v46 = vld [vmem:[#allocation13 + $0x8] sm:$0xff]   ;;  %v6527_v49 = vld [vmem:[#allocation13] sm:$0xff]  }
 0xabd   :  { %4778 = vmatprep.subr.bf16.mxu1 %v6510_v9  ;;  %6089 = vmatprep.subr.bf16.mxu0 %v8066_v37  ;;  %v4851_v9 = vld [vmem:[%s8009_s10] sm:$0x3] }
 0xac0   :  { %4779 = vmatpush1.bf16.msra.mxu1 %v6508_v58  ;;  %6090 = vmatpush3.bf16.msra.mxu0 %v6511_v6  ;;  %v4856_v58 = vrot.slane %v4851_v9, %v7158_v41  ;;  %v5455_v41 = vld [vmem:[%s8011_s12] ss:$0 sm:$0xff]  ;;  %s6837_s12 = smov [#allocation14]  }
 0xac1   :  { %4780 = vmatprep.subr.bf16.mxu1 %v6514_v57  ;;  %6091 = vmatprep.subr.bf16.mxu0 %v8066_v37 }
 0xac4   :  { %4781 = vmatpush1.bf16.msra.mxu1 %v6512_v16  ;;  %6092 = vmatpush3.bf16.msra.mxu0 %v6515_v17 }
 0xac5   :  { %4782 = vmatprep.subr.bf16.mxu1 %v6518_v63  ;;  %6093 = vmatprep.subr.bf16.mxu0 %v8066_v37 }
 0xac8   :  { %4783 = vmatpush1.bf16.msra.mxu1 %v6516_v38  ;;  %6094 = vmatpush3.bf16.msra.mxu0 %v6519_v25 }
 0xac9   :  { %6099 = vmatprep.subr.bf16.mxu1 %v8066_v37 }
 0xb4a   :  { %v4269_v59 = vpop.f32.mrf.mxu1  ;;  %v4310_v1 = vpop.f32.mrf.mxu0 }
 0xb4b   :  { %v4316_v27 = vadd.f32 %v4269_v59, %v7888_v54  ;;  %v5403_v54 = vld [vmem:[%s8006_s7] ss:$0 sm:$0xff]  ;;  %v4339_v48 = vadd.f32 %v5400_v22, %v4310_v1 }
 0xb4c   :  { %v4271_v32 = vpop.f32.mrf.mxu1  ;;  %v6057_v20 = vpop.f32.mrf.mxu0  ;;  %v4359_v21 = vadd.f32 %v5403_v54, %v7940_v43  ;;  %v6520_v43 = vld [vmem:[#allocation13 + $0x38] sm:$0xff]  }
 0xb4d   :  { %v4330_v23 = vadd.f32 %v4323_v15, %v4316_v27  ;;  %v4317_v26 = vadd.f32 %v4271_v32, %v7890_v14  ;;  %v4860_v27 = vrot.slane %v4851_v9, %v7167_v33 }
 0xb4e   :  { %v4273_v42 = vpop.f32.mrf.mxu1  ;;  %v4313_v45 = vpop.f32.mrf.mxu0 }
 0xb4f   :  { %v5401_v61 = vmul.f32 -1.442695, %v4330_v23  ;;  %v4331_v40 = vadd.f32 %v4327_v39, %v4317_v26  ;;  %v5452_v45 = vld [vmem:[%s8010_s11] ss:$0 sm:$0xff]  ;;  %s5018_s11 = sshll.u32 %s6837_s12, 4  ;;  %s5019_s11 = int_to_ptr.vmem [resolvable:$true] %s5018_s11 }
 0xb50   :  { %v4274_v24 = vpop.f32.mrf.mxu1  ;;  %v6058_v51 = vpop.f32.mrf.mxu0  ;;  %s6791_s21 = scalar_lea.vmem %s5019_s11, 128  ;;  %p6796_p8 = scmp.lt.s32.totalorder %s5019_s11, %s5019_s11 }
 0xb51   :  { %6608 = vpow2.f32 %v5401_v61  ;;  %v5402_v53 = vmul.f32 -1.442695, %v4331_v40  ;;  %p6792_p7 = scmp.ne.s32.totalorder %s5019_s11, %s6791_s21  ;;  %p6797_p9 = scmp.lt.s32.totalorder %s6791_s21, %s6791_s21 }
 0xb53   :  { %6610 = vpow2.f32 %v5402_v53  ;;  %p6798_p10 = por %p6797_p9, %p6796_p8 }
 0xb55   :  { %p6799_p11 = pnand %p6798_p10, %p6792_p7 }
 0xb5e   :  { %v6609_v8 = vpop.eup %6608 }
 0xb5f   :  { %v4346_v12 = vadd.f32 1.0, %v6609_v8 }
 0xb60   :  { %v6611_v5 = vpop.eup %6610 }
 0xb61   :  { %6612 = vrcp.f32 %v4346_v12  ;;  %v4347_v35 = vadd.f32 1.0, %v6611_v5 }
 0xb6a   :  { %v4561_v62 = vpop.f32.mrf.mxu1  ;;  %v7966_v34 = vpop.f32.mrf.mxu0 }
 0xb6b   :  { %v4892_v24 = vadd.f32 %v5455_v41, %v7966_v34 }
 0xb6c   :  { %v4563_v14 = vpop.f32.mrf.mxu1  ;;  %v6077_v3 = vpop.f32.mrf.mxu0 }
 0xb6e   :  { %v6613_v11 = vpop.eup %6612  ;;  %v4565_v31 = vpop.f32.mrf.mxu1 }
 0xb6f   :  { %v4605_v28 = vpop.f32.mrf.mxu0  ;;  %v4360_v30 = vmul.f32 %v6613_v11, %v4359_v21 }
 0xb70   :  { %v4566_v55 = vpop.f32.mrf.mxu1 }
 0xb71   :  { %v6078_v13 = vpop.f32.mrf.mxu0  ;;  %v4361_v0 = vadd.f32 %v4360_v30, %v4339_v48 }
 0xb73   :  { %6614 = vtanh.f32 %v4361_v0 }
 0xb74   :  { %6616 = vrcp.f32 %v4347_v35 }
 0xb80   :  { %v6615_v2 = vpop.eup %6614 }
 0xb81   :  { %v4363_v50 = vsub.f32 %v7845_v19, %v6615_v2  ;;  %v6617_v10 = vpop.eup %6616  ;;  %v6523_v19 = vld [vmem:[#allocation13 + $0x20] sm:$0xff]  }
 0xb83   :  { %v4364_v36 = vmul.f32 %v6617_v10, %v4363_v50 }
 0xb85   :  { %v4365_v18 = vadd.f32 %v6615_v2, %v4364_v36 }
 0xb87   :  { %v4366_v56 = vpack.c.bf16 %v4365_v18, %v4365_v18 }
 0xb89   :  { %4801 = vmatmul.mubr.bf16.vlgmr.msra.gmra.mxu1 %v4366_v56  ;;  %6096 = vmatmul.mubr.bf16.vlgmr.msra.gmra.mxu0 %v4366_v56 }
 0xb8a   :  { %6115 = vmatprep.mubr.msk.bf16.mxu1 %vm6835_vm0, %v8066_v37  ;;  %6100 = vmatpush3.bf16.msra.mxu1 %v6520_v43 }
 0xb8b   :  { %6101 = vmatprep.subr.bf16.mxu1 %v8066_v37 }
 0xb8e   :  { %6102 = vmatpush3.bf16.msra.mxu1 %v6521_v4 }
 0xb8f   :  { %6103 = vmatprep.subr.bf16.mxu1 %v8066_v37 }
 0xb92   :  { %6104 = vmatpush3.bf16.msra.mxu1 %v6522_v29 }
 0xb93   :  { %6105 = vmatprep.subr.bf16.mxu1 %v8066_v37 }
 0xb96   :  { %6106 = vmatpush3.bf16.msra.mxu1 %v6523_v19 }
 0xb97   :  { %6107 = vmatprep.subr.bf16.mxu1 %v8066_v37 }
 0xb9a   :  { %6108 = vmatpush3.bf16.msra.mxu1 %v6524_v60 }
 0xb9b   :  { %6109 = vmatprep.subr.bf16.mxu1 %v8066_v37 }
 0xb9e   :  { %6110 = vmatpush3.bf16.msra.mxu1 %v6525_v44 }
 0xb9f   :  { %6111 = vmatprep.subr.bf16.mxu1 %v8066_v37 }
 0xba2   :  { %6112 = vmatpush3.bf16.msra.mxu1 %v6526_v46 }
 0xba3   :  { %6113 = vmatprep.subr.bf16.mxu1 %v8066_v37 }
 0xba6   :  { %6114 = vmatpush3.bf16.msra.mxu1 %v6527_v49 }
 0xc49   :  { %v4802_v6 = vpop.f32.mrf.mxu1  ;;  %v4843_v57 = vpop.f32.mrf.mxu0 }
 0xc4a   :  { %v4849_v16 = vadd.f32 %v4802_v6, %v4561_v62  ;;  %v4872_v26 = vadd.f32 %v5452_v45, %v4843_v57 }
 0xc4b   :  { %v4804_v17 = vpop.f32.mrf.mxu1  ;;  %v6097_v63 = vpop.f32.mrf.mxu0 }
 0xc4c   :  { %v4863_v38 = vadd.f32 %v4856_v58, %v4849_v16  ;;  %v4850_v37 = vadd.f32 %v4804_v17, %v4563_v14 }
 0xc4d   :  { %v4806_v25 = vpop.f32.mrf.mxu1  ;;  %v4846_v7 = vpop.f32.mrf.mxu0 }
 0xc4e   :  { %v5453_v15 = vmul.f32 -1.442695, %v4863_v38  ;;  %v4864_v32 = vadd.f32 %v4860_v27, %v4850_v37 }
 0xc4f   :  { %v4807_v59 = vpop.f32.mrf.mxu1  ;;  %v6098_v1 = vpop.f32.mrf.mxu0 }
 0xc50   :  { %6618 = vpow2.f32 %v5453_v15  ;;  %v5454_v20 = vmul.f32 -1.442695, %v4864_v32 }
 0xc52   :  { %6620 = vpow2.f32 %v5454_v20 }
 0xc5d   :  { %v6619_v23 = vpop.eup %6618 }
 0xc5e   :  { %v4879_v42 = vadd.f32 1.0, %v6619_v23 }
 0xc5f   :  { %v6621_v61 = vpop.eup %6620 }
 0xc60   :  { %6622 = vrcp.f32 %v4879_v42  ;;  %v4880_v40 = vadd.f32 1.0, %v6621_v61 }
 0xc6d   :  { %v6623_v51 = vpop.eup %6622 }
 0xc6e   :  { %v4893_v33 = vmul.f32 %v6623_v51, %v4892_v24 }
 0xc70   :  { %v4894_v39 = vadd.f32 %v4893_v33, %v4872_v26 }
 0xc72   :  { %6624 = vtanh.f32 %v4894_v39 }
 0xc73   :  { %6626 = vrcp.f32 %v4880_v40 }
 0xc7f   :  { %v6625_v53 = vpop.eup %6624 }
 0xc80   :  { %v4896_v8 = vsub.f32 %v7896_v47, %v6625_v53  ;;  %v6627_v12 = vpop.eup %6626 }
 0xc82   :  { %v4897_v54 = vmul.f32 %v6627_v12, %v4896_v8 }
 0xc84   :  { %v4898_v62 = vadd.f32 %v6625_v53, %v4897_v54 }
 0xc86   :  { %v4899_v22 = vpack.c.bf16 %v4898_v62, %v4898_v62 }
 0xc88   :  { %6116 = vmatmul.mubr.bf16.vlgmr.msra.gmra.mxu1 %v4899_v22 }
 0xd48   :  { %v5005_v14 = vpop.f32.mrf.mxu1 }
 0xd49   :  { %v5006_v34 = vadd.f32 %v7927_v52, %v5005_v14 }
 0xd4a   :  { %v6117_v3 = vpop.f32.mrf.mxu1 }
 0xd4b   :  { %5011 = vst [vmem:[#allocation14 + $0x6] sm:$0x3] %v5006_v34 }
 0xd4c   :  { %v5008_v5 = vpop.f32.mrf.mxu1 }
 0xd4d   :  { %6802 = shalt.err (!%p6799_p11)
}
 0xd4e   :  { %5021 = dma.vmem_to_hbm [thread:$0]  %s5019_s11, 128, %s8014_s15, [#allocation4]   ;;  %v6118_v47 = vpop.f32.mrf.mxu1 }
 0xd4f   :  { %6819 = dma.done.wait [#allocation4], 128  }
 0xd50   :  { %6820 = vsyncadd [#allocation4], 4294967168 }
 0xd51   :  { %5025 = vsyncpa [#allocation3], 1 }
 0xd52   :  { %5026 = vsyncpa [#allocation6], 1 }
 0xd53   :  { %5027 = vsyncpa [#allocation9], 1 }
 0xd54   :  { %5028 = vsyncpa [#allocation12], 1 }
 0xd55   :  { %5029 = vsyncpa [#allocation4], 1 }

</bundles_post_ra>
